<compile_context>
chip_gen: v5e
topology: v5e:2x2
jax: 0.10.0
libtpu: 0.0.40
codegen_flags: <defaults>
</compile_context>

<pallas_src>
import math

import jax
import jax.numpy as jnp
from jax.experimental import pallas as pl
from jax.experimental.pallas import tpu as pltpu  # noqa: F401  (TPU backend assumed)

# ---------------------------------------------------------------------------
# Model hyperparameters (small, synthetic BERT)
# ---------------------------------------------------------------------------
B = 2              # batch per modality
S = 8              # sequence length
H = 32             # hidden size
NH = 4             # attention heads
DH = H // NH       # head dim
FF = 64            # FFN intermediate size
VOCAB = 100
N_LAYERS = 2
TEXT_SIZE = 16
CONTEXT_SIZE = 16
N_CLASSES = 12
LN_EPS = 1e-12

NB = 2 * B         # combined batch (text + context modalities)
ROWS = NB * S      # flattened activation rows
OUT_PAD = 128      # lane-dense padded output width
NEG_MASK = -1e9    # additive attention mask (kept in f32)
NEG_PAD = -1e30    # bias for padded logit lanes (softmax -> ~0)


# ---------------------------------------------------------------------------
# In-kernel helpers
# ---------------------------------------------------------------------------
def _layer_norm(x, g, b):
    mu = jnp.mean(x, axis=-1, keepdims=True)
    var = jnp.mean((x - mu) ** 2, axis=-1, keepdims=True)
    return (x - mu) * jax.lax.rsqrt(var + LN_EPS) * g + b


# ---------------------------------------------------------------------------
# Fused Pallas kernel: embeddings + 2 transformer layers (both modalities)
# + two-modal head, in a single invocation (no grid).
# ---------------------------------------------------------------------------
def fused_forward_kernel(ids_ref, amask_ref,
                         wemb_ref, pos_type_ref, elng_ref, elnb_ref,
                         wq_ref, bq_ref, wk_ref, bk_ref, wv_ref, bv_ref,
                         wo_ref, bo_ref, ln1g_ref, ln1b_ref,
                         w1_ref, b1_ref, w2_ref, b2_ref, ln2g_ref, ln2b_ref,
                         selt_ref, selc_ref,
                         wt_ref, bt_ref, wc_ref, bc_ref,
                         wot_ref, woc_ref, bout_ref,
                         out_ref):
    f32 = jnp.float32

    # ---- Embeddings: one-hot gather on the MXU + (pos + token-type) + LayerNorm
    ids = ids_ref[...]                                              # (ROWS, 1) int32
    vocab_iota = jax.lax.broadcasted_iota(jnp.int32, (ROWS, VOCAB), 1)
    onehot = (vocab_iota == ids).astype(f32)                        # (ROWS, VOCAB)
    x = jnp.dot(onehot, wemb_ref[...], preferred_element_type=f32)  # (ROWS, H)
    x = x + pos_type_ref[...]
    x = _layer_norm(x, elng_ref[...], elnb_ref[...])

    amask = amask_ref[...]                                          # (ROWS, ROWS)
    scale = 1.0 / math.sqrt(DH)

    # ---- Transformer encoder (static unroll over the 2 layers) ----
    for l in range(N_LAYERS):
        wq, bq = wq_ref[l], bq_ref[l]        # (NH,H,DH), (NH,1,DH)
        wk, bk = wk_ref[l], bk_ref[l]
        wv, bv = wv_ref[l], bv_ref[l]
        wo = wo_ref[l]                       # (NH,DH,H)

        attn = jnp.zeros((ROWS, H), f32)
        for h in range(NH):                  # static unroll; head-major weights,
            qh = jnp.dot(x, wq[h], preferred_element_type=f32) + bq[h]   # (ROWS,DH)
            kh = jnp.dot(x, wk[h], preferred_element_type=f32) + bk[h]
            vh = jnp.dot(x, wv[h], preferred_element_type=f32) + bv[h]
            s = jnp.dot(qh, kh.T, preferred_element_type=f32) * scale + amask
            m = jnp.max(s, axis=-1, keepdims=True)
            p = jnp.exp(s - m)
            denom = jnp.sum(p, axis=-1, keepdims=True)
            probs = p * pl.reciprocal(denom, approx=True)                # EUP rcp
            ctx = jnp.dot(probs, vh, preferred_element_type=f32)         # (ROWS,DH)
            attn = attn + jnp.dot(ctx, wo[h], preferred_element_type=f32)
        attn = attn + bo_ref[l]

        h1 = _layer_norm(x + attn, ln1g_ref[l], ln1b_ref[l])

        ff = jnp.dot(h1, w1_ref[l], preferred_element_type=f32) + b1_ref[l]
        # TODO(synk): PyTorch nn.GELU defaults to the exact erf form; tanh
        #             approximation is used here (tiny numerical difference).
        ff = jax.nn.gelu(ff, approximate=True)
        ff = jnp.dot(ff, w2_ref[l], preferred_element_type=f32) + b2_ref[l]
        x = _layer_norm(h1 + ff, ln2g_ref[l], ln2b_ref[l])

    # ---- Two-modal head ----
    # CLS extraction via one-hot selector matmuls (no sublane gathers).
    cls_t = jnp.dot(selt_ref[...], x, preferred_element_type=f32)   # (B, H)
    cls_c = jnp.dot(selc_ref[...], x, preferred_element_type=f32)   # (B, H)

    # dropout_text / dropout_context / dropout_last are identity in eval mode.
    mode_t = jnp.dot(cls_t, wt_ref[...], preferred_element_type=f32) + bt_ref[...]
    mode_c = jnp.dot(cls_c, wc_ref[...], preferred_element_type=f32) + bc_ref[...]

    # concat([mode_t, mode_c]) @ Wout == mode_t @ Wout_t + mode_c @ Wout_c
    logits = (jnp.dot(mode_t, wot_ref[...], preferred_element_type=f32)
              + jnp.dot(mode_c, woc_ref[...], preferred_element_type=f32)
              + bout_ref[...])                                      # (B, OUT_PAD)

    # Exact softmax over the lane-dense padded logits (pad lanes are ~ -1e30 -> 0).
    m = jnp.max(logits, axis=-1, keepdims=True)
    p = jnp.exp(logits - m)
    out_ref[...] = p / jnp.sum(p, axis=-1, keepdims=True)


# ---------------------------------------------------------------------------
# Wrapper: build kernel inputs (mask, ids) and run the single pallas_call.
# ---------------------------------------------------------------------------
def two_modal_forward(kp, text_ids, text_mask, ctx_ids, ctx_mask):
    # Stack modalities: text batch rows first, then context batch rows.
    ids_all = jnp.concatenate([text_ids, ctx_ids], axis=0).reshape(ROWS, 1)
    ids_all = ids_all.astype(jnp.int32)

    masks = jnp.concatenate([text_mask, ctx_mask], axis=0).reshape(ROWS)
    row_batch = jnp.arange(ROWS, dtype=jnp.int32) // S
    allowed = (row_batch[:, None] == row_batch[None, :]) & (masks[None, :] > 0)
    amask = jnp.where(allowed, 0.0, NEG_MASK).astype(jnp.float32)   # (ROWS, ROWS)

    out_pad = pl.pallas_call(
        fused_forward_kernel,
        out_shape=jax.ShapeDtypeStruct((B, OUT_PAD), jnp.float32),
    )(ids_all, amask,
      kp["wemb"], kp["pos_type"], kp["eln_g"], kp["eln_b"],
      kp["wq"], kp["bq"], kp["wk"], kp["bk"], kp["wv"], kp["bv"],
      kp["wo"], kp["bo"], kp["ln1g"], kp["ln1b"],
      kp["w1"], kp["b1"], kp["w2"], kp["b2"], kp["ln2g"], kp["ln2b"],
      kp["sel_t"], kp["sel_c"],
      kp["wt"], kp["bt"], kp["wc"], kp["bc"],
      kp["wout_t"], kp["wout_c"], kp["bout"])

    return out_pad[:, :N_CLASSES]


# ---------------------------------------------------------------------------
# Deterministic parameter init (torch-like layout)
# ---------------------------------------------------------------------------
def init_params(key):
    def nrm(k, shape, scale=0.02):
        return (scale * jax.random.normal(k, shape)).astype(jnp.float32)

    keys = iter(jax.random.split(key, 64))
    params = {
        "word_emb": nrm(next(keys), (VOCAB, H)),
        "pos_emb": nrm(next(keys), (S, H)),
        "type_emb": nrm(next(keys), (2, H)),
        "emb_ln_g": jnp.ones((1, H), jnp.float32),
        "emb_ln_b": jnp.zeros((1, H), jnp.float32),
        "layers": [],
    }
    for _ in range(N_LAYERS):
        params["layers"].append({
            "wq": nrm(next(keys), (H, H)), "bq": jnp.zeros((1, H), jnp.float32),
            "wk": nrm(next(keys), (H, H)), "bk": jnp.zeros((1, H), jnp.float32),
            "wv": nrm(next(keys), (H, H)), "bv": jnp.zeros((1, H), jnp.float32),
            "wo": nrm(next(keys), (H, H)), "bo": jnp.zeros((1, H), jnp.float32),
            "ln1g": jnp.ones((1, H), jnp.float32),
            "ln1b": jnp.zeros((1, H), jnp.float32),
            "w1": nrm(next(keys), (H, FF)), "b1": jnp.zeros((1, FF), jnp.float32),
            "w2": nrm(next(keys), (FF, H)), "b2": jnp.zeros((1, H), jnp.float32),
            "ln2g": jnp.ones((1, H), jnp.float32),
            "ln2b": jnp.zeros((1, H), jnp.float32),
        })
    params["head"] = {
        "wt": nrm(next(keys), (H, TEXT_SIZE)),
        "bt": jnp.zeros((1, TEXT_SIZE), jnp.float32),
        "wc": nrm(next(keys), (H, CONTEXT_SIZE)),
        "bc": jnp.zeros((1, CONTEXT_SIZE), jnp.float32),
        # linear_categorical_output weight split along its input axis
        # (equivalent to concat([mode_text, mode_ctx]) @ W):
        "wout_t": nrm(next(keys), (TEXT_SIZE, N_CLASSES)),
        "wout_c": nrm(next(keys), (CONTEXT_SIZE, N_CLASSES)),
        "bout": jnp.zeros((1, N_CLASSES), jnp.float32),
    }
    return params


# ---------------------------------------------------------------------------
# One-time host-side reshaping of params into kernel-ready layout:
#   * per-layer weights stacked along a leading layer axis,
#   * Q/K/V/O weights split head-major (no in-kernel lane slicing),
#   * pos + token-type embedding pre-tiled to the flat (ROWS, H) slab,
#   * head output weights padded lane-dense to 128 columns,
#   * CLS one-hot row selectors.
# ---------------------------------------------------------------------------
def prepare_kernel_params(params):
    L = N_LAYERS

    def stk(name):
        return jnp.stack([lp[name] for lp in params["layers"]], axis=0)

    kp = {}
    kp["wemb"] = params["word_emb"]                                   # (VOCAB, H)
    pos_type = params["pos_emb"] + params["type_emb"][0][None, :]     # (S, H)
    kp["pos_type"] = jnp.tile(pos_type, (NB, 1))                      # (ROWS, H)
    kp["eln_g"] = params["emb_ln_g"]
    kp["eln_b"] = params["emb_ln_b"]

    # attention: head-major splits
    kp["wq"] = stk("wq").reshape(L, H, NH, DH).transpose(0, 2, 1, 3)  # (L,NH,H,DH)
    kp["wk"] = stk("wk").reshape(L, H, NH, DH).transpose(0, 2, 1, 3)
    kp["wv"] = stk("wv").reshape(L, H, NH, DH).transpose(0, 2, 1, 3)
    kp["bq"] = stk("bq").reshape(L, 1, NH, DH).transpose(0, 2, 1, 3)  # (L,NH,1,DH)
    kp["bk"] = stk("bk").reshape(L, 1, NH, DH).transpose(0, 2, 1, 3)
    kp["bv"] = stk("bv").reshape(L, 1, NH, DH).transpose(0, 2, 1, 3)
    kp["wo"] = stk("wo").reshape(L, NH, DH, H)                        # (L,NH,DH,H)
    kp["bo"] = stk("bo")                                              # (L,1,H)
    kp["ln1g"] = stk("ln1g"); kp["ln1b"] = stk("ln1b")
    kp["w1"] = stk("w1"); kp["b1"] = stk("b1")
    kp["w2"] = stk("w2"); kp["b2"] = stk("b2")
    kp["ln2g"] = stk("ln2g"); kp["ln2b"] = stk("ln2b")

    # CLS selectors (text rows: b*S ; context rows: (B+b)*S)
    kp["sel_t"] = jax.nn.one_hot(jnp.arange(B) * S, ROWS, dtype=jnp.float32)
    kp["sel_c"] = jax.nn.one_hot((jnp.arange(B) + B) * S, ROWS, dtype=jnp.float32)

    # head: pad the output projection lane-dense to 128 columns
    hd = params["head"]
    kp["wt"] = hd["wt"]; kp["bt"] = hd["bt"]
    kp["wc"] = hd["wc"]; kp["bc"] = hd["bc"]
    kp["wout_t"] = jnp.zeros((TEXT_SIZE, OUT_PAD), jnp.float32
                             ).at[:, :N_CLASSES].set(hd["wout_t"])
    kp["wout_c"] = jnp.zeros((CONTEXT_SIZE, OUT_PAD), jnp.float32
                             ).at[:, :N_CLASSES].set(hd["wout_c"])
    kp["bout"] = jnp.full((1, OUT_PAD), NEG_PAD, jnp.float32
                          ).at[:, :N_CLASSES].set(hd["bout"])
    return kp


# ---------------------------------------------------------------------------
if __name__ == "__main__":
    key = jax.random.PRNGKey(0)
    kparam, k1, k2 = jax.random.split(key, 3)
    params = init_params(kparam)
    kp = prepare_kernel_params(params)

    text_input_ids = jax.random.randint(k1, (B, S), 0, VOCAB, dtype=jnp.int32)
    context_input_ids = jax.random.randint(k2, (B, S), 0, VOCAB, dtype=jnp.int32)
    text_attention_mask = jnp.array(
        [[1] * S, [1] * (S - 2) + [0, 0]], dtype=jnp.int32)
    context_attention_mask = jnp.array(
        [[1] * (S - 3) + [0, 0, 0], [1] * S], dtype=jnp.int32)

    fwd = jax.jit(two_modal_forward)
    out = fwd(kp, text_input_ids, text_attention_mask,
              context_input_ids, context_attention_mask)
    out = jax.block_until_ready(out)

    assert out.shape == (B, N_CLASSES), out.shape
    assert bool(jnp.all(jnp.isfinite(out)))
    # softmax rows must sum to 1
    assert bool(jnp.allclose(jnp.sum(out, axis=1), 1.0, atol=1e-5))
    print("KERNEL_OK")
</pallas_src>

<mosaic_0001>
module attributes {stable_mosaic.version = 11 : i64} {
  func.func @fused_forward_kernel(%arg0: memref<32x1xi32, #tpu.memory_space<vmem>>, %arg1: memref<32x32xf32, #tpu.memory_space<vmem>>, %arg2: memref<100x32xf32, #tpu.memory_space<vmem>>, %arg3: memref<32x32xf32, #tpu.memory_space<vmem>>, %arg4: memref<1x32xf32, #tpu.memory_space<vmem>>, %arg5: memref<1x32xf32, #tpu.memory_space<vmem>>, %arg6: memref<2x4x32x8xf32, #tpu.memory_space<vmem>>, %arg7: memref<2x4x1x8xf32, #tpu.memory_space<vmem>>, %arg8: memref<2x4x32x8xf32, #tpu.memory_space<vmem>>, %arg9: memref<2x4x1x8xf32, #tpu.memory_space<vmem>>, %arg10: memref<2x4x32x8xf32, #tpu.memory_space<vmem>>, %arg11: memref<2x4x1x8xf32, #tpu.memory_space<vmem>>, %arg12: memref<2x4x8x32xf32, #tpu.memory_space<vmem>>, %arg13: memref<2x1x32xf32, #tpu.memory_space<vmem>>, %arg14: memref<2x1x32xf32, #tpu.memory_space<vmem>>, %arg15: memref<2x1x32xf32, #tpu.memory_space<vmem>>, %arg16: memref<2x32x64xf32, #tpu.memory_space<vmem>>, %arg17: memref<2x1x64xf32, #tpu.memory_space<vmem>>, %arg18: memref<2x64x32xf32, #tpu.memory_space<vmem>>, %arg19: memref<2x1x32xf32, #tpu.memory_space<vmem>>, %arg20: memref<2x1x32xf32, #tpu.memory_space<vmem>>, %arg21: memref<2x1x32xf32, #tpu.memory_space<vmem>>, %arg22: memref<2x32xf32, #tpu.memory_space<vmem>>, %arg23: memref<2x32xf32, #tpu.memory_space<vmem>>, %arg24: memref<32x16xf32, #tpu.memory_space<vmem>>, %arg25: memref<1x16xf32, #tpu.memory_space<vmem>>, %arg26: memref<32x16xf32, #tpu.memory_space<vmem>>, %arg27: memref<1x16xf32, #tpu.memory_space<vmem>>, %arg28: memref<16x128xf32, #tpu.memory_space<vmem>>, %arg29: memref<16x128xf32, #tpu.memory_space<vmem>>, %arg30: memref<1x128xf32, #tpu.memory_space<vmem>>, %arg31: memref<2x128xf32, #tpu.memory_space<vmem>>) attributes {dimension_semantics = [], scalar_prefetch = 0 : i64, scratch_operands = 0 : i64, tpu.core_type = #tpu.core_type<tc>} {
    %c0 = arith.constant 0 : index
    %c0_0 = arith.constant 0 : index
    %0 = vector.load %arg0[%c0, %c0_0] : memref<32x1xi32, #tpu.memory_space<vmem>>, vector<32x1xi32>
    %1 = tpu.iota {dimensions = array<i32: 1>} : vector<32x100xi32>
    %2 = vector.broadcast %0 : vector<32x1xi32> to vector<32x100xi32>
    %3 = arith.cmpi eq, %1, %2 : vector<32x100xi32>
    %4 = arith.extui %3 : vector<32x100xi1> to vector<32x100xi32>
    %5 = arith.sitofp %4 : vector<32x100xi32> to vector<32x100xf32>
    %c0_1 = arith.constant 0 : index
    %c0_2 = arith.constant 0 : index
    %6 = vector.load %arg2[%c0_1, %c0_2] : memref<100x32xf32, #tpu.memory_space<vmem>>, vector<100x32xf32>
    %cst = arith.constant dense<0.000000e+00> : vector<32x32xf32>
    %7 = tpu.matmul %5, %6, %cst {dimension_numbers = #tpu.dot_dimension_numbers<[1], [0], [0], [1], [0, 0, 1, 1], [], []>} : vector<32x100xf32>, vector<100x32xf32>, vector<32x32xf32> -> vector<32x32xf32>
    %c0_3 = arith.constant 0 : index
    %c0_4 = arith.constant 0 : index
    %8 = vector.load %arg3[%c0_3, %c0_4] : memref<32x32xf32, #tpu.memory_space<vmem>>, vector<32x32xf32>
    %9 = arith.addf %7, %8 : vector<32x32xf32>
    %c0_5 = arith.constant 0 : index
    %c0_6 = arith.constant 0 : index
    %10 = vector.load %arg4[%c0_5, %c0_6] : memref<1x32xf32, #tpu.memory_space<vmem>>, vector<1x32xf32>
    %c0_7 = arith.constant 0 : index
    %c0_8 = arith.constant 0 : index
    %11 = vector.load %arg5[%c0_7, %c0_8] : memref<1x32xf32, #tpu.memory_space<vmem>>, vector<1x32xf32>
    %cst_9 = arith.constant dense<0.000000e+00> : vector<32xf32>
    %12 = vector.multi_reduction <add>, %9, %cst_9 [1] : vector<32x32xf32> to vector<32xf32>
    %13 = vector.shape_cast %12 : vector<32xf32> to vector<32x1xf32>
    %cst_10 = arith.constant 3.200000e+01 : f32
    %14 = vector.broadcast %cst_10 : f32 to vector<32x1xf32>
    %15 = arith.divf %13, %14 : vector<32x1xf32>
    %16 = vector.broadcast %15 : vector<32x1xf32> to vector<32x32xf32>
    %17 = arith.subf %9, %16 : vector<32x32xf32>
    %18 = arith.mulf %17, %17 : vector<32x32xf32>
    %cst_11 = arith.constant dense<0.000000e+00> : vector<32xf32>
    %19 = vector.multi_reduction <add>, %18, %cst_11 [1] : vector<32x32xf32> to vector<32xf32>
    %20 = vector.shape_cast %19 : vector<32xf32> to vector<32x1xf32>
    %cst_12 = arith.constant 3.200000e+01 : f32
    %21 = vector.broadcast %cst_12 : f32 to vector<32x1xf32>
    %22 = arith.divf %20, %21 : vector<32x1xf32>
    %23 = vector.broadcast %15 : vector<32x1xf32> to vector<32x32xf32>
    %24 = arith.subf %9, %23 : vector<32x32xf32>
    %cst_13 = arith.constant 9.99999996E-13 : f32
    %25 = vector.broadcast %cst_13 : f32 to vector<32x1xf32>
    %26 = arith.addf %22, %25 : vector<32x1xf32>
    %27 = math.rsqrt %26 : vector<32x1xf32>
    %28 = vector.broadcast %27 : vector<32x1xf32> to vector<32x32xf32>
    %29 = arith.mulf %24, %28 : vector<32x32xf32>
    %30 = vector.broadcast %10 : vector<1x32xf32> to vector<32x32xf32>
    %31 = arith.mulf %29, %30 : vector<32x32xf32>
    %32 = vector.broadcast %11 : vector<1x32xf32> to vector<32x32xf32>
    %33 = arith.addf %31, %32 : vector<32x32xf32>
    %c0_14 = arith.constant 0 : index
    %c0_15 = arith.constant 0 : index
    %34 = vector.load %arg1[%c0_14, %c0_15] : memref<32x32xf32, #tpu.memory_space<vmem>>, vector<32x32xf32>
    %c0_16 = arith.constant 0 : index
    %c0_17 = arith.constant 0 : index
    %c0_18 = arith.constant 0 : index
    %c0_19 = arith.constant 0 : index
    %35 = vector.load %arg6[%c0_16, %c0_17, %c0_18, %c0_19] : memref<2x4x32x8xf32, #tpu.memory_space<vmem>>, vector<1x4x32x8xf32>
    %36 = vector.shape_cast %35 : vector<1x4x32x8xf32> to vector<4x32x8xf32>
    %c0_20 = arith.constant 0 : index
    %c0_21 = arith.constant 0 : index
    %c0_22 = arith.constant 0 : index
    %c0_23 = arith.constant 0 : index
    %37 = vector.load %arg7[%c0_20, %c0_21, %c0_22, %c0_23] : memref<2x4x1x8xf32, #tpu.memory_space<vmem>>, vector<1x4x1x8xf32>
    %38 = vector.shape_cast %37 : vector<1x4x1x8xf32> to vector<4x1x8xf32>
    %c0_24 = arith.constant 0 : index
    %c0_25 = arith.constant 0 : index
    %c0_26 = arith.constant 0 : index
    %c0_27 = arith.constant 0 : index
    %39 = vector.load %arg8[%c0_24, %c0_25, %c0_26, %c0_27] : memref<2x4x32x8xf32, #tpu.memory_space<vmem>>, vector<1x4x32x8xf32>
    %40 = vector.shape_cast %39 : vector<1x4x32x8xf32> to vector<4x32x8xf32>
    %c0_28 = arith.constant 0 : index
    %c0_29 = arith.constant 0 : index
    %c0_30 = arith.constant 0 : index
    %c0_31 = arith.constant 0 : index
    %41 = vector.load %arg9[%c0_28, %c0_29, %c0_30, %c0_31] : memref<2x4x1x8xf32, #tpu.memory_space<vmem>>, vector<1x4x1x8xf32>
    %42 = vector.shape_cast %41 : vector<1x4x1x8xf32> to vector<4x1x8xf32>
    %c0_32 = arith.constant 0 : index
    %c0_33 = arith.constant 0 : index
    %c0_34 = arith.constant 0 : index
    %c0_35 = arith.constant 0 : index
    %43 = vector.load %arg10[%c0_32, %c0_33, %c0_34, %c0_35] : memref<2x4x32x8xf32, #tpu.memory_space<vmem>>, vector<1x4x32x8xf32>
    %44 = vector.shape_cast %43 : vector<1x4x32x8xf32> to vector<4x32x8xf32>
    %c0_36 = arith.constant 0 : index
    %c0_37 = arith.constant 0 : index
    %c0_38 = arith.constant 0 : index
    %c0_39 = arith.constant 0 : index
    %45 = vector.load %arg11[%c0_36, %c0_37, %c0_38, %c0_39] : memref<2x4x1x8xf32, #tpu.memory_space<vmem>>, vector<1x4x1x8xf32>
    %46 = vector.shape_cast %45 : vector<1x4x1x8xf32> to vector<4x1x8xf32>
    %c0_40 = arith.constant 0 : index
    %c0_41 = arith.constant 0 : index
    %c0_42 = arith.constant 0 : index
    %c0_43 = arith.constant 0 : index
    %47 = vector.load %arg12[%c0_40, %c0_41, %c0_42, %c0_43] : memref<2x4x8x32xf32, #tpu.memory_space<vmem>>, vector<1x4x8x32xf32>
    %48 = vector.shape_cast %47 : vector<1x4x8x32xf32> to vector<4x8x32xf32>
    %cst_44 = arith.constant 0.000000e+00 : f32
    %49 = vector.broadcast %cst_44 : f32 to vector<32x32xf32>
    %50 = vector.extract_strided_slice %36 {offsets = [0, 0, 0], sizes = [1, 32, 8], strides = [1, 1, 1]} : vector<4x32x8xf32> to vector<1x32x8xf32>
    %51 = vector.shape_cast %50 : vector<1x32x8xf32> to vector<32x8xf32>
    %cst_45 = arith.constant dense<0.000000e+00> : vector<32x8xf32>
    %52 = tpu.matmul %33, %51, %cst_45 {dimension_numbers = #tpu.dot_dimension_numbers<[1], [0], [0], [1], [0, 0, 1, 1], [], []>} : vector<32x32xf32>, vector<32x8xf32>, vector<32x8xf32> -> vector<32x8xf32>
    %53 = vector.extract_strided_slice %38 {offsets = [0, 0, 0], sizes = [1, 1, 8], strides = [1, 1, 1]} : vector<4x1x8xf32> to vector<1x1x8xf32>
    %54 = vector.shape_cast %53 : vector<1x1x8xf32> to vector<1x8xf32>
    %55 = vector.broadcast %54 : vector<1x8xf32> to vector<32x8xf32>
    %56 = arith.addf %52, %55 : vector<32x8xf32>
    %57 = vector.extract_strided_slice %40 {offsets = [0, 0, 0], sizes = [1, 32, 8], strides = [1, 1, 1]} : vector<4x32x8xf32> to vector<1x32x8xf32>
    %58 = vector.shape_cast %57 : vector<1x32x8xf32> to vector<32x8xf32>
    %cst_46 = arith.constant dense<0.000000e+00> : vector<32x8xf32>
    %59 = tpu.matmul %33, %58, %cst_46 {dimension_numbers = #tpu.dot_dimension_numbers<[1], [0], [0], [1], [0, 0, 1, 1], [], []>} : vector<32x32xf32>, vector<32x8xf32>, vector<32x8xf32> -> vector<32x8xf32>
    %60 = vector.extract_strided_slice %42 {offsets = [0, 0, 0], sizes = [1, 1, 8], strides = [1, 1, 1]} : vector<4x1x8xf32> to vector<1x1x8xf32>
    %61 = vector.shape_cast %60 : vector<1x1x8xf32> to vector<1x8xf32>
    %62 = vector.broadcast %61 : vector<1x8xf32> to vector<32x8xf32>
    %63 = arith.addf %59, %62 : vector<32x8xf32>
    %64 = vector.extract_strided_slice %44 {offsets = [0, 0, 0], sizes = [1, 32, 8], strides = [1, 1, 1]} : vector<4x32x8xf32> to vector<1x32x8xf32>
    %65 = vector.shape_cast %64 : vector<1x32x8xf32> to vector<32x8xf32>
    %cst_47 = arith.constant dense<0.000000e+00> : vector<32x8xf32>
    %66 = tpu.matmul %33, %65, %cst_47 {dimension_numbers = #tpu.dot_dimension_numbers<[1], [0], [0], [1], [0, 0, 1, 1], [], []>} : vector<32x32xf32>, vector<32x8xf32>, vector<32x8xf32> -> vector<32x8xf32>
    %67 = vector.extract_strided_slice %46 {offsets = [0, 0, 0], sizes = [1, 1, 8], strides = [1, 1, 1]} : vector<4x1x8xf32> to vector<1x1x8xf32>
    %68 = vector.shape_cast %67 : vector<1x1x8xf32> to vector<1x8xf32>
    %69 = vector.broadcast %68 : vector<1x8xf32> to vector<32x8xf32>
    %70 = arith.addf %66, %69 : vector<32x8xf32>
    %71 = tpu.transpose %63, [1, 0] : vector<32x8xf32> -> vector<8x32xf32>
    %cst_48 = arith.constant dense<0.000000e+00> : vector<32x32xf32>
    %72 = tpu.matmul %56, %71, %cst_48 {dimension_numbers = #tpu.dot_dimension_numbers<[1], [0], [0], [1], [0, 0, 1, 1], [], []>} : vector<32x8xf32>, vector<8x32xf32>, vector<32x32xf32> -> vector<32x32xf32>
    %cst_49 = arith.constant 0.353553385 : f32
    %73 = vector.broadcast %cst_49 : f32 to vector<32x32xf32>
    %74 = arith.mulf %72, %73 : vector<32x32xf32>
    %75 = arith.addf %74, %34 : vector<32x32xf32>
    %cst_50 = arith.constant dense<0xFF800000> : vector<32xf32>
    %76 = vector.multi_reduction <maximumf>, %75, %cst_50 [1] : vector<32x32xf32> to vector<32xf32>
    %77 = vector.shape_cast %76 : vector<32xf32> to vector<32x1xf32>
    %78 = vector.broadcast %77 : vector<32x1xf32> to vector<32x32xf32>
    %79 = arith.subf %75, %78 : vector<32x32xf32>
    %80 = math.exp %79 : vector<32x32xf32>
    %cst_51 = arith.constant dense<0.000000e+00> : vector<32xf32>
    %81 = vector.multi_reduction <add>, %80, %cst_51 [1] : vector<32x32xf32> to vector<32xf32>
    %82 = vector.shape_cast %81 : vector<32xf32> to vector<32x1xf32>
    %83 = tpu.reciprocal %82 {approx = true} : vector<32x1xf32> -> vector<32x1xf32>
    %84 = vector.broadcast %83 : vector<32x1xf32> to vector<32x32xf32>
    %85 = arith.mulf %80, %84 : vector<32x32xf32>
    %cst_52 = arith.constant dense<0.000000e+00> : vector<32x8xf32>
    %86 = tpu.matmul %85, %70, %cst_52 {dimension_numbers = #tpu.dot_dimension_numbers<[1], [0], [0], [1], [0, 0, 1, 1], [], []>} : vector<32x32xf32>, vector<32x8xf32>, vector<32x8xf32> -> vector<32x8xf32>
    %87 = vector.extract_strided_slice %48 {offsets = [0, 0, 0], sizes = [1, 8, 32], strides = [1, 1, 1]} : vector<4x8x32xf32> to vector<1x8x32xf32>
    %88 = vector.shape_cast %87 : vector<1x8x32xf32> to vector<8x32xf32>
    %cst_53 = arith.constant dense<0.000000e+00> : vector<32x32xf32>
    %89 = tpu.matmul %86, %88, %cst_53 {dimension_numbers = #tpu.dot_dimension_numbers<[1], [0], [0], [1], [0, 0, 1, 1], [], []>} : vector<32x8xf32>, vector<8x32xf32>, vector<32x32xf32> -> vector<32x32xf32>
    %90 = arith.addf %49, %89 : vector<32x32xf32>
    %91 = vector.extract_strided_slice %36 {offsets = [1, 0, 0], sizes = [1, 32, 8], strides = [1, 1, 1]} : vector<4x32x8xf32> to vector<1x32x8xf32>
    %92 = vector.shape_cast %91 : vector<1x32x8xf32> to vector<32x8xf32>
    %cst_54 = arith.constant dense<0.000000e+00> : vector<32x8xf32>
    %93 = tpu.matmul %33, %92, %cst_54 {dimension_numbers = #tpu.dot_dimension_numbers<[1], [0], [0], [1], [0, 0, 1, 1], [], []>} : vector<32x32xf32>, vector<32x8xf32>, vector<32x8xf32> -> vector<32x8xf32>
    %94 = vector.extract_strided_slice %38 {offsets = [1, 0, 0], sizes = [1, 1, 8], strides = [1, 1, 1]} : vector<4x1x8xf32> to vector<1x1x8xf32>
    %95 = vector.shape_cast %94 : vector<1x1x8xf32> to vector<1x8xf32>
    %96 = vector.broadcast %95 : vector<1x8xf32> to vector<32x8xf32>
    %97 = arith.addf %93, %96 : vector<32x8xf32>
    %98 = vector.extract_strided_slice %40 {offsets = [1, 0, 0], sizes = [1, 32, 8], strides = [1, 1, 1]} : vector<4x32x8xf32> to vector<1x32x8xf32>
    %99 = vector.shape_cast %98 : vector<1x32x8xf32> to vector<32x8xf32>
    %cst_55 = arith.constant dense<0.000000e+00> : vector<32x8xf32>
    %100 = tpu.matmul %33, %99, %cst_55 {dimension_numbers = #tpu.dot_dimension_numbers<[1], [0], [0], [1], [0, 0, 1, 1], [], []>} : vector<32x32xf32>, vector<32x8xf32>, vector<32x8xf32> -> vector<32x8xf32>
    %101 = vector.extract_strided_slice %42 {offsets = [1, 0, 0], sizes = [1, 1, 8], strides = [1, 1, 1]} : vector<4x1x8xf32> to vector<1x1x8xf32>
    %102 = vector.shape_cast %101 : vector<1x1x8xf32> to vector<1x8xf32>
    %103 = vector.broadcast %102 : vector<1x8xf32> to vector<32x8xf32>
    %104 = arith.addf %100, %103 : vector<32x8xf32>
    %105 = vector.extract_strided_slice %44 {offsets = [1, 0, 0], sizes = [1, 32, 8], strides = [1, 1, 1]} : vector<4x32x8xf32> to vector<1x32x8xf32>
    %106 = vector.shape_cast %105 : vector<1x32x8xf32> to vector<32x8xf32>
    %cst_56 = arith.constant dense<0.000000e+00> : vector<32x8xf32>
    %107 = tpu.matmul %33, %106, %cst_56 {dimension_numbers = #tpu.dot_dimension_numbers<[1], [0], [0], [1], [0, 0, 1, 1], [], []>} : vector<32x32xf32>, vector<32x8xf32>, vector<32x8xf32> -> vector<32x8xf32>
    %108 = vector.extract_strided_slice %46 {offsets = [1, 0, 0], sizes = [1, 1, 8], strides = [1, 1, 1]} : vector<4x1x8xf32> to vector<1x1x8xf32>
    %109 = vector.shape_cast %108 : vector<1x1x8xf32> to vector<1x8xf32>
    %110 = vector.broadcast %109 : vector<1x8xf32> to vector<32x8xf32>
    %111 = arith.addf %107, %110 : vector<32x8xf32>
    %112 = tpu.transpose %104, [1, 0] : vector<32x8xf32> -> vector<8x32xf32>
    %cst_57 = arith.constant dense<0.000000e+00> : vector<32x32xf32>
    %113 = tpu.matmul %97, %112, %cst_57 {dimension_numbers = #tpu.dot_dimension_numbers<[1], [0], [0], [1], [0, 0, 1, 1], [], []>} : vector<32x8xf32>, vector<8x32xf32>, vector<32x32xf32> -> vector<32x32xf32>
    %cst_58 = arith.constant 0.353553385 : f32
    %114 = vector.broadcast %cst_58 : f32 to vector<32x32xf32>
    %115 = arith.mulf %113, %114 : vector<32x32xf32>
    %116 = arith.addf %115, %34 : vector<32x32xf32>
    %cst_59 = arith.constant dense<0xFF800000> : vector<32xf32>
    %117 = vector.multi_reduction <maximumf>, %116, %cst_59 [1] : vector<32x32xf32> to vector<32xf32>
    %118 = vector.shape_cast %117 : vector<32xf32> to vector<32x1xf32>
    %119 = vector.broadcast %118 : vector<32x1xf32> to vector<32x32xf32>
    %120 = arith.subf %116, %119 : vector<32x32xf32>
    %121 = math.exp %120 : vector<32x32xf32>
    %cst_60 = arith.constant dense<0.000000e+00> : vector<32xf32>
    %122 = vector.multi_reduction <add>, %121, %cst_60 [1] : vector<32x32xf32> to vector<32xf32>
    %123 = vector.shape_cast %122 : vector<32xf32> to vector<32x1xf32>
    %124 = tpu.reciprocal %123 {approx = true} : vector<32x1xf32> -> vector<32x1xf32>
    %125 = vector.broadcast %124 : vector<32x1xf32> to vector<32x32xf32>
    %126 = arith.mulf %121, %125 : vector<32x32xf32>
    %cst_61 = arith.constant dense<0.000000e+00> : vector<32x8xf32>
    %127 = tpu.matmul %126, %111, %cst_61 {dimension_numbers = #tpu.dot_dimension_numbers<[1], [0], [0], [1], [0, 0, 1, 1], [], []>} : vector<32x32xf32>, vector<32x8xf32>, vector<32x8xf32> -> vector<32x8xf32>
    %128 = vector.extract_strided_slice %48 {offsets = [1, 0, 0], sizes = [1, 8, 32], strides = [1, 1, 1]} : vector<4x8x32xf32> to vector<1x8x32xf32>
    %129 = vector.shape_cast %128 : vector<1x8x32xf32> to vector<8x32xf32>
    %cst_62 = arith.constant dense<0.000000e+00> : vector<32x32xf32>
    %130 = tpu.matmul %127, %129, %cst_62 {dimension_numbers = #tpu.dot_dimension_numbers<[1], [0], [0], [1], [0, 0, 1, 1], [], []>} : vector<32x8xf32>, vector<8x32xf32>, vector<32x32xf32> -> vector<32x32xf32>
    %131 = arith.addf %90, %130 : vector<32x32xf32>
    %132 = vector.extract_strided_slice %36 {offsets = [2, 0, 0], sizes = [1, 32, 8], strides = [1, 1, 1]} : vector<4x32x8xf32> to vector<1x32x8xf32>
    %133 = vector.shape_cast %132 : vector<1x32x8xf32> to vector<32x8xf32>
    %cst_63 = arith.constant dense<0.000000e+00> : vector<32x8xf32>
    %134 = tpu.matmul %33, %133, %cst_63 {dimension_numbers = #tpu.dot_dimension_numbers<[1], [0], [0], [1], [0, 0, 1, 1], [], []>} : vector<32x32xf32>, vector<32x8xf32>, vector<32x8xf32> -> vector<32x8xf32>
    %135 = vector.extract_strided_slice %38 {offsets = [2, 0, 0], sizes = [1, 1, 8], strides = [1, 1, 1]} : vector<4x1x8xf32> to vector<1x1x8xf32>
    %136 = vector.shape_cast %135 : vector<1x1x8xf32> to vector<1x8xf32>
    %137 = vector.broadcast %136 : vector<1x8xf32> to vector<32x8xf32>
    %138 = arith.addf %134, %137 : vector<32x8xf32>
    %139 = vector.extract_strided_slice %40 {offsets = [2, 0, 0], sizes = [1, 32, 8], strides = [1, 1, 1]} : vector<4x32x8xf32> to vector<1x32x8xf32>
    %140 = vector.shape_cast %139 : vector<1x32x8xf32> to vector<32x8xf32>
    %cst_64 = arith.constant dense<0.000000e+00> : vector<32x8xf32>
    %141 = tpu.matmul %33, %140, %cst_64 {dimension_numbers = #tpu.dot_dimension_numbers<[1], [0], [0], [1], [0, 0, 1, 1], [], []>} : vector<32x32xf32>, vector<32x8xf32>, vector<32x8xf32> -> vector<32x8xf32>
    %142 = vector.extract_strided_slice %42 {offsets = [2, 0, 0], sizes = [1, 1, 8], strides = [1, 1, 1]} : vector<4x1x8xf32> to vector<1x1x8xf32>
    %143 = vector.shape_cast %142 : vector<1x1x8xf32> to vector<1x8xf32>
    %144 = vector.broadcast %143 : vector<1x8xf32> to vector<32x8xf32>
    %145 = arith.addf %141, %144 : vector<32x8xf32>
    %146 = vector.extract_strided_slice %44 {offsets = [2, 0, 0], sizes = [1, 32, 8], strides = [1, 1, 1]} : vector<4x32x8xf32> to vector<1x32x8xf32>
    %147 = vector.shape_cast %146 : vector<1x32x8xf32> to vector<32x8xf32>
    %cst_65 = arith.constant dense<0.000000e+00> : vector<32x8xf32>
    %148 = tpu.matmul %33, %147, %cst_65 {dimension_numbers = #tpu.dot_dimension_numbers<[1], [0], [0], [1], [0, 0, 1, 1], [], []>} : vector<32x32xf32>, vector<32x8xf32>, vector<32x8xf32> -> vector<32x8xf32>
    %149 = vector.extract_strided_slice %46 {offsets = [2, 0, 0], sizes = [1, 1, 8], strides = [1, 1, 1]} : vector<4x1x8xf32> to vector<1x1x8xf32>
    %150 = vector.shape_cast %149 : vector<1x1x8xf32> to vector<1x8xf32>
    %151 = vector.broadcast %150 : vector<1x8xf32> to vector<32x8xf32>
    %152 = arith.addf %148, %151 : vector<32x8xf32>
    %153 = tpu.transpose %145, [1, 0] : vector<32x8xf32> -> vector<8x32xf32>
    %cst_66 = arith.constant dense<0.000000e+00> : vector<32x32xf32>
    %154 = tpu.matmul %138, %153, %cst_66 {dimension_numbers = #tpu.dot_dimension_numbers<[1], [0], [0], [1], [0, 0, 1, 1], [], []>} : vector<32x8xf32>, vector<8x32xf32>, vector<32x32xf32> -> vector<32x32xf32>
    %cst_67 = arith.constant 0.353553385 : f32
    %155 = vector.broadcast %cst_67 : f32 to vector<32x32xf32>
    %156 = arith.mulf %154, %155 : vector<32x32xf32>
    %157 = arith.addf %156, %34 : vector<32x32xf32>
    %cst_68 = arith.constant dense<0xFF800000> : vector<32xf32>
    %158 = vector.multi_reduction <maximumf>, %157, %cst_68 [1] : vector<32x32xf32> to vector<32xf32>
    %159 = vector.shape_cast %158 : vector<32xf32> to vector<32x1xf32>
    %160 = vector.broadcast %159 : vector<32x1xf32> to vector<32x32xf32>
    %161 = arith.subf %157, %160 : vector<32x32xf32>
    %162 = math.exp %161 : vector<32x32xf32>
    %cst_69 = arith.constant dense<0.000000e+00> : vector<32xf32>
    %163 = vector.multi_reduction <add>, %162, %cst_69 [1] : vector<32x32xf32> to vector<32xf32>
    %164 = vector.shape_cast %163 : vector<32xf32> to vector<32x1xf32>
    %165 = tpu.reciprocal %164 {approx = true} : vector<32x1xf32> -> vector<32x1xf32>
    %166 = vector.broadcast %165 : vector<32x1xf32> to vector<32x32xf32>
    %167 = arith.mulf %162, %166 : vector<32x32xf32>
    %cst_70 = arith.constant dense<0.000000e+00> : vector<32x8xf32>
    %168 = tpu.matmul %167, %152, %cst_70 {dimension_numbers = #tpu.dot_dimension_numbers<[1], [0], [0], [1], [0, 0, 1, 1], [], []>} : vector<32x32xf32>, vector<32x8xf32>, vector<32x8xf32> -> vector<32x8xf32>
    %169 = vector.extract_strided_slice %48 {offsets = [2, 0, 0], sizes = [1, 8, 32], strides = [1, 1, 1]} : vector<4x8x32xf32> to vector<1x8x32xf32>
    %170 = vector.shape_cast %169 : vector<1x8x32xf32> to vector<8x32xf32>
    %cst_71 = arith.constant dense<0.000000e+00> : vector<32x32xf32>
    %171 = tpu.matmul %168, %170, %cst_71 {dimension_numbers = #tpu.dot_dimension_numbers<[1], [0], [0], [1], [0, 0, 1, 1], [], []>} : vector<32x8xf32>, vector<8x32xf32>, vector<32x32xf32> -> vector<32x32xf32>
    %172 = arith.addf %131, %171 : vector<32x32xf32>
    %173 = vector.extract_strided_slice %36 {offsets = [3, 0, 0], sizes = [1, 32, 8], strides = [1, 1, 1]} : vector<4x32x8xf32> to vector<1x32x8xf32>
    %174 = vector.shape_cast %173 : vector<1x32x8xf32> to vector<32x8xf32>
    %cst_72 = arith.constant dense<0.000000e+00> : vector<32x8xf32>
    %175 = tpu.matmul %33, %174, %cst_72 {dimension_numbers = #tpu.dot_dimension_numbers<[1], [0], [0], [1], [0, 0, 1, 1], [], []>} : vector<32x32xf32>, vector<32x8xf32>, vector<32x8xf32> -> vector<32x8xf32>
    %176 = vector.extract_strided_slice %38 {offsets = [3, 0, 0], sizes = [1, 1, 8], strides = [1, 1, 1]} : vector<4x1x8xf32> to vector<1x1x8xf32>
    %177 = vector.shape_cast %176 : vector<1x1x8xf32> to vector<1x8xf32>
    %178 = vector.broadcast %177 : vector<1x8xf32> to vector<32x8xf32>
    %179 = arith.addf %175, %178 : vector<32x8xf32>
    %180 = vector.extract_strided_slice %40 {offsets = [3, 0, 0], sizes = [1, 32, 8], strides = [1, 1, 1]} : vector<4x32x8xf32> to vector<1x32x8xf32>
    %181 = vector.shape_cast %180 : vector<1x32x8xf32> to vector<32x8xf32>
    %cst_73 = arith.constant dense<0.000000e+00> : vector<32x8xf32>
    %182 = tpu.matmul %33, %181, %cst_73 {dimension_numbers = #tpu.dot_dimension_numbers<[1], [0], [0], [1], [0, 0, 1, 1], [], []>} : vector<32x32xf32>, vector<32x8xf32>, vector<32x8xf32> -> vector<32x8xf32>
    %183 = vector.extract_strided_slice %42 {offsets = [3, 0, 0], sizes = [1, 1, 8], strides = [1, 1, 1]} : vector<4x1x8xf32> to vector<1x1x8xf32>
    %184 = vector.shape_cast %183 : vector<1x1x8xf32> to vector<1x8xf32>
    %185 = vector.broadcast %184 : vector<1x8xf32> to vector<32x8xf32>
    %186 = arith.addf %182, %185 : vector<32x8xf32>
    %187 = vector.extract_strided_slice %44 {offsets = [3, 0, 0], sizes = [1, 32, 8], strides = [1, 1, 1]} : vector<4x32x8xf32> to vector<1x32x8xf32>
    %188 = vector.shape_cast %187 : vector<1x32x8xf32> to vector<32x8xf32>
    %cst_74 = arith.constant dense<0.000000e+00> : vector<32x8xf32>
    %189 = tpu.matmul %33, %188, %cst_74 {dimension_numbers = #tpu.dot_dimension_numbers<[1], [0], [0], [1], [0, 0, 1, 1], [], []>} : vector<32x32xf32>, vector<32x8xf32>, vector<32x8xf32> -> vector<32x8xf32>
    %190 = vector.extract_strided_slice %46 {offsets = [3, 0, 0], sizes = [1, 1, 8], strides = [1, 1, 1]} : vector<4x1x8xf32> to vector<1x1x8xf32>
    %191 = vector.shape_cast %190 : vector<1x1x8xf32> to vector<1x8xf32>
    %192 = vector.broadcast %191 : vector<1x8xf32> to vector<32x8xf32>
    %193 = arith.addf %189, %192 : vector<32x8xf32>
    %194 = tpu.transpose %186, [1, 0] : vector<32x8xf32> -> vector<8x32xf32>
    %cst_75 = arith.constant dense<0.000000e+00> : vector<32x32xf32>
    %195 = tpu.matmul %179, %194, %cst_75 {dimension_numbers = #tpu.dot_dimension_numbers<[1], [0], [0], [1], [0, 0, 1, 1], [], []>} : vector<32x8xf32>, vector<8x32xf32>, vector<32x32xf32> -> vector<32x32xf32>
    %cst_76 = arith.constant 0.353553385 : f32
    %196 = vector.broadcast %cst_76 : f32 to vector<32x32xf32>
    %197 = arith.mulf %195, %196 : vector<32x32xf32>
    %198 = arith.addf %197, %34 : vector<32x32xf32>
    %cst_77 = arith.constant dense<0xFF800000> : vector<32xf32>
    %199 = vector.multi_reduction <maximumf>, %198, %cst_77 [1] : vector<32x32xf32> to vector<32xf32>
    %200 = vector.shape_cast %199 : vector<32xf32> to vector<32x1xf32>
    %201 = vector.broadcast %200 : vector<32x1xf32> to vector<32x32xf32>
    %202 = arith.subf %198, %201 : vector<32x32xf32>
    %203 = math.exp %202 : vector<32x32xf32>
    %cst_78 = arith.constant dense<0.000000e+00> : vector<32xf32>
    %204 = vector.multi_reduction <add>, %203, %cst_78 [1] : vector<32x32xf32> to vector<32xf32>
    %205 = vector.shape_cast %204 : vector<32xf32> to vector<32x1xf32>
    %206 = tpu.reciprocal %205 {approx = true} : vector<32x1xf32> -> vector<32x1xf32>
    %207 = vector.broadcast %206 : vector<32x1xf32> to vector<32x32xf32>
    %208 = arith.mulf %203, %207 : vector<32x32xf32>
    %cst_79 = arith.constant dense<0.000000e+00> : vector<32x8xf32>
    %209 = tpu.matmul %208, %193, %cst_79 {dimension_numbers = #tpu.dot_dimension_numbers<[1], [0], [0], [1], [0, 0, 1, 1], [], []>} : vector<32x32xf32>, vector<32x8xf32>, vector<32x8xf32> -> vector<32x8xf32>
    %210 = vector.extract_strided_slice %48 {offsets = [3, 0, 0], sizes = [1, 8, 32], strides = [1, 1, 1]} : vector<4x8x32xf32> to vector<1x8x32xf32>
    %211 = vector.shape_cast %210 : vector<1x8x32xf32> to vector<8x32xf32>
    %cst_80 = arith.constant dense<0.000000e+00> : vector<32x32xf32>
    %212 = tpu.matmul %209, %211, %cst_80 {dimension_numbers = #tpu.dot_dimension_numbers<[1], [0], [0], [1], [0, 0, 1, 1], [], []>} : vector<32x8xf32>, vector<8x32xf32>, vector<32x32xf32> -> vector<32x32xf32>
    %213 = arith.addf %172, %212 : vector<32x32xf32>
    %c0_81 = arith.constant 0 : index
    %c0_82 = arith.constant 0 : index
    %c0_83 = arith.constant 0 : index
    %214 = vector.load %arg13[%c0_81, %c0_82, %c0_83] : memref<2x1x32xf32, #tpu.memory_space<vmem>>, vector<1x1x32xf32>
    %215 = vector.shape_cast %214 : vector<1x1x32xf32> to vector<1x32xf32>
    %216 = vector.broadcast %215 : vector<1x32xf32> to vector<32x32xf32>
    %217 = arith.addf %213, %216 : vector<32x32xf32>
    %218 = arith.addf %33, %217 : vector<32x32xf32>
    %c0_84 = arith.constant 0 : index
    %c0_85 = arith.constant 0 : index
    %c0_86 = arith.constant 0 : index
    %219 = vector.load %arg14[%c0_84, %c0_85, %c0_86] : memref<2x1x32xf32, #tpu.memory_space<vmem>>, vector<1x1x32xf32>
    %220 = vector.shape_cast %219 : vector<1x1x32xf32> to vector<1x32xf32>
    %c0_87 = arith.constant 0 : index
    %c0_88 = arith.constant 0 : index
    %c0_89 = arith.constant 0 : index
    %221 = vector.load %arg15[%c0_87, %c0_88, %c0_89] : memref<2x1x32xf32, #tpu.memory_space<vmem>>, vector<1x1x32xf32>
    %222 = vector.shape_cast %221 : vector<1x1x32xf32> to vector<1x32xf32>
    %cst_90 = arith.constant dense<0.000000e+00> : vector<32xf32>
    %223 = vector.multi_reduction <add>, %218, %cst_90 [1] : vector<32x32xf32> to vector<32xf32>
    %224 = vector.shape_cast %223 : vector<32xf32> to vector<32x1xf32>
    %cst_91 = arith.constant 3.200000e+01 : f32
    %225 = vector.broadcast %cst_91 : f32 to vector<32x1xf32>
    %226 = arith.divf %224, %225 : vector<32x1xf32>
    %227 = vector.broadcast %226 : vector<32x1xf32> to vector<32x32xf32>
    %228 = arith.subf %218, %227 : vector<32x32xf32>
    %229 = arith.mulf %228, %228 : vector<32x32xf32>
    %cst_92 = arith.constant dense<0.000000e+00> : vector<32xf32>
    %230 = vector.multi_reduction <add>, %229, %cst_92 [1] : vector<32x32xf32> to vector<32xf32>
    %231 = vector.shape_cast %230 : vector<32xf32> to vector<32x1xf32>
    %cst_93 = arith.constant 3.200000e+01 : f32
    %232 = vector.broadcast %cst_93 : f32 to vector<32x1xf32>
    %233 = arith.divf %231, %232 : vector<32x1xf32>
    %234 = vector.broadcast %226 : vector<32x1xf32> to vector<32x32xf32>
    %235 = arith.subf %218, %234 : vector<32x32xf32>
    %cst_94 = arith.constant 9.99999996E-13 : f32
    %236 = vector.broadcast %cst_94 : f32 to vector<32x1xf32>
    %237 = arith.addf %233, %236 : vector<32x1xf32>
    %238 = math.rsqrt %237 : vector<32x1xf32>
    %239 = vector.broadcast %238 : vector<32x1xf32> to vector<32x32xf32>
    %240 = arith.mulf %235, %239 : vector<32x32xf32>
    %241 = vector.broadcast %220 : vector<1x32xf32> to vector<32x32xf32>
    %242 = arith.mulf %240, %241 : vector<32x32xf32>
    %243 = vector.broadcast %222 : vector<1x32xf32> to vector<32x32xf32>
    %244 = arith.addf %242, %243 : vector<32x32xf32>
    %c0_95 = arith.constant 0 : index
    %c0_96 = arith.constant 0 : index
    %c0_97 = arith.constant 0 : index
    %245 = vector.load %arg16[%c0_95, %c0_96, %c0_97] : memref<2x32x64xf32, #tpu.memory_space<vmem>>, vector<1x32x64xf32>
    %246 = vector.shape_cast %245 : vector<1x32x64xf32> to vector<32x64xf32>
    %cst_98 = arith.constant dense<0.000000e+00> : vector<32x64xf32>
    %247 = tpu.matmul %244, %246, %cst_98 {dimension_numbers = #tpu.dot_dimension_numbers<[1], [0], [0], [1], [0, 0, 1, 1], [], []>} : vector<32x32xf32>, vector<32x64xf32>, vector<32x64xf32> -> vector<32x64xf32>
    %c0_99 = arith.constant 0 : index
    %c0_100 = arith.constant 0 : index
    %c0_101 = arith.constant 0 : index
    %248 = vector.load %arg17[%c0_99, %c0_100, %c0_101] : memref<2x1x64xf32, #tpu.memory_space<vmem>>, vector<1x1x64xf32>
    %249 = vector.shape_cast %248 : vector<1x1x64xf32> to vector<1x64xf32>
    %250 = vector.broadcast %249 : vector<1x64xf32> to vector<32x64xf32>
    %251 = arith.addf %247, %250 : vector<32x64xf32>
    %252 = arith.mulf %251, %251 : vector<32x64xf32>
    %253 = arith.mulf %251, %252 : vector<32x64xf32>
    %cst_102 = arith.constant 4.471500e-02 : f32
    %254 = vector.broadcast %cst_102 : f32 to vector<32x64xf32>
    %255 = arith.mulf %254, %253 : vector<32x64xf32>
    %256 = arith.addf %251, %255 : vector<32x64xf32>
    %cst_103 = arith.constant 0.797884583 : f32
    %257 = vector.broadcast %cst_103 : f32 to vector<32x64xf32>
    %258 = arith.mulf %257, %256 : vector<32x64xf32>
    %259 = math.tanh %258 : vector<32x64xf32>
    %cst_104 = arith.constant 1.000000e+00 : f32
    %260 = vector.broadcast %cst_104 : f32 to vector<32x64xf32>
    %261 = arith.addf %260, %259 : vector<32x64xf32>
    %cst_105 = arith.constant 5.000000e-01 : f32
    %262 = vector.broadcast %cst_105 : f32 to vector<32x64xf32>
    %263 = arith.mulf %262, %261 : vector<32x64xf32>
    %264 = arith.mulf %251, %263 : vector<32x64xf32>
    %c0_106 = arith.constant 0 : index
    %c0_107 = arith.constant 0 : index
    %c0_108 = arith.constant 0 : index
    %265 = vector.load %arg18[%c0_106, %c0_107, %c0_108] : memref<2x64x32xf32, #tpu.memory_space<vmem>>, vector<1x64x32xf32>
    %266 = vector.shape_cast %265 : vector<1x64x32xf32> to vector<64x32xf32>
    %cst_109 = arith.constant dense<0.000000e+00> : vector<32x32xf32>
    %267 = tpu.matmul %264, %266, %cst_109 {dimension_numbers = #tpu.dot_dimension_numbers<[1], [0], [0], [1], [0, 0, 1, 1], [], []>} : vector<32x64xf32>, vector<64x32xf32>, vector<32x32xf32> -> vector<32x32xf32>
    %c0_110 = arith.constant 0 : index
    %c0_111 = arith.constant 0 : index
    %c0_112 = arith.constant 0 : index
    %268 = vector.load %arg19[%c0_110, %c0_111, %c0_112] : memref<2x1x32xf32, #tpu.memory_space<vmem>>, vector<1x1x32xf32>
    %269 = vector.shape_cast %268 : vector<1x1x32xf32> to vector<1x32xf32>
    %270 = vector.broadcast %269 : vector<1x32xf32> to vector<32x32xf32>
    %271 = arith.addf %267, %270 : vector<32x32xf32>
    %272 = arith.addf %244, %271 : vector<32x32xf32>
    %c0_113 = arith.constant 0 : index
    %c0_114 = arith.constant 0 : index
    %c0_115 = arith.constant 0 : index
    %273 = vector.load %arg20[%c0_113, %c0_114, %c0_115] : memref<2x1x32xf32, #tpu.memory_space<vmem>>, vector<1x1x32xf32>
    %274 = vector.shape_cast %273 : vector<1x1x32xf32> to vector<1x32xf32>
    %c0_116 = arith.constant 0 : index
    %c0_117 = arith.constant 0 : index
    %c0_118 = arith.constant 0 : index
    %275 = vector.load %arg21[%c0_116, %c0_117, %c0_118] : memref<2x1x32xf32, #tpu.memory_space<vmem>>, vector<1x1x32xf32>
    %276 = vector.shape_cast %275 : vector<1x1x32xf32> to vector<1x32xf32>
    %cst_119 = arith.constant dense<0.000000e+00> : vector<32xf32>
    %277 = vector.multi_reduction <add>, %272, %cst_119 [1] : vector<32x32xf32> to vector<32xf32>
    %278 = vector.shape_cast %277 : vector<32xf32> to vector<32x1xf32>
    %cst_120 = arith.constant 3.200000e+01 : f32
    %279 = vector.broadcast %cst_120 : f32 to vector<32x1xf32>
    %280 = arith.divf %278, %279 : vector<32x1xf32>
    %281 = vector.broadcast %280 : vector<32x1xf32> to vector<32x32xf32>
    %282 = arith.subf %272, %281 : vector<32x32xf32>
    %283 = arith.mulf %282, %282 : vector<32x32xf32>
    %cst_121 = arith.constant dense<0.000000e+00> : vector<32xf32>
    %284 = vector.multi_reduction <add>, %283, %cst_121 [1] : vector<32x32xf32> to vector<32xf32>
    %285 = vector.shape_cast %284 : vector<32xf32> to vector<32x1xf32>
    %cst_122 = arith.constant 3.200000e+01 : f32
    %286 = vector.broadcast %cst_122 : f32 to vector<32x1xf32>
    %287 = arith.divf %285, %286 : vector<32x1xf32>
    %288 = vector.broadcast %280 : vector<32x1xf32> to vector<32x32xf32>
    %289 = arith.subf %272, %288 : vector<32x32xf32>
    %cst_123 = arith.constant 9.99999996E-13 : f32
    %290 = vector.broadcast %cst_123 : f32 to vector<32x1xf32>
    %291 = arith.addf %287, %290 : vector<32x1xf32>
    %292 = math.rsqrt %291 : vector<32x1xf32>
    %293 = vector.broadcast %292 : vector<32x1xf32> to vector<32x32xf32>
    %294 = arith.mulf %289, %293 : vector<32x32xf32>
    %295 = vector.broadcast %274 : vector<1x32xf32> to vector<32x32xf32>
    %296 = arith.mulf %294, %295 : vector<32x32xf32>
    %297 = vector.broadcast %276 : vector<1x32xf32> to vector<32x32xf32>
    %298 = arith.addf %296, %297 : vector<32x32xf32>
    %c1 = arith.constant 1 : index
    %c0_124 = arith.constant 0 : index
    %c0_125 = arith.constant 0 : index
    %c0_126 = arith.constant 0 : index
    %299 = vector.load %arg6[%c1, %c0_124, %c0_125, %c0_126] : memref<2x4x32x8xf32, #tpu.memory_space<vmem>>, vector<1x4x32x8xf32>
    %300 = vector.shape_cast %299 : vector<1x4x32x8xf32> to vector<4x32x8xf32>
    %c1_127 = arith.constant 1 : index
    %c0_128 = arith.constant 0 : index
    %c0_129 = arith.constant 0 : index
    %c0_130 = arith.constant 0 : index
    %301 = vector.load %arg7[%c1_127, %c0_128, %c0_129, %c0_130] : memref<2x4x1x8xf32, #tpu.memory_space<vmem>>, vector<1x4x1x8xf32>
    %302 = vector.shape_cast %301 : vector<1x4x1x8xf32> to vector<4x1x8xf32>
    %c1_131 = arith.constant 1 : index
    %c0_132 = arith.constant 0 : index
    %c0_133 = arith.constant 0 : index
    %c0_134 = arith.constant 0 : index
    %303 = vector.load %arg8[%c1_131, %c0_132, %c0_133, %c0_134] : memref<2x4x32x8xf32, #tpu.memory_space<vmem>>, vector<1x4x32x8xf32>
    %304 = vector.shape_cast %303 : vector<1x4x32x8xf32> to vector<4x32x8xf32>
    %c1_135 = arith.constant 1 : index
    %c0_136 = arith.constant 0 : index
    %c0_137 = arith.constant 0 : index
    %c0_138 = arith.constant 0 : index
    %305 = vector.load %arg9[%c1_135, %c0_136, %c0_137, %c0_138] : memref<2x4x1x8xf32, #tpu.memory_space<vmem>>, vector<1x4x1x8xf32>
    %306 = vector.shape_cast %305 : vector<1x4x1x8xf32> to vector<4x1x8xf32>
    %c1_139 = arith.constant 1 : index
    %c0_140 = arith.constant 0 : index
    %c0_141 = arith.constant 0 : index
    %c0_142 = arith.constant 0 : index
    %307 = vector.load %arg10[%c1_139, %c0_140, %c0_141, %c0_142] : memref<2x4x32x8xf32, #tpu.memory_space<vmem>>, vector<1x4x32x8xf32>
    %308 = vector.shape_cast %307 : vector<1x4x32x8xf32> to vector<4x32x8xf32>
    %c1_143 = arith.constant 1 : index
    %c0_144 = arith.constant 0 : index
    %c0_145 = arith.constant 0 : index
    %c0_146 = arith.constant 0 : index
    %309 = vector.load %arg11[%c1_143, %c0_144, %c0_145, %c0_146] : memref<2x4x1x8xf32, #tpu.memory_space<vmem>>, vector<1x4x1x8xf32>
    %310 = vector.shape_cast %309 : vector<1x4x1x8xf32> to vector<4x1x8xf32>
    %c1_147 = arith.constant 1 : index
    %c0_148 = arith.constant 0 : index
    %c0_149 = arith.constant 0 : index
    %c0_150 = arith.constant 0 : index
    %311 = vector.load %arg12[%c1_147, %c0_148, %c0_149, %c0_150] : memref<2x4x8x32xf32, #tpu.memory_space<vmem>>, vector<1x4x8x32xf32>
    %312 = vector.shape_cast %311 : vector<1x4x8x32xf32> to vector<4x8x32xf32>
    %cst_151 = arith.constant 0.000000e+00 : f32
    %313 = vector.broadcast %cst_151 : f32 to vector<32x32xf32>
    %314 = vector.extract_strided_slice %300 {offsets = [0, 0, 0], sizes = [1, 32, 8], strides = [1, 1, 1]} : vector<4x32x8xf32> to vector<1x32x8xf32>
    %315 = vector.shape_cast %314 : vector<1x32x8xf32> to vector<32x8xf32>
    %cst_152 = arith.constant dense<0.000000e+00> : vector<32x8xf32>
    %316 = tpu.matmul %298, %315, %cst_152 {dimension_numbers = #tpu.dot_dimension_numbers<[1], [0], [0], [1], [0, 0, 1, 1], [], []>} : vector<32x32xf32>, vector<32x8xf32>, vector<32x8xf32> -> vector<32x8xf32>
    %317 = vector.extract_strided_slice %302 {offsets = [0, 0, 0], sizes = [1, 1, 8], strides = [1, 1, 1]} : vector<4x1x8xf32> to vector<1x1x8xf32>
    %318 = vector.shape_cast %317 : vector<1x1x8xf32> to vector<1x8xf32>
    %319 = vector.broadcast %318 : vector<1x8xf32> to vector<32x8xf32>
    %320 = arith.addf %316, %319 : vector<32x8xf32>
    %321 = vector.extract_strided_slice %304 {offsets = [0, 0, 0], sizes = [1, 32, 8], strides = [1, 1, 1]} : vector<4x32x8xf32> to vector<1x32x8xf32>
    %322 = vector.shape_cast %321 : vector<1x32x8xf32> to vector<32x8xf32>
    %cst_153 = arith.constant dense<0.000000e+00> : vector<32x8xf32>
    %323 = tpu.matmul %298, %322, %cst_153 {dimension_numbers = #tpu.dot_dimension_numbers<[1], [0], [0], [1], [0, 0, 1, 1], [], []>} : vector<32x32xf32>, vector<32x8xf32>, vector<32x8xf32> -> vector<32x8xf32>
    %324 = vector.extract_strided_slice %306 {offsets = [0, 0, 0], sizes = [1, 1, 8], strides = [1, 1, 1]} : vector<4x1x8xf32> to vector<1x1x8xf32>
    %325 = vector.shape_cast %324 : vector<1x1x8xf32> to vector<1x8xf32>
    %326 = vector.broadcast %325 : vector<1x8xf32> to vector<32x8xf32>
    %327 = arith.addf %323, %326 : vector<32x8xf32>
    %328 = vector.extract_strided_slice %308 {offsets = [0, 0, 0], sizes = [1, 32, 8], strides = [1, 1, 1]} : vector<4x32x8xf32> to vector<1x32x8xf32>
    %329 = vector.shape_cast %328 : vector<1x32x8xf32> to vector<32x8xf32>
    %cst_154 = arith.constant dense<0.000000e+00> : vector<32x8xf32>
    %330 = tpu.matmul %298, %329, %cst_154 {dimension_numbers = #tpu.dot_dimension_numbers<[1], [0], [0], [1], [0, 0, 1, 1], [], []>} : vector<32x32xf32>, vector<32x8xf32>, vector<32x8xf32> -> vector<32x8xf32>
    %331 = vector.extract_strided_slice %310 {offsets = [0, 0, 0], sizes = [1, 1, 8], strides = [1, 1, 1]} : vector<4x1x8xf32> to vector<1x1x8xf32>
    %332 = vector.shape_cast %331 : vector<1x1x8xf32> to vector<1x8xf32>
    %333 = vector.broadcast %332 : vector<1x8xf32> to vector<32x8xf32>
    %334 = arith.addf %330, %333 : vector<32x8xf32>
    %335 = tpu.transpose %327, [1, 0] : vector<32x8xf32> -> vector<8x32xf32>
    %cst_155 = arith.constant dense<0.000000e+00> : vector<32x32xf32>
    %336 = tpu.matmul %320, %335, %cst_155 {dimension_numbers = #tpu.dot_dimension_numbers<[1], [0], [0], [1], [0, 0, 1, 1], [], []>} : vector<32x8xf32>, vector<8x32xf32>, vector<32x32xf32> -> vector<32x32xf32>
    %cst_156 = arith.constant 0.353553385 : f32
    %337 = vector.broadcast %cst_156 : f32 to vector<32x32xf32>
    %338 = arith.mulf %336, %337 : vector<32x32xf32>
    %339 = arith.addf %338, %34 : vector<32x32xf32>
    %cst_157 = arith.constant dense<0xFF800000> : vector<32xf32>
    %340 = vector.multi_reduction <maximumf>, %339, %cst_157 [1] : vector<32x32xf32> to vector<32xf32>
    %341 = vector.shape_cast %340 : vector<32xf32> to vector<32x1xf32>
    %342 = vector.broadcast %341 : vector<32x1xf32> to vector<32x32xf32>
    %343 = arith.subf %339, %342 : vector<32x32xf32>
    %344 = math.exp %343 : vector<32x32xf32>
    %cst_158 = arith.constant dense<0.000000e+00> : vector<32xf32>
    %345 = vector.multi_reduction <add>, %344, %cst_158 [1] : vector<32x32xf32> to vector<32xf32>
    %346 = vector.shape_cast %345 : vector<32xf32> to vector<32x1xf32>
    %347 = tpu.reciprocal %346 {approx = true} : vector<32x1xf32> -> vector<32x1xf32>
    %348 = vector.broadcast %347 : vector<32x1xf32> to vector<32x32xf32>
    %349 = arith.mulf %344, %348 : vector<32x32xf32>
    %cst_159 = arith.constant dense<0.000000e+00> : vector<32x8xf32>
    %350 = tpu.matmul %349, %334, %cst_159 {dimension_numbers = #tpu.dot_dimension_numbers<[1], [0], [0], [1], [0, 0, 1, 1], [], []>} : vector<32x32xf32>, vector<32x8xf32>, vector<32x8xf32> -> vector<32x8xf32>
    %351 = vector.extract_strided_slice %312 {offsets = [0, 0, 0], sizes = [1, 8, 32], strides = [1, 1, 1]} : vector<4x8x32xf32> to vector<1x8x32xf32>
    %352 = vector.shape_cast %351 : vector<1x8x32xf32> to vector<8x32xf32>
    %cst_160 = arith.constant dense<0.000000e+00> : vector<32x32xf32>
    %353 = tpu.matmul %350, %352, %cst_160 {dimension_numbers = #tpu.dot_dimension_numbers<[1], [0], [0], [1], [0, 0, 1, 1], [], []>} : vector<32x8xf32>, vector<8x32xf32>, vector<32x32xf32> -> vector<32x32xf32>
    %354 = arith.addf %313, %353 : vector<32x32xf32>
    %355 = vector.extract_strided_slice %300 {offsets = [1, 0, 0], sizes = [1, 32, 8], strides = [1, 1, 1]} : vector<4x32x8xf32> to vector<1x32x8xf32>
    %356 = vector.shape_cast %355 : vector<1x32x8xf32> to vector<32x8xf32>
    %cst_161 = arith.constant dense<0.000000e+00> : vector<32x8xf32>
    %357 = tpu.matmul %298, %356, %cst_161 {dimension_numbers = #tpu.dot_dimension_numbers<[1], [0], [0], [1], [0, 0, 1, 1], [], []>} : vector<32x32xf32>, vector<32x8xf32>, vector<32x8xf32> -> vector<32x8xf32>
    %358 = vector.extract_strided_slice %302 {offsets = [1, 0, 0], sizes = [1, 1, 8], strides = [1, 1, 1]} : vector<4x1x8xf32> to vector<1x1x8xf32>
    %359 = vector.shape_cast %358 : vector<1x1x8xf32> to vector<1x8xf32>
    %360 = vector.broadcast %359 : vector<1x8xf32> to vector<32x8xf32>
    %361 = arith.addf %357, %360 : vector<32x8xf32>
    %362 = vector.extract_strided_slice %304 {offsets = [1, 0, 0], sizes = [1, 32, 8], strides = [1, 1, 1]} : vector<4x32x8xf32> to vector<1x32x8xf32>
    %363 = vector.shape_cast %362 : vector<1x32x8xf32> to vector<32x8xf32>
    %cst_162 = arith.constant dense<0.000000e+00> : vector<32x8xf32>
    %364 = tpu.matmul %298, %363, %cst_162 {dimension_numbers = #tpu.dot_dimension_numbers<[1], [0], [0], [1], [0, 0, 1, 1], [], []>} : vector<32x32xf32>, vector<32x8xf32>, vector<32x8xf32> -> vector<32x8xf32>
    %365 = vector.extract_strided_slice %306 {offsets = [1, 0, 0], sizes = [1, 1, 8], strides = [1, 1, 1]} : vector<4x1x8xf32> to vector<1x1x8xf32>
    %366 = vector.shape_cast %365 : vector<1x1x8xf32> to vector<1x8xf32>
    %367 = vector.broadcast %366 : vector<1x8xf32> to vector<32x8xf32>
    %368 = arith.addf %364, %367 : vector<32x8xf32>
    %369 = vector.extract_strided_slice %308 {offsets = [1, 0, 0], sizes = [1, 32, 8], strides = [1, 1, 1]} : vector<4x32x8xf32> to vector<1x32x8xf32>
    %370 = vector.shape_cast %369 : vector<1x32x8xf32> to vector<32x8xf32>
    %cst_163 = arith.constant dense<0.000000e+00> : vector<32x8xf32>
    %371 = tpu.matmul %298, %370, %cst_163 {dimension_numbers = #tpu.dot_dimension_numbers<[1], [0], [0], [1], [0, 0, 1, 1], [], []>} : vector<32x32xf32>, vector<32x8xf32>, vector<32x8xf32> -> vector<32x8xf32>
    %372 = vector.extract_strided_slice %310 {offsets = [1, 0, 0], sizes = [1, 1, 8], strides = [1, 1, 1]} : vector<4x1x8xf32> to vector<1x1x8xf32>
    %373 = vector.shape_cast %372 : vector<1x1x8xf32> to vector<1x8xf32>
    %374 = vector.broadcast %373 : vector<1x8xf32> to vector<32x8xf32>
    %375 = arith.addf %371, %374 : vector<32x8xf32>
    %376 = tpu.transpose %368, [1, 0] : vector<32x8xf32> -> vector<8x32xf32>
    %cst_164 = arith.constant dense<0.000000e+00> : vector<32x32xf32>
    %377 = tpu.matmul %361, %376, %cst_164 {dimension_numbers = #tpu.dot_dimension_numbers<[1], [0], [0], [1], [0, 0, 1, 1], [], []>} : vector<32x8xf32>, vector<8x32xf32>, vector<32x32xf32> -> vector<32x32xf32>
    %cst_165 = arith.constant 0.353553385 : f32
    %378 = vector.broadcast %cst_165 : f32 to vector<32x32xf32>
    %379 = arith.mulf %377, %378 : vector<32x32xf32>
    %380 = arith.addf %379, %34 : vector<32x32xf32>
    %cst_166 = arith.constant dense<0xFF800000> : vector<32xf32>
    %381 = vector.multi_reduction <maximumf>, %380, %cst_166 [1] : vector<32x32xf32> to vector<32xf32>
    %382 = vector.shape_cast %381 : vector<32xf32> to vector<32x1xf32>
    %383 = vector.broadcast %382 : vector<32x1xf32> to vector<32x32xf32>
    %384 = arith.subf %380, %383 : vector<32x32xf32>
    %385 = math.exp %384 : vector<32x32xf32>
    %cst_167 = arith.constant dense<0.000000e+00> : vector<32xf32>
    %386 = vector.multi_reduction <add>, %385, %cst_167 [1] : vector<32x32xf32> to vector<32xf32>
    %387 = vector.shape_cast %386 : vector<32xf32> to vector<32x1xf32>
    %388 = tpu.reciprocal %387 {approx = true} : vector<32x1xf32> -> vector<32x1xf32>
    %389 = vector.broadcast %388 : vector<32x1xf32> to vector<32x32xf32>
    %390 = arith.mulf %385, %389 : vector<32x32xf32>
    %cst_168 = arith.constant dense<0.000000e+00> : vector<32x8xf32>
    %391 = tpu.matmul %390, %375, %cst_168 {dimension_numbers = #tpu.dot_dimension_numbers<[1], [0], [0], [1], [0, 0, 1, 1], [], []>} : vector<32x32xf32>, vector<32x8xf32>, vector<32x8xf32> -> vector<32x8xf32>
    %392 = vector.extract_strided_slice %312 {offsets = [1, 0, 0], sizes = [1, 8, 32], strides = [1, 1, 1]} : vector<4x8x32xf32> to vector<1x8x32xf32>
    %393 = vector.shape_cast %392 : vector<1x8x32xf32> to vector<8x32xf32>
    %cst_169 = arith.constant dense<0.000000e+00> : vector<32x32xf32>
    %394 = tpu.matmul %391, %393, %cst_169 {dimension_numbers = #tpu.dot_dimension_numbers<[1], [0], [0], [1], [0, 0, 1, 1], [], []>} : vector<32x8xf32>, vector<8x32xf32>, vector<32x32xf32> -> vector<32x32xf32>
    %395 = arith.addf %354, %394 : vector<32x32xf32>
    %396 = vector.extract_strided_slice %300 {offsets = [2, 0, 0], sizes = [1, 32, 8], strides = [1, 1, 1]} : vector<4x32x8xf32> to vector<1x32x8xf32>
    %397 = vector.shape_cast %396 : vector<1x32x8xf32> to vector<32x8xf32>
    %cst_170 = arith.constant dense<0.000000e+00> : vector<32x8xf32>
    %398 = tpu.matmul %298, %397, %cst_170 {dimension_numbers = #tpu.dot_dimension_numbers<[1], [0], [0], [1], [0, 0, 1, 1], [], []>} : vector<32x32xf32>, vector<32x8xf32>, vector<32x8xf32> -> vector<32x8xf32>
    %399 = vector.extract_strided_slice %302 {offsets = [2, 0, 0], sizes = [1, 1, 8], strides = [1, 1, 1]} : vector<4x1x8xf32> to vector<1x1x8xf32>
    %400 = vector.shape_cast %399 : vector<1x1x8xf32> to vector<1x8xf32>
    %401 = vector.broadcast %400 : vector<1x8xf32> to vector<32x8xf32>
    %402 = arith.addf %398, %401 : vector<32x8xf32>
    %403 = vector.extract_strided_slice %304 {offsets = [2, 0, 0], sizes = [1, 32, 8], strides = [1, 1, 1]} : vector<4x32x8xf32> to vector<1x32x8xf32>
    %404 = vector.shape_cast %403 : vector<1x32x8xf32> to vector<32x8xf32>
    %cst_171 = arith.constant dense<0.000000e+00> : vector<32x8xf32>
    %405 = tpu.matmul %298, %404, %cst_171 {dimension_numbers = #tpu.dot_dimension_numbers<[1], [0], [0], [1], [0, 0, 1, 1], [], []>} : vector<32x32xf32>, vector<32x8xf32>, vector<32x8xf32> -> vector<32x8xf32>
    %406 = vector.extract_strided_slice %306 {offsets = [2, 0, 0], sizes = [1, 1, 8], strides = [1, 1, 1]} : vector<4x1x8xf32> to vector<1x1x8xf32>
    %407 = vector.shape_cast %406 : vector<1x1x8xf32> to vector<1x8xf32>
    %408 = vector.broadcast %407 : vector<1x8xf32> to vector<32x8xf32>
    %409 = arith.addf %405, %408 : vector<32x8xf32>
    %410 = vector.extract_strided_slice %308 {offsets = [2, 0, 0], sizes = [1, 32, 8], strides = [1, 1, 1]} : vector<4x32x8xf32> to vector<1x32x8xf32>
    %411 = vector.shape_cast %410 : vector<1x32x8xf32> to vector<32x8xf32>
    %cst_172 = arith.constant dense<0.000000e+00> : vector<32x8xf32>
    %412 = tpu.matmul %298, %411, %cst_172 {dimension_numbers = #tpu.dot_dimension_numbers<[1], [0], [0], [1], [0, 0, 1, 1], [], []>} : vector<32x32xf32>, vector<32x8xf32>, vector<32x8xf32> -> vector<32x8xf32>
    %413 = vector.extract_strided_slice %310 {offsets = [2, 0, 0], sizes = [1, 1, 8], strides = [1, 1, 1]} : vector<4x1x8xf32> to vector<1x1x8xf32>
    %414 = vector.shape_cast %413 : vector<1x1x8xf32> to vector<1x8xf32>
    %415 = vector.broadcast %414 : vector<1x8xf32> to vector<32x8xf32>
    %416 = arith.addf %412, %415 : vector<32x8xf32>
    %417 = tpu.transpose %409, [1, 0] : vector<32x8xf32> -> vector<8x32xf32>
    %cst_173 = arith.constant dense<0.000000e+00> : vector<32x32xf32>
    %418 = tpu.matmul %402, %417, %cst_173 {dimension_numbers = #tpu.dot_dimension_numbers<[1], [0], [0], [1], [0, 0, 1, 1], [], []>} : vector<32x8xf32>, vector<8x32xf32>, vector<32x32xf32> -> vector<32x32xf32>
    %cst_174 = arith.constant 0.353553385 : f32
    %419 = vector.broadcast %cst_174 : f32 to vector<32x32xf32>
    %420 = arith.mulf %418, %419 : vector<32x32xf32>
    %421 = arith.addf %420, %34 : vector<32x32xf32>
    %cst_175 = arith.constant dense<0xFF800000> : vector<32xf32>
    %422 = vector.multi_reduction <maximumf>, %421, %cst_175 [1] : vector<32x32xf32> to vector<32xf32>
    %423 = vector.shape_cast %422 : vector<32xf32> to vector<32x1xf32>
    %424 = vector.broadcast %423 : vector<32x1xf32> to vector<32x32xf32>
    %425 = arith.subf %421, %424 : vector<32x32xf32>
    %426 = math.exp %425 : vector<32x32xf32>
    %cst_176 = arith.constant dense<0.000000e+00> : vector<32xf32>
    %427 = vector.multi_reduction <add>, %426, %cst_176 [1] : vector<32x32xf32> to vector<32xf32>
    %428 = vector.shape_cast %427 : vector<32xf32> to vector<32x1xf32>
    %429 = tpu.reciprocal %428 {approx = true} : vector<32x1xf32> -> vector<32x1xf32>
    %430 = vector.broadcast %429 : vector<32x1xf32> to vector<32x32xf32>
    %431 = arith.mulf %426, %430 : vector<32x32xf32>
    %cst_177 = arith.constant dense<0.000000e+00> : vector<32x8xf32>
    %432 = tpu.matmul %431, %416, %cst_177 {dimension_numbers = #tpu.dot_dimension_numbers<[1], [0], [0], [1], [0, 0, 1, 1], [], []>} : vector<32x32xf32>, vector<32x8xf32>, vector<32x8xf32> -> vector<32x8xf32>
    %433 = vector.extract_strided_slice %312 {offsets = [2, 0, 0], sizes = [1, 8, 32], strides = [1, 1, 1]} : vector<4x8x32xf32> to vector<1x8x32xf32>
    %434 = vector.shape_cast %433 : vector<1x8x32xf32> to vector<8x32xf32>
    %cst_178 = arith.constant dense<0.000000e+00> : vector<32x32xf32>
    %435 = tpu.matmul %432, %434, %cst_178 {dimension_numbers = #tpu.dot_dimension_numbers<[1], [0], [0], [1], [0, 0, 1, 1], [], []>} : vector<32x8xf32>, vector<8x32xf32>, vector<32x32xf32> -> vector<32x32xf32>
    %436 = arith.addf %395, %435 : vector<32x32xf32>
    %437 = vector.extract_strided_slice %300 {offsets = [3, 0, 0], sizes = [1, 32, 8], strides = [1, 1, 1]} : vector<4x32x8xf32> to vector<1x32x8xf32>
    %438 = vector.shape_cast %437 : vector<1x32x8xf32> to vector<32x8xf32>
    %cst_179 = arith.constant dense<0.000000e+00> : vector<32x8xf32>
    %439 = tpu.matmul %298, %438, %cst_179 {dimension_numbers = #tpu.dot_dimension_numbers<[1], [0], [0], [1], [0, 0, 1, 1], [], []>} : vector<32x32xf32>, vector<32x8xf32>, vector<32x8xf32> -> vector<32x8xf32>
    %440 = vector.extract_strided_slice %302 {offsets = [3, 0, 0], sizes = [1, 1, 8], strides = [1, 1, 1]} : vector<4x1x8xf32> to vector<1x1x8xf32>
    %441 = vector.shape_cast %440 : vector<1x1x8xf32> to vector<1x8xf32>
    %442 = vector.broadcast %441 : vector<1x8xf32> to vector<32x8xf32>
    %443 = arith.addf %439, %442 : vector<32x8xf32>
    %444 = vector.extract_strided_slice %304 {offsets = [3, 0, 0], sizes = [1, 32, 8], strides = [1, 1, 1]} : vector<4x32x8xf32> to vector<1x32x8xf32>
    %445 = vector.shape_cast %444 : vector<1x32x8xf32> to vector<32x8xf32>
    %cst_180 = arith.constant dense<0.000000e+00> : vector<32x8xf32>
    %446 = tpu.matmul %298, %445, %cst_180 {dimension_numbers = #tpu.dot_dimension_numbers<[1], [0], [0], [1], [0, 0, 1, 1], [], []>} : vector<32x32xf32>, vector<32x8xf32>, vector<32x8xf32> -> vector<32x8xf32>
    %447 = vector.extract_strided_slice %306 {offsets = [3, 0, 0], sizes = [1, 1, 8], strides = [1, 1, 1]} : vector<4x1x8xf32> to vector<1x1x8xf32>
    %448 = vector.shape_cast %447 : vector<1x1x8xf32> to vector<1x8xf32>
    %449 = vector.broadcast %448 : vector<1x8xf32> to vector<32x8xf32>
    %450 = arith.addf %446, %449 : vector<32x8xf32>
    %451 = vector.extract_strided_slice %308 {offsets = [3, 0, 0], sizes = [1, 32, 8], strides = [1, 1, 1]} : vector<4x32x8xf32> to vector<1x32x8xf32>
    %452 = vector.shape_cast %451 : vector<1x32x8xf32> to vector<32x8xf32>
    %cst_181 = arith.constant dense<0.000000e+00> : vector<32x8xf32>
    %453 = tpu.matmul %298, %452, %cst_181 {dimension_numbers = #tpu.dot_dimension_numbers<[1], [0], [0], [1], [0, 0, 1, 1], [], []>} : vector<32x32xf32>, vector<32x8xf32>, vector<32x8xf32> -> vector<32x8xf32>
    %454 = vector.extract_strided_slice %310 {offsets = [3, 0, 0], sizes = [1, 1, 8], strides = [1, 1, 1]} : vector<4x1x8xf32> to vector<1x1x8xf32>
    %455 = vector.shape_cast %454 : vector<1x1x8xf32> to vector<1x8xf32>
    %456 = vector.broadcast %455 : vector<1x8xf32> to vector<32x8xf32>
    %457 = arith.addf %453, %456 : vector<32x8xf32>
    %458 = tpu.transpose %450, [1, 0] : vector<32x8xf32> -> vector<8x32xf32>
    %cst_182 = arith.constant dense<0.000000e+00> : vector<32x32xf32>
    %459 = tpu.matmul %443, %458, %cst_182 {dimension_numbers = #tpu.dot_dimension_numbers<[1], [0], [0], [1], [0, 0, 1, 1], [], []>} : vector<32x8xf32>, vector<8x32xf32>, vector<32x32xf32> -> vector<32x32xf32>
    %cst_183 = arith.constant 0.353553385 : f32
    %460 = vector.broadcast %cst_183 : f32 to vector<32x32xf32>
    %461 = arith.mulf %459, %460 : vector<32x32xf32>
    %462 = arith.addf %461, %34 : vector<32x32xf32>
    %cst_184 = arith.constant dense<0xFF800000> : vector<32xf32>
    %463 = vector.multi_reduction <maximumf>, %462, %cst_184 [1] : vector<32x32xf32> to vector<32xf32>
    %464 = vector.shape_cast %463 : vector<32xf32> to vector<32x1xf32>
    %465 = vector.broadcast %464 : vector<32x1xf32> to vector<32x32xf32>
    %466 = arith.subf %462, %465 : vector<32x32xf32>
    %467 = math.exp %466 : vector<32x32xf32>
    %cst_185 = arith.constant dense<0.000000e+00> : vector<32xf32>
    %468 = vector.multi_reduction <add>, %467, %cst_185 [1] : vector<32x32xf32> to vector<32xf32>
    %469 = vector.shape_cast %468 : vector<32xf32> to vector<32x1xf32>
    %470 = tpu.reciprocal %469 {approx = true} : vector<32x1xf32> -> vector<32x1xf32>
    %471 = vector.broadcast %470 : vector<32x1xf32> to vector<32x32xf32>
    %472 = arith.mulf %467, %471 : vector<32x32xf32>
    %cst_186 = arith.constant dense<0.000000e+00> : vector<32x8xf32>
    %473 = tpu.matmul %472, %457, %cst_186 {dimension_numbers = #tpu.dot_dimension_numbers<[1], [0], [0], [1], [0, 0, 1, 1], [], []>} : vector<32x32xf32>, vector<32x8xf32>, vector<32x8xf32> -> vector<32x8xf32>
    %474 = vector.extract_strided_slice %312 {offsets = [3, 0, 0], sizes = [1, 8, 32], strides = [1, 1, 1]} : vector<4x8x32xf32> to vector<1x8x32xf32>
    %475 = vector.shape_cast %474 : vector<1x8x32xf32> to vector<8x32xf32>
    %cst_187 = arith.constant dense<0.000000e+00> : vector<32x32xf32>
    %476 = tpu.matmul %473, %475, %cst_187 {dimension_numbers = #tpu.dot_dimension_numbers<[1], [0], [0], [1], [0, 0, 1, 1], [], []>} : vector<32x8xf32>, vector<8x32xf32>, vector<32x32xf32> -> vector<32x32xf32>
    %477 = arith.addf %436, %476 : vector<32x32xf32>
    %c1_188 = arith.constant 1 : index
    %c0_189 = arith.constant 0 : index
    %c0_190 = arith.constant 0 : index
    %478 = vector.load %arg13[%c1_188, %c0_189, %c0_190] : memref<2x1x32xf32, #tpu.memory_space<vmem>>, vector<1x1x32xf32>
    %479 = vector.shape_cast %478 : vector<1x1x32xf32> to vector<1x32xf32>
    %480 = vector.broadcast %479 : vector<1x32xf32> to vector<32x32xf32>
    %481 = arith.addf %477, %480 : vector<32x32xf32>
    %482 = arith.addf %298, %481 : vector<32x32xf32>
    %c1_191 = arith.constant 1 : index
    %c0_192 = arith.constant 0 : index
    %c0_193 = arith.constant 0 : index
    %483 = vector.load %arg14[%c1_191, %c0_192, %c0_193] : memref<2x1x32xf32, #tpu.memory_space<vmem>>, vector<1x1x32xf32>
    %484 = vector.shape_cast %483 : vector<1x1x32xf32> to vector<1x32xf32>
    %c1_194 = arith.constant 1 : index
    %c0_195 = arith.constant 0 : index
    %c0_196 = arith.constant 0 : index
    %485 = vector.load %arg15[%c1_194, %c0_195, %c0_196] : memref<2x1x32xf32, #tpu.memory_space<vmem>>, vector<1x1x32xf32>
    %486 = vector.shape_cast %485 : vector<1x1x32xf32> to vector<1x32xf32>
    %cst_197 = arith.constant dense<0.000000e+00> : vector<32xf32>
    %487 = vector.multi_reduction <add>, %482, %cst_197 [1] : vector<32x32xf32> to vector<32xf32>
    %488 = vector.shape_cast %487 : vector<32xf32> to vector<32x1xf32>
    %cst_198 = arith.constant 3.200000e+01 : f32
    %489 = vector.broadcast %cst_198 : f32 to vector<32x1xf32>
    %490 = arith.divf %488, %489 : vector<32x1xf32>
    %491 = vector.broadcast %490 : vector<32x1xf32> to vector<32x32xf32>
    %492 = arith.subf %482, %491 : vector<32x32xf32>
    %493 = arith.mulf %492, %492 : vector<32x32xf32>
    %cst_199 = arith.constant dense<0.000000e+00> : vector<32xf32>
    %494 = vector.multi_reduction <add>, %493, %cst_199 [1] : vector<32x32xf32> to vector<32xf32>
    %495 = vector.shape_cast %494 : vector<32xf32> to vector<32x1xf32>
    %cst_200 = arith.constant 3.200000e+01 : f32
    %496 = vector.broadcast %cst_200 : f32 to vector<32x1xf32>
    %497 = arith.divf %495, %496 : vector<32x1xf32>
    %498 = vector.broadcast %490 : vector<32x1xf32> to vector<32x32xf32>
    %499 = arith.subf %482, %498 : vector<32x32xf32>
    %cst_201 = arith.constant 9.99999996E-13 : f32
    %500 = vector.broadcast %cst_201 : f32 to vector<32x1xf32>
    %501 = arith.addf %497, %500 : vector<32x1xf32>
    %502 = math.rsqrt %501 : vector<32x1xf32>
    %503 = vector.broadcast %502 : vector<32x1xf32> to vector<32x32xf32>
    %504 = arith.mulf %499, %503 : vector<32x32xf32>
    %505 = vector.broadcast %484 : vector<1x32xf32> to vector<32x32xf32>
    %506 = arith.mulf %504, %505 : vector<32x32xf32>
    %507 = vector.broadcast %486 : vector<1x32xf32> to vector<32x32xf32>
    %508 = arith.addf %506, %507 : vector<32x32xf32>
    %c1_202 = arith.constant 1 : index
    %c0_203 = arith.constant 0 : index
    %c0_204 = arith.constant 0 : index
    %509 = vector.load %arg16[%c1_202, %c0_203, %c0_204] : memref<2x32x64xf32, #tpu.memory_space<vmem>>, vector<1x32x64xf32>
    %510 = vector.shape_cast %509 : vector<1x32x64xf32> to vector<32x64xf32>
    %cst_205 = arith.constant dense<0.000000e+00> : vector<32x64xf32>
    %511 = tpu.matmul %508, %510, %cst_205 {dimension_numbers = #tpu.dot_dimension_numbers<[1], [0], [0], [1], [0, 0, 1, 1], [], []>} : vector<32x32xf32>, vector<32x64xf32>, vector<32x64xf32> -> vector<32x64xf32>
    %c1_206 = arith.constant 1 : index
    %c0_207 = arith.constant 0 : index
    %c0_208 = arith.constant 0 : index
    %512 = vector.load %arg17[%c1_206, %c0_207, %c0_208] : memref<2x1x64xf32, #tpu.memory_space<vmem>>, vector<1x1x64xf32>
    %513 = vector.shape_cast %512 : vector<1x1x64xf32> to vector<1x64xf32>
    %514 = vector.broadcast %513 : vector<1x64xf32> to vector<32x64xf32>
    %515 = arith.addf %511, %514 : vector<32x64xf32>
    %516 = arith.mulf %515, %515 : vector<32x64xf32>
    %517 = arith.mulf %515, %516 : vector<32x64xf32>
    %cst_209 = arith.constant 4.471500e-02 : f32
    %518 = vector.broadcast %cst_209 : f32 to vector<32x64xf32>
    %519 = arith.mulf %518, %517 : vector<32x64xf32>
    %520 = arith.addf %515, %519 : vector<32x64xf32>
    %cst_210 = arith.constant 0.797884583 : f32
    %521 = vector.broadcast %cst_210 : f32 to vector<32x64xf32>
    %522 = arith.mulf %521, %520 : vector<32x64xf32>
    %523 = math.tanh %522 : vector<32x64xf32>
    %cst_211 = arith.constant 1.000000e+00 : f32
    %524 = vector.broadcast %cst_211 : f32 to vector<32x64xf32>
    %525 = arith.addf %524, %523 : vector<32x64xf32>
    %cst_212 = arith.constant 5.000000e-01 : f32
    %526 = vector.broadcast %cst_212 : f32 to vector<32x64xf32>
    %527 = arith.mulf %526, %525 : vector<32x64xf32>
    %528 = arith.mulf %515, %527 : vector<32x64xf32>
    %c1_213 = arith.constant 1 : index
    %c0_214 = arith.constant 0 : index
    %c0_215 = arith.constant 0 : index
    %529 = vector.load %arg18[%c1_213, %c0_214, %c0_215] : memref<2x64x32xf32, #tpu.memory_space<vmem>>, vector<1x64x32xf32>
    %530 = vector.shape_cast %529 : vector<1x64x32xf32> to vector<64x32xf32>
    %cst_216 = arith.constant dense<0.000000e+00> : vector<32x32xf32>
    %531 = tpu.matmul %528, %530, %cst_216 {dimension_numbers = #tpu.dot_dimension_numbers<[1], [0], [0], [1], [0, 0, 1, 1], [], []>} : vector<32x64xf32>, vector<64x32xf32>, vector<32x32xf32> -> vector<32x32xf32>
    %c1_217 = arith.constant 1 : index
    %c0_218 = arith.constant 0 : index
    %c0_219 = arith.constant 0 : index
    %532 = vector.load %arg19[%c1_217, %c0_218, %c0_219] : memref<2x1x32xf32, #tpu.memory_space<vmem>>, vector<1x1x32xf32>
    %533 = vector.shape_cast %532 : vector<1x1x32xf32> to vector<1x32xf32>
    %534 = vector.broadcast %533 : vector<1x32xf32> to vector<32x32xf32>
    %535 = arith.addf %531, %534 : vector<32x32xf32>
    %536 = arith.addf %508, %535 : vector<32x32xf32>
    %c1_220 = arith.constant 1 : index
    %c0_221 = arith.constant 0 : index
    %c0_222 = arith.constant 0 : index
    %537 = vector.load %arg20[%c1_220, %c0_221, %c0_222] : memref<2x1x32xf32, #tpu.memory_space<vmem>>, vector<1x1x32xf32>
    %538 = vector.shape_cast %537 : vector<1x1x32xf32> to vector<1x32xf32>
    %c1_223 = arith.constant 1 : index
    %c0_224 = arith.constant 0 : index
    %c0_225 = arith.constant 0 : index
    %539 = vector.load %arg21[%c1_223, %c0_224, %c0_225] : memref<2x1x32xf32, #tpu.memory_space<vmem>>, vector<1x1x32xf32>
    %540 = vector.shape_cast %539 : vector<1x1x32xf32> to vector<1x32xf32>
    %cst_226 = arith.constant dense<0.000000e+00> : vector<32xf32>
    %541 = vector.multi_reduction <add>, %536, %cst_226 [1] : vector<32x32xf32> to vector<32xf32>
    %542 = vector.shape_cast %541 : vector<32xf32> to vector<32x1xf32>
    %cst_227 = arith.constant 3.200000e+01 : f32
    %543 = vector.broadcast %cst_227 : f32 to vector<32x1xf32>
    %544 = arith.divf %542, %543 : vector<32x1xf32>
    %545 = vector.broadcast %544 : vector<32x1xf32> to vector<32x32xf32>
    %546 = arith.subf %536, %545 : vector<32x32xf32>
    %547 = arith.mulf %546, %546 : vector<32x32xf32>
    %cst_228 = arith.constant dense<0.000000e+00> : vector<32xf32>
    %548 = vector.multi_reduction <add>, %547, %cst_228 [1] : vector<32x32xf32> to vector<32xf32>
    %549 = vector.shape_cast %548 : vector<32xf32> to vector<32x1xf32>
    %cst_229 = arith.constant 3.200000e+01 : f32
    %550 = vector.broadcast %cst_229 : f32 to vector<32x1xf32>
    %551 = arith.divf %549, %550 : vector<32x1xf32>
    %552 = vector.broadcast %544 : vector<32x1xf32> to vector<32x32xf32>
    %553 = arith.subf %536, %552 : vector<32x32xf32>
    %cst_230 = arith.constant 9.99999996E-13 : f32
    %554 = vector.broadcast %cst_230 : f32 to vector<32x1xf32>
    %555 = arith.addf %551, %554 : vector<32x1xf32>
    %556 = math.rsqrt %555 : vector<32x1xf32>
    %557 = vector.broadcast %556 : vector<32x1xf32> to vector<32x32xf32>
    %558 = arith.mulf %553, %557 : vector<32x32xf32>
    %559 = vector.broadcast %538 : vector<1x32xf32> to vector<32x32xf32>
    %560 = arith.mulf %558, %559 : vector<32x32xf32>
    %561 = vector.broadcast %540 : vector<1x32xf32> to vector<32x32xf32>
    %562 = arith.addf %560, %561 : vector<32x32xf32>
    %c0_231 = arith.constant 0 : index
    %c0_232 = arith.constant 0 : index
    %563 = vector.load %arg22[%c0_231, %c0_232] : memref<2x32xf32, #tpu.memory_space<vmem>>, vector<2x32xf32>
    %cst_233 = arith.constant dense<0.000000e+00> : vector<2x32xf32>
    %564 = tpu.matmul %563, %562, %cst_233 {dimension_numbers = #tpu.dot_dimension_numbers<[1], [0], [0], [1], [0, 0, 1, 1], [], []>} : vector<2x32xf32>, vector<32x32xf32>, vector<2x32xf32> -> vector<2x32xf32>
    %c0_234 = arith.constant 0 : index
    %c0_235 = arith.constant 0 : index
    %565 = vector.load %arg23[%c0_234, %c0_235] : memref<2x32xf32, #tpu.memory_space<vmem>>, vector<2x32xf32>
    %cst_236 = arith.constant dense<0.000000e+00> : vector<2x32xf32>
    %566 = tpu.matmul %565, %562, %cst_236 {dimension_numbers = #tpu.dot_dimension_numbers<[1], [0], [0], [1], [0, 0, 1, 1], [], []>} : vector<2x32xf32>, vector<32x32xf32>, vector<2x32xf32> -> vector<2x32xf32>
    %c0_237 = arith.constant 0 : index
    %c0_238 = arith.constant 0 : index
    %567 = vector.load %arg24[%c0_237, %c0_238] : memref<32x16xf32, #tpu.memory_space<vmem>>, vector<32x16xf32>
    %cst_239 = arith.constant dense<0.000000e+00> : vector<2x16xf32>
    %568 = tpu.matmul %564, %567, %cst_239 {dimension_numbers = #tpu.dot_dimension_numbers<[1], [0], [0], [1], [0, 0, 1, 1], [], []>} : vector<2x32xf32>, vector<32x16xf32>, vector<2x16xf32> -> vector<2x16xf32>
    %c0_240 = arith.constant 0 : index
    %c0_241 = arith.constant 0 : index
    %569 = vector.load %arg25[%c0_240, %c0_241] : memref<1x16xf32, #tpu.memory_space<vmem>>, vector<1x16xf32>
    %570 = vector.broadcast %569 : vector<1x16xf32> to vector<2x16xf32>
    %571 = arith.addf %568, %570 : vector<2x16xf32>
    %c0_242 = arith.constant 0 : index
    %c0_243 = arith.constant 0 : index
    %572 = vector.load %arg26[%c0_242, %c0_243] : memref<32x16xf32, #tpu.memory_space<vmem>>, vector<32x16xf32>
    %cst_244 = arith.constant dense<0.000000e+00> : vector<2x16xf32>
    %573 = tpu.matmul %566, %572, %cst_244 {dimension_numbers = #tpu.dot_dimension_numbers<[1], [0], [0], [1], [0, 0, 1, 1], [], []>} : vector<2x32xf32>, vector<32x16xf32>, vector<2x16xf32> -> vector<2x16xf32>
    %c0_245 = arith.constant 0 : index
    %c0_246 = arith.constant 0 : index
    %574 = vector.load %arg27[%c0_245, %c0_246] : memref<1x16xf32, #tpu.memory_space<vmem>>, vector<1x16xf32>
    %575 = vector.broadcast %574 : vector<1x16xf32> to vector<2x16xf32>
    %576 = arith.addf %573, %575 : vector<2x16xf32>
    %c0_247 = arith.constant 0 : index
    %c0_248 = arith.constant 0 : index
    %577 = vector.load %arg28[%c0_247, %c0_248] : memref<16x128xf32, #tpu.memory_space<vmem>>, vector<16x128xf32>
    %cst_249 = arith.constant dense<0.000000e+00> : vector<2x128xf32>
    %578 = tpu.matmul %571, %577, %cst_249 {dimension_numbers = #tpu.dot_dimension_numbers<[1], [0], [0], [1], [0, 0, 1, 1], [], []>} : vector<2x16xf32>, vector<16x128xf32>, vector<2x128xf32> -> vector<2x128xf32>
    %c0_250 = arith.constant 0 : index
    %c0_251 = arith.constant 0 : index
    %579 = vector.load %arg29[%c0_250, %c0_251] : memref<16x128xf32, #tpu.memory_space<vmem>>, vector<16x128xf32>
    %cst_252 = arith.constant dense<0.000000e+00> : vector<2x128xf32>
    %580 = tpu.matmul %576, %579, %cst_252 {dimension_numbers = #tpu.dot_dimension_numbers<[1], [0], [0], [1], [0, 0, 1, 1], [], []>} : vector<2x16xf32>, vector<16x128xf32>, vector<2x128xf32> -> vector<2x128xf32>
    %581 = arith.addf %578, %580 : vector<2x128xf32>
    %c0_253 = arith.constant 0 : index
    %c0_254 = arith.constant 0 : index
    %582 = vector.load %arg30[%c0_253, %c0_254] : memref<1x128xf32, #tpu.memory_space<vmem>>, vector<1x128xf32>
    %583 = vector.broadcast %582 : vector<1x128xf32> to vector<2x128xf32>
    %584 = arith.addf %581, %583 : vector<2x128xf32>
    %cst_255 = arith.constant dense<0xFF800000> : vector<2xf32>
    %585 = vector.multi_reduction <maximumf>, %584, %cst_255 [1] : vector<2x128xf32> to vector<2xf32>
    %586 = vector.shape_cast %585 : vector<2xf32> to vector<2x1xf32>
    %587 = vector.broadcast %586 : vector<2x1xf32> to vector<2x128xf32>
    %588 = arith.subf %584, %587 : vector<2x128xf32>
    %589 = math.exp %588 : vector<2x128xf32>
    %cst_256 = arith.constant dense<0.000000e+00> : vector<2xf32>
    %590 = vector.multi_reduction <add>, %589, %cst_256 [1] : vector<2x128xf32> to vector<2xf32>
    %591 = vector.shape_cast %590 : vector<2xf32> to vector<2x1xf32>
    %592 = vector.broadcast %591 : vector<2x1xf32> to vector<2x128xf32>
    %593 = arith.divf %589, %592 : vector<2x128xf32>
    %c0_257 = arith.constant 0 : index
    %c0_258 = arith.constant 0 : index
    %594 = vector.load %arg31[%c0_257, %c0_258] : memref<2x128xf32, #tpu.memory_space<vmem>>, vector<2x128xf32>
    tpu.vector_store %arg31[%c0_257, %c0_258], %593 {strides = array<i32>} : memref<2x128xf32, #tpu.memory_space<vmem>>, vector<2x128xf32>,
    return
  }
}

</mosaic_0001>

<bundles_post_ra>
// kernel: two_modal_forward.1
= control target key start
LH: loop header
LB: loop body
LE: loop exit
PB: predicated region body
PF: predicated region fallthrough
CT: control target
= control target key end

     0   :  { %s4395_s6 = smov 1   ;;  %s4396_s10 = smov 2   ;;  %s5578_s0 = inlined_call_operand.smem [shape: u32[32], index: -1, kind: input, shape index: {}] }
   0x1   :  { %s4438_s5 = sld [smem:[%s5578_s0]]   ;;  %s4397_s14 = smov 3  }
   0x2   :  { %s4443_s9 = sld [smem:[%s5578_s0 + %s4395_s6]]   ;;  %s4398_s18 = smov 4  }
   0x3   :  { %s4448_s13 = sld [smem:[%s5578_s0 + %s4396_s10]]   ;;  %s4399_s22 = smov 5  }
   0x4   :  { %s4453_s17 = sld [smem:[%s5578_s0 + %s4397_s14]]   ;;  %s4400_s26 = smov 6  }
   0x5   :  { %s4458_s21 = sld [smem:[%s5578_s0 + %s4398_s18]]   ;;  %s4401_s30 = smov 7  }
   0x6   :  { %s4463_s25 = sld [smem:[%s5578_s0 + %s4399_s22]]   ;;  %s4402_s4 = smov 8  }
   0x7   :  { %s4468_s29 = sld [smem:[%s5578_s0 + %s4400_s26]]   ;;  %s4403_s10 = smov 9  }
   0x8   :  { %s4473_s3 = sld [smem:[%s5578_s0 + %s4401_s30]]   ;;  %s4404_s15 = smov 10  }
   0x9   :  { %s4478_s8 = sld [smem:[%s5578_s0 + %s4402_s4]]   ;;  %s4405_s20 = smov 11  }
   0xa   :  { %s4483_s14 = sld [smem:[%s5578_s0 + %s4403_s10]]   ;;  %s4406_s26 = smov 12  }
   0xb   :  { %s4488_s19 = sld [smem:[%s5578_s0 + %s4404_s15]]   ;;  %s4407_s1 = smov 13  }
   0xc   :  { %s4493_s24 = sld [smem:[%s5578_s0 + %s4405_s20]]   ;;  %s4408_s7 = smov 14  }
   0xd   :  { %s4498_s30 = sld [smem:[%s5578_s0 + %s4406_s26]]   ;;  %s4409_s15 = smov 15  }
   0xe   :  { %s4503_s6 = sld [smem:[%s5578_s0 + %s4407_s1]]   ;;  %s4410_s22 = smov 16  }
   0xf   :  { %s4508_s12 = sld [smem:[%s5578_s0 + %s4408_s7]]   ;;  %s4411_s28 = smov 17  }
  0x10   :  { %s4513_s20 = sld [smem:[%s5578_s0 + %s4409_s15]]   ;;  %s4412_s7 = smov 18  }
  0x11   :  { %s4518_s27 = sld [smem:[%s5578_s0 + %s4410_s22]]   ;;  %s4413_s15 = smov 19  }
  0x12   :  { %s4523_s4 = sld [smem:[%s5578_s0 + %s4411_s28]]   ;;  %s4414_s22 = smov 20  }
  0x13   :  { %s4415_s28 = smov 21  }
  0x15   :  { %5589 = sst [smem:[#allocation5_spill]] %s4508_s12 }
  0x16   :  { %5590 = sst [smem:[#allocation6_spill]] %s4513_s20 }
  0x17   :  { %5591 = sst [smem:[#allocation7_spill]] %s4518_s27 }
  0x18   :  { %5592 = sst [smem:[#allocation8_spill]] %s4523_s4 }
  0x19   :  { %s4528_s12 = sld [smem:[%s5578_s0 + %s4412_s7]]   ;;  %s4416_s7 = smov 22  }
  0x1a   :  { %s4533_s20 = sld [smem:[%s5578_s0 + %s4413_s15]]   ;;  %s4417_s15 = smov 23  }
  0x1b   :  { %s4538_s27 = sld [smem:[%s5578_s0 + %s4414_s22]]   ;;  %s4418_s22 = smov 24  }
  0x1c   :  { %s4543_s4 = sld [smem:[%s5578_s0 + %s4415_s28]]   ;;  %s4419_s28 = smov 25  }
  0x1f   :  { %5593 = sst [smem:[#allocation9_spill]] %s4528_s12 }
  0x20   :  { %5594 = sst [smem:[#allocation10_spill]] %s4533_s20 }
  0x21   :  { %5595 = sst [smem:[#allocation11_spill]] %s4538_s27 }
  0x22   :  { %5596 = sst [smem:[#allocation12_spill]] %s4543_s4 }
  0x23   :  { %s4548_s12 = sld [smem:[%s5578_s0 + %s4416_s7]]   ;;  %s4420_s7 = smov 26  }
  0x24   :  { %s4553_s20 = sld [smem:[%s5578_s0 + %s4417_s15]]   ;;  %s4421_s15 = smov 27  }
  0x25   :  { %s4558_s27 = sld [smem:[%s5578_s0 + %s4418_s22]]   ;;  %s4422_s22 = smov 28  }
  0x26   :  { %s4563_s4 = sld [smem:[%s5578_s0 + %s4419_s28]]   ;;  %s4423_s28 = smov 29  }
  0x29   :  { %5597 = sst [smem:[#allocation13_spill]] %s4548_s12 }
  0x2a   :  { %5598 = sst [smem:[#allocation14_spill]] %s4553_s20 }
  0x2b   :  { %5599 = sst [smem:[#allocation15_spill]] %s4558_s27 }
  0x2c   :  { %5600 = sst [smem:[#allocation16_spill]] %s4563_s4 }
  0x2d   :  { %s4568_s12 = sld [smem:[%s5578_s0 + %s4420_s7]]   ;;  %s4424_s7 = smov 30  }
  0x2e   :  { %s4573_s20 = sld [smem:[%s5578_s0 + %s4421_s15]]   ;;  %s4425_s15 = smov 31  }
  0x2f   :  { %s4578_s27 = sld [smem:[%s5578_s0 + %s4422_s22]]  }
  0x30   :  { %s4583_s4 = sld [smem:[%s5578_s0 + %s4423_s28]]  }
  0x33   :  { %5601 = sst [smem:[#allocation17_spill]] %s4568_s12 }
  0x34   :  { %5602 = sst [smem:[#allocation18_spill]] %s4573_s20 }
  0x35   :  { %s4588_s12 = sld [smem:[%s5578_s0 + %s4424_s7]]  }
  0x36   :  { %s4593_s20 = sld [smem:[%s5578_s0 + %s4425_s15]]  }
  0x37   :  { %v131_v0 = vld [vmem:[%s4438_s5] sm:$0xff]  ;;  %v133_v1 = vld [vmem:[%s4438_s5 + $0x10] sm:$0xff]  ;;  %vm191_vm0 = vcmask 1043456   ;;  %v4426_v2 = vmov 0   ;;  %v172_v4 = vld [vmem:[%s4448_s13 + $0x58] sm:$0xff] }
  0x38   :  { %4130 = vset.pattern.permute.xlu0 %v4426_v2  ;;  %4131 = vset.pattern.permute.xlu1 %v4426_v2  ;;  %v173_v3 = vld [vmem:[%s4448_s13 + $0x60] sm:$0xf]  ;;  %v171_v5 = vld [vmem:[%s4448_s13 + $0x50] sm:$0xff]  ;;  %v132_v6 = vld [vmem:[%s4438_s5 + $0x8] sm:$0xff] }
  0x39   :  { %138 = vperm.xlu0 %4130, %v131_v0   ;;  %144 = vperm.xlu1 %4131, %v133_v1   ;;  %v134_v7 = vld [vmem:[%s4438_s5 + $0x18] sm:$0xff]  ;;  %v170_v8 = vld [vmem:[%s4448_s13 + $0x48] sm:$0xff]  ;;  %v169_v9 = vld [vmem:[%s4448_s13 + $0x40] sm:$0xff] }
  0x3a   :  { %3757 = vmatpush.msk.msra.mxu0 %vm191_vm0, %v173_v3  ;;  %v168_v10 = vld [vmem:[%s4448_s13 + $0x38] sm:$0xff]  ;;  %v167_v11 = vld [vmem:[%s4448_s13 + $0x30] sm:$0xff]  ;;  %v166_v12 = vld [vmem:[%s4448_s13 + $0x28] sm:$0xff] }
  0x3b   :  { %v165_v13 = vld [vmem:[%s4448_s13 + $0x20] sm:$0xff]  ;;  %v164_v14 = vld [vmem:[%s4448_s13 + $0x18] sm:$0xff] }
  0x3c   :  { %199 = vmatpush.msra.mxu0 %v172_v4 }
  0x3e   :  { %200 = vmatpush.msra.mxu0 %v171_v5 }
  0x40   :  { %201 = vmatpush.msra.mxu0 %v170_v8 }
  0x41   :  { %141 = vperm.xlu0 %4130, %v132_v6   ;;  %147 = vperm.xlu1 %4131, %v134_v7  }
  0x42   :  { %202 = vmatpush.msra.mxu0 %v169_v9 }
  0x44   :  { %203 = vmatpush.msra.mxu0 %v168_v10 }
  0x46   :  { %204 = vmatpush.msra.mxu0 %v167_v11 }
  0x48   :  { %205 = vmatpush.msra.mxu0 %v166_v12 }
  0x4a   :  { %206 = vmatpush.msra.mxu0 %v165_v13 }
  0x4b   :  { %68 = vsyncpa [#allocation3], 0  ;;  %v163_v15 = vld [vmem:[%s4448_s13 + $0x10] sm:$0xff]  ;;  %v162_v16 = vld [vmem:[%s4448_s13 + $0x8] sm:$0xff]  ;;  %v135_v18 = vlaneseq  ;;  %vm178_vm1 = vcmask 818176   ;;  %v4427_v21 = vmov 0.0  }
  0x4c   :  { %207 = vmatpush.msra.mxu0 %v164_v14  ;;  %v161_v17 = vld [vmem:[%s4448_s13] sm:$0xff]  ;;  %vm226_vm6 = vcmask 261120   ;;  %v175_v33 = vld [vmem:[%s4453_s17 + $0x8] sm:$0xff]  ;;  %v176_v37 = vld [vmem:[%s4453_s17 + $0x10] sm:$0xff]  ;;  %v4428_v45 = vmov 32.0   ;;  %s5603_s0 = sld [smem:[#allocation7_spill]] }
  0x4d   :  { %v136_v19 = vand.u32 127, %v135_v18  ;;  %v174_v29 = vld [vmem:[%s4453_s17] sm:$0xff]  ;;  %v177_v41 = vld [vmem:[%s4453_s17 + $0x18] sm:$0xff]  ;;  %4175 = vrcp.f32 %v4428_v45  ;;  %v342_v11 = vld [vmem:[%s4468_s29 + $0x10] sm:$0xff]  ;;  %s5604_s5 = sld [smem:[#allocation5_spill]] }
  0x4e   :  { %208 = vmatpush.msra.mxu0 %v163_v15  ;;  %v343_v8 = vld [vmem:[%s4468_s29 + $0x18] sm:$0xff]  ;;  %v362_v12 = vld [vmem:[%s4478_s8 + $0x10] sm:$0xff]  ;;  %v341_v14 = vld [vmem:[%s4468_s29 + $0x8] sm:$0xff]  ;;  %s5605_s13 = sld [smem:[#allocation6_spill]] }
  0x4f   :  { %v363_v9 = vld [vmem:[%s4478_s8 + $0x18] sm:$0xff]  ;;  %v382_v13 = vld [vmem:[%s4488_s19 + $0x10] sm:$0xff]  ;;  %4091 = vmatpush.msra.mxu1 %v343_v8  ;;  %v361_v15 = vld [vmem:[%s4478_s8 + $0x8] sm:$0xff]  ;;  %s5606_s17 = sld [smem:[#allocation9_spill]] }
  0x50   :  { %209 = vmatpush.msra.mxu0 %v162_v16  ;;  %v383_v10 = vld [vmem:[%s4488_s19 + $0x18] sm:$0xff]  ;;  %463 = vmatpush.msra.mxu2 %v363_v9  ;;  %v381_v16 = vld [vmem:[%s4488_s19 + $0x8] sm:$0xff]  ;;  %v360_v18 = vld [vmem:[%s4478_s8] sm:$0xff]  ;;  %s5609_s22 = sld [smem:[#allocation11_spill]] }
  0x51   :  { %495 = vmatpush.msra.mxu3 %v383_v10  ;;  %4092 = vmatpush.msra.mxu1 %v342_v11  ;;  %v346_v45 = vld [vmem:[%s4468_s29 + $0x30] sm:$0xff]  ;;  %s5610_s23 = sld [smem:[#allocation12_spill]] }
  0x52   :  { %210 = vmatpush.msra.mxu0 %v161_v17  ;;  %464 = vmatpush.msra.mxu2 %v362_v12  ;;  %v340_v17 = vld [vmem:[%s4468_s29] sm:$0xff] }
  0x53   :  { %v4176_v46 = vpop.eup %4175  ;;  %496 = vmatpush.msra.mxu3 %v382_v13  ;;  %4093 = vmatpush.msra.mxu1 %v341_v14 }
  0x54   :  { %v240_v47 = vmul.f32 32.0, %v4176_v46  ;;  %vm244_vm7 = vweird.f32 %v4176_v46  ;;  %431 = vmatpush.msrb.mxu0 %v343_v8  ;;  %465 = vmatpush.msra.mxu2 %v361_v15 }
  0x55   :  { %497 = vmatpush.msra.mxu3 %v381_v16  ;;  %4094 = vmatpush.msra.mxu1 %v340_v17 }
  0x56   :  { %v241_v48 = vsub.f32 1.0, %v240_v47  ;;  %432 = vmatpush.msrb.mxu0 %v342_v11  ;;  %466 = vmatpush.msra.mxu2 %v360_v18 }
  0x58   :  { %v242_v49 = vmul.f32 %v4176_v46, %v241_v48  ;;  %433 = vmatpush.msrb.mxu0 %v341_v14 }
  0x5a   :  { %v243_v50 = vadd.f32 %v4176_v46, %v242_v49  ;;  %434 = vmatpush.msrb.mxu0 %v340_v17 }
  0x5c   :  { %v4624_v51 = vsel %vm244_vm7, %v4176_v46, %v243_v50  ;;  %v4133_v46 = vld [vmem:[%s4463_s25] ss:$0 sm:$0xff]  ;;  %v345_v50 = vld [vmem:[%s4468_s29 + $0x28] sm:$0xff]  ;;  %s5608_s25 = sld [smem:[#allocation10_spill]] }
  0xab   :  { %v139_v20 = vpop.permute.xlu0 %138  ;;  %v145_v24 = vpop.permute.xlu1 %144 }
  0xac   :  { %vm149_vm2 = vcmp.eq.s32.totalorder %v136_v19, %v139_v20  ;;  %vm151_vm4 = vcmp.eq.s32.totalorder %v136_v19, %v145_v24  ;;  %v367_v20 = vld [vmem:[%s4478_s8 + $0x38] sm:$0xff]  ;;  %v365_v24 = vld [vmem:[%s4478_s8 + $0x28] sm:$0xff] }
  0xad   :  { %v3753_v22 = vsel %vm149_vm2, 1.0, %v4427_v21  ;;  %v3755_v26 = vsel %vm151_vm4, 1.0, %v4427_v21  ;;  %vm512_vm4 = vcmask 64512  }
  0xae   :  { %3758 = vmatmul.msk.f32.vlgmr.msra.gmra.mxu0 %vm178_vm1, %v3753_v22  ;;  %v366_v22 = vld [vmem:[%s4478_s8 + $0x30] sm:$0xff] }
  0xaf   :  { %706 = vmatpush.msra.mxu0 %v367_v20 }
  0xb1   :  { %707 = vmatpush.msra.mxu0 %v366_v22 }
  0xb3   :  { %v142_v23 = vpop.permute.xlu0 %141  ;;  %v148_v27 = vpop.permute.xlu1 %147  ;;  %708 = vmatpush.msra.mxu0 %v365_v24 }
  0xb4   :  { %vm150_vm3 = vcmp.eq.s32.totalorder %v136_v19, %v142_v23  ;;  %vm152_vm5 = vcmp.eq.s32.totalorder %v136_v19, %v148_v27  ;;  %v380_v19 = vld [vmem:[%s4488_s19] sm:$0xff] }
  0xb5   :  { %v3754_v25 = vsel %vm150_vm3, 1.0, %v4427_v21  ;;  %v3756_v28 = vsel %vm152_vm5, 1.0, %v4427_v21  ;;  %498 = vmatpush.msra.mxu3 %v380_v19 }
  0xb6   :  { %3759 = vmatmul.msk.f32.gmra.mxu0 %vm178_vm1, %v3754_v25 }
  0xbe   :  { %3760 = vmatmul.msk.f32.gmra.mxu0 %vm178_vm1, %v3755_v26  ;;  %v364_v26 = vld [vmem:[%s4478_s8 + $0x20] sm:$0xff] }
  0xbf   :  { %709 = vmatpush.msra.mxu0 %v364_v26 }
  0xc6   :  { %3761 = vmatmul.msk.f32.gmra.mxu0 %vm178_vm1, %v3756_v28 }
 0x12b   :  { %v212_v30 = vpop.f32.mrf.mxu0 }
 0x12c   :  { %v213_v31 = vadd.f32 %v212_v30, %v174_v29 }
 0x12e   :  { %v227_v32 = vsel %vm226_vm6, %v213_v31, 0.0 }
 0x12f   :  { %228 = vadd.xlane.f32.xlu2 %v227_v32 }
 0x133   :  { %v215_v34 = vpop.f32.mrf.mxu0 }
 0x134   :  { %v216_v35 = vadd.f32 %v215_v34, %v175_v33 }
 0x136   :  { %v230_v36 = vsel %vm226_vm6, %v216_v35, 0.0 }
 0x137   :  { %231 = vadd.xlane.f32.xlu2 %v230_v36 }
 0x13b   :  { %v218_v38 = vpop.f32.mrf.mxu0 }
 0x13c   :  { %v219_v39 = vadd.f32 %v218_v38, %v176_v37 }
 0x13e   :  { %v233_v40 = vsel %vm226_vm6, %v219_v39, 0.0 }
 0x13f   :  { %234 = vadd.xlane.f32.xlu0 %v233_v40 }
 0x143   :  { %v221_v42 = vpop.f32.mrf.mxu0 }
 0x144   :  { %v222_v43 = vadd.f32 %v221_v42, %v177_v41  ;;  %v4670_v41 = vld [vmem:[%s4458_s21] ss:$0 sm:$0xff]  ;;  %s5607_s21 = sld [smem:[#allocation8_spill]] }
 0x146   :  { %v236_v44 = vsel %vm226_vm6, %v222_v43, 0.0 }
 0x147   :  { %237 = vadd.xlane.f32.xlu1 %v236_v44  ;;  %v347_v44 = vld [vmem:[%s4468_s29 + $0x38] sm:$0xff] }
 0x148   :  { %674 = vmatpush.msrb.mxu3 %v347_v44 }
 0x14a   :  { %675 = vmatpush.msrb.mxu3 %v346_v45 }
 0x14c   :  { %676 = vmatpush.msrb.mxu3 %v345_v50 }
 0x1a2   :  { %v229_v52 = vpop.xlane.xlu2 %228 }
 0x1a3   :  { %v246_v53 = vmul.f32 %v4624_v51, %v229_v52 }
 0x1a5   :  { %v4627_v54 = vsub.f32 %v213_v31, %v246_v53 }
 0x1a7   :  { %v254_v55 = vmul.f32 %v4627_v54, %v4627_v54 }
 0x1a9   :  { %v258_v56 = vsel %vm226_vm6, %v254_v55, 0.0 }
 0x1aa   :  { %259 = vadd.xlane.f32.xlu2 %v258_v56  ;;  %v232_v57 = vpop.xlane.xlu2 %231 }
 0x1ab   :  { %v247_v58 = vmul.f32 %v4624_v51, %v232_v57 }
 0x1ad   :  { %v4633_v59 = vsub.f32 %v216_v35, %v247_v58 }
 0x1af   :  { %v255_v60 = vmul.f32 %v4633_v59, %v4633_v59 }
 0x1b1   :  { %v261_v61 = vsel %vm226_vm6, %v255_v60, 0.0 }
 0x1b2   :  { %v235_v62 = vpop.xlane.xlu0 %234  ;;  %262 = vadd.xlane.f32.xlu2 %v261_v61  ;;  %v344_v61 = vld [vmem:[%s4468_s29 + $0x20] sm:$0xff] }
 0x1b3   :  { %v248_v63 = vmul.f32 %v4624_v51, %v235_v62  ;;  %677 = vmatpush.msrb.mxu3 %v344_v61 }
 0x1b5   :  { %v4639_v0 = vsub.f32 %v219_v39, %v248_v63 }
 0x1b7   :  { %v256_v1 = vmul.f32 %v4639_v0, %v4639_v0 }
 0x1b9   :  { %v264_v2 = vsel %vm226_vm6, %v256_v1, 0.0 }
 0x1ba   :  { %v238_v3 = vpop.xlane.xlu1 %237  ;;  %265 = vadd.xlane.f32.xlu2 %v264_v2 }
 0x1bb   :  { %v249_v4 = vmul.f32 %v4624_v51, %v238_v3 }
 0x1bd   :  { %v4645_v5 = vsub.f32 %v222_v43, %v249_v4 }
 0x1bf   :  { %v257_v6 = vmul.f32 %v4645_v5, %v4645_v5 }
 0x1c1   :  { %v267_v7 = vsel %vm226_vm6, %v257_v6, 0.0 }
 0x1c2   :  { %268 = vadd.xlane.f32.xlu2 %v267_v7 }
 0x21d   :  { %v260_v21 = vpop.xlane.xlu2 %259 }
 0x21e   :  { %v270_v23 = vmul.f32 %v260_v21, %v4624_v51 }
 0x220   :  { %v274_v25 = vadd.f32 1e-12, %v270_v23 }
 0x222   :  { %4177 = vrsqrt.f32 %v274_v25  ;;  %vm284_vm9 = vweird.f32 %v274_v25 }
 0x225   :  { %v263_v27 = vpop.xlane.xlu2 %262 }
 0x226   :  { %v271_v28 = vmul.f32 %v263_v27, %v4624_v51 }
 0x228   :  { %v4178_v29 = vpop.eup %4177  ;;  %v275_v30 = vadd.f32 1e-12, %v271_v28 }
 0x229   :  { %v279_v31 = vmul.f32 %v4178_v29, %v274_v25  ;;  %vm285_vm8 = vweird.f32 %v4178_v29 }
 0x22a   :  { %4179 = vrsqrt.f32 %v275_v30  ;;  %vm286_vm10 = vmor %vm284_vm9, %vm285_vm8  ;;  %vm294_vm12 = vweird.f32 %v275_v30 }
 0x22b   :  { %v280_v32 = vmul.f32 %v4178_v29, %v279_v31  ;;  %v4137_v31 = vld [vmem:[%s4493_s24] ss:$0 sm:$0xff] }
 0x22d   :  { %v281_v33 = vmul.f32 0.5, %v280_v32  ;;  %v266_v34 = vpop.xlane.xlu2 %265 }
 0x22e   :  { %v272_v35 = vmul.f32 %v266_v34, %v4624_v51 }
 0x22f   :  { %v282_v36 = vsub.f32 1.5, %v281_v33 }
 0x230   :  { %v4180_v37 = vpop.eup %4179  ;;  %v276_v38 = vadd.f32 1e-12, %v272_v35 }
 0x231   :  { %v283_v39 = vmul.f32 %v4178_v29, %v282_v36  ;;  %v289_v40 = vmul.f32 %v4180_v37, %v275_v30  ;;  %vm295_vm11 = vweird.f32 %v4180_v37 }
 0x232   :  { %4181 = vrsqrt.f32 %v276_v38  ;;  %vm296_vm13 = vmor %vm294_vm12, %vm295_vm11  ;;  %vm304_vm15 = vweird.f32 %v276_v38 }
 0x233   :  { %v287_v42 = vsel %vm286_vm10, %v4178_v29, %v283_v39  ;;  %v290_v43 = vmul.f32 %v4180_v37, %v289_v40  ;;  %v4135_v29 = vld [vmem:[%s4483_s14] ss:$0 sm:$0xff]  ;;  %v4136_v39 = vld [vmem:[%s4483_s14 + $0x1] ss:$0 sm:$0xff] }
 0x234   :  { %v318_v47 = vmul.f32 %v287_v42, %v4627_v54 }
 0x235   :  { %v291_v48 = vmul.f32 0.5, %v290_v43  ;;  %v269_v49 = vpop.xlane.xlu2 %268  ;;  %v4134_v43 = vld [vmem:[%s4473_s3] ss:$0 sm:$0xff] }
 0x236   :  { %v325_v52 = vmul.f32 %v4670_v41, %v318_v47  ;;  %v273_v53 = vmul.f32 %v269_v49, %v4624_v51 }
 0x237   :  { %v292_v55 = vsub.f32 1.5, %v291_v48  ;;  %v386_v48 = vld [vmem:[%s4488_s19 + $0x30] sm:$0xff] }
 0x238   :  { %v4182_v56 = vpop.eup %4181  ;;  %v4679_v57 = vadd.f32 %v4133_v46, %v325_v52  ;;  %v277_v58 = vadd.f32 1e-12, %v273_v53  ;;  %v385_v52 = vld [vmem:[%s4488_s19 + $0x28] sm:$0xff]  ;;  %v384_v53 = vld [vmem:[%s4488_s19 + $0x20] sm:$0xff] }
 0x239   :  { %v293_v60 = vmul.f32 %v4180_v37, %v292_v55  ;;  %v299_v54 = vmul.f32 %v4182_v56, %v276_v38  ;;  %vm305_vm14 = vweird.f32 %v4182_v56 }
 0x23a   :  { %4183 = vrsqrt.f32 %v277_v58  ;;  %3762 = vmatmul.msk.f32.vlgmr.msrb.gmra.mxu0 %vm226_vm6, %v4679_v57  ;;  %3766 = vmatmul.msk.f32.vlgmr.msra.gmra.mxu2 %vm226_vm6, %v4679_v57  ;;  %vm306_vm0 = vmor %vm304_vm15, %vm305_vm14  ;;  %vm314_vm2 = vweird.f32 %v277_v58 }
 0x23b   :  { %v297_v62 = vsel %vm296_vm13, %v4180_v37, %v293_v60  ;;  %v300_v63 = vmul.f32 %v4182_v56, %v299_v54  ;;  %3770 = vmatmul.msk.f32.vlgmr.msra.gmra.mxu3 %vm226_vm6, %v4679_v57 }
 0x23c   :  { %v319_v1 = vmul.f32 %v297_v62, %v4633_v59 }
 0x23d   :  { %v301_v2 = vmul.f32 0.5, %v300_v63  ;;  %v4763_v63 = vld [vmem:[%s4443_s9] sm:$0xff] }
 0x23e   :  { %v326_v3 = vmul.f32 %v4670_v41, %v319_v1 }
 0x23f   :  { %v302_v4 = vsub.f32 1.5, %v301_v2 }
 0x240   :  { %v4184_v6 = vpop.eup %4183  ;;  %v4690_v7 = vadd.f32 %v4133_v46, %v326_v3 }
 0x241   :  { %v303_v8 = vmul.f32 %v4182_v56, %v302_v4  ;;  %v309_v9 = vmul.f32 %v4184_v6, %v277_v58  ;;  %vm315_vm1 = vweird.f32 %v4184_v6 }
 0x242   :  { %3763 = vmatmul.msk.f32.vlgmr.msra.gmra.mxu1 %vm226_vm6, %v4690_v7  ;;  %3767 = vmatmul.msk.f32.gmra.mxu2 %vm226_vm6, %v4690_v7  ;;  %vm316_vm3 = vmor %vm314_vm2, %vm315_vm1  ;;  %vm1770_vm2 = vcmask 523264  }
 0x243   :  { %v307_v59 = vsel %vm306_vm0, %v4182_v56, %v303_v8  ;;  %v310_v10 = vmul.f32 %v4184_v6, %v309_v9  ;;  %3771 = vmatmul.msk.f32.gmra.mxu3 %vm226_vm6, %v4690_v7  ;;  %3790 = vmatmul.msk.f32.vlgmr.msra.gmra.mxu0 %vm226_vm6, %v4679_v57 }
 0x244   :  { %v320_v11 = vmul.f32 %v307_v59, %v4639_v0 }
 0x245   :  { %v311_v12 = vmul.f32 0.5, %v310_v10 }
 0x246   :  { %v327_v13 = vmul.f32 %v4670_v41, %v320_v11  ;;  %v4773_v11 = vld [vmem:[%s4443_s9 + $0x10] sm:$0xff] }
 0x247   :  { %v312_v14 = vsub.f32 1.5, %v311_v12 }
 0x248   :  { %v4702_v15 = vadd.f32 %v4133_v46, %v327_v13 }
 0x249   :  { %v313_v16 = vmul.f32 %v4184_v6, %v312_v14 }
 0x24a   :  { %3764 = vmatmul.msk.f32.gmra.mxu1 %vm226_vm6, %v4702_v15  ;;  %3768 = vmatmul.msk.f32.gmra.mxu2 %vm226_vm6, %v4702_v15 }
 0x24b   :  { %v317_v17 = vsel %vm316_vm3, %v4184_v6, %v313_v16  ;;  %3772 = vmatmul.msk.f32.gmra.mxu3 %vm226_vm6, %v4702_v15  ;;  %3791 = vmatmul.msk.f32.gmra.mxu0 %vm226_vm6, %v4690_v7  ;;  %v4768_v6 = vld [vmem:[%s4443_s9 + $0x8] sm:$0xff] }
 0x24c   :  { %v321_v0 = vmul.f32 %v317_v17, %v4645_v5  ;;  %v4778_v17 = vld [vmem:[%s4443_s9 + $0x18] sm:$0xff] }
 0x24e   :  { %v328_v18 = vmul.f32 %v4670_v41, %v321_v0 }
 0x250   :  { %v4714_v19 = vadd.f32 %v4133_v46, %v328_v18  ;;  %v387_v46 = vld [vmem:[%s4488_s19 + $0x38] sm:$0xff] }
 0x252   :  { %3765 = vmatmul.msk.f32.gmra.mxu1 %vm226_vm6, %v4714_v19  ;;  %3769 = vmatmul.msk.f32.gmra.mxu2 %vm226_vm6, %v4714_v19 }
 0x253   :  { %3773 = vmatmul.msk.f32.gmra.mxu3 %vm226_vm6, %v4714_v19  ;;  %3792 = vmatmul.msk.f32.gmra.mxu0 %vm226_vm6, %v4702_v15 }
 0x25b   :  { %3786 = vmatmul.msk.f32.vlgmr.msrb.gmra.mxu3 %vm226_vm6, %v4679_v57  ;;  %3793 = vmatmul.msk.f32.gmra.mxu0 %vm226_vm6, %v4714_v19 }
 0x263   :  { %3787 = vmatmul.msk.f32.gmra.mxu3 %vm226_vm6, %v4690_v7 }
 0x26b   :  { %3788 = vmatmul.msk.f32.gmra.mxu3 %vm226_vm6, %v4702_v15 }
 0x273   :  { %3789 = vmatmul.msk.f32.gmra.mxu3 %vm226_vm6, %v4714_v19 }
 0x2b7   :  { %v436_v5 = vpop.f32.mrf.mxu0 }
 0x2b8   :  { %v437_v47 = vadd.f32 %v4134_v43, %v436_v5 }
 0x2bd   :  { %v468_v20 = vpop.f32.mrf.mxu2 }
 0x2be   :  { %v500_v21 = vpop.f32.mrf.mxu3  ;;  %v469_v44 = vadd.f32 %v4135_v29, %v468_v20 }
 0x2bf   :  { %v501_v40 = vadd.f32 %v4137_v31, %v500_v21  ;;  %v439_v49 = vpop.f32.mrf.mxu1 }
 0x2c0   :  { %v711_v22 = vpop.f32.mrf.mxu0  ;;  %v440_v56 = vadd.f32 %v4134_v43, %v439_v49 }
 0x2c1   :  { %v712_v55 = vadd.f32 %v4136_v39, %v711_v22 }
 0x2c5   :  { %v471_v23 = vpop.f32.mrf.mxu2 }
 0x2c6   :  { %v503_v24 = vpop.f32.mrf.mxu3  ;;  %v472_v41 = vadd.f32 %v4135_v29, %v471_v23  ;;  %v4139_v23 = vld [vmem:[%s4493_s24 + $0x1] ss:$0 sm:$0xff] }
 0x2c7   :  { %v504_v38 = vadd.f32 %v4137_v31, %v503_v24  ;;  %v442_v58 = vpop.f32.mrf.mxu1 }
 0x2c8   :  { %v714_v25 = vpop.f32.mrf.mxu0  ;;  %v443_v60 = vadd.f32 %v4134_v43, %v442_v58 }
 0x2c9   :  { %v715_v50 = vadd.f32 %v4136_v39, %v714_v25 }
 0x2cd   :  { %v474_v26 = vpop.f32.mrf.mxu2 }
 0x2ce   :  { %v506_v27 = vpop.f32.mrf.mxu3  ;;  %v475_v36 = vadd.f32 %v4135_v29, %v474_v26 }
 0x2cf   :  { %v507_v35 = vadd.f32 %v4137_v31, %v506_v27  ;;  %v445_v54 = vpop.f32.mrf.mxu1 }
 0x2d0   :  { %v717_v28 = vpop.f32.mrf.mxu0  ;;  %v446_v61 = vadd.f32 %v4134_v43, %v445_v54 }
 0x2d1   :  { %v718_v45 = vadd.f32 %v4136_v39, %v717_v28 }
 0x2d5   :  { %v477_v30 = vpop.f32.mrf.mxu2 }
 0x2d6   :  { %v478_v32 = vadd.f32 %v4135_v29, %v477_v30  ;;  %v509_v33 = vpop.f32.mrf.mxu3 }
 0x2d7   :  { %v510_v34 = vadd.f32 %v4137_v31, %v509_v33 }
 0x2d8   :  { %3774 = vmatpush.xpose.msk.msrb.mxu1 %vm512_vm4, %v478_v32  ;;  %v720_v37 = vpop.f32.mrf.mxu0 }
 0x2d9   :  { %642 = vmatpush.msrb.mxu2 %v510_v34  ;;  %v721_v42 = vadd.f32 %v4136_v39, %v720_v37 }
 0x2db   :  { %643 = vmatpush.msrb.mxu2 %v507_v35 }
 0x2dc   :  { %3775 = vmatpush.xpose.msk.msrb.mxu1 %vm512_vm4, %v475_v36 }
 0x2dd   :  { %644 = vmatpush.msrb.mxu2 %v504_v38 }
 0x2df   :  { %645 = vmatpush.msrb.mxu2 %v501_v40 }
 0x2e0   :  { %3776 = vmatpush.xpose.msk.msrb.mxu1 %vm512_vm4, %v472_v41 }
 0x2e1   :  { %3798 = vmatpush.xpose.msk.msra.mxu2 %vm512_vm4, %v721_v42 }
 0x2e4   :  { %3777 = vmatpush.xpose.msk.msrb.mxu1 %vm512_vm4, %v469_v44 }
 0x2e5   :  { %3799 = vmatpush.xpose.msk.msra.mxu2 %vm512_vm4, %v718_v45 }
 0x2e7   :  { %3778 = vmatmul.msk.f32.vlgmr.msrb.gmra.mxu1 %vm512_vm4, %v437_v47 }
 0x2e8   :  { %738 = vmatpush.msra.mxu1 %v387_v46 }
 0x2e9   :  { %3800 = vmatpush.xpose.msk.msra.mxu2 %vm512_vm4, %v715_v50 }
 0x2ea   :  { %739 = vmatpush.msra.mxu1 %v386_v48 }
 0x2ec   :  { %740 = vmatpush.msra.mxu1 %v385_v52 }
 0x2ed   :  { %3801 = vmatpush.xpose.msk.msra.mxu2 %vm512_vm4, %v712_v55 }
 0x2ee   :  { %741 = vmatpush.msra.mxu1 %v384_v53 }
 0x2ef   :  { %3779 = vmatmul.msk.f32.gmra.mxu1 %vm512_vm4, %v440_v56 }
 0x2f7   :  { %3780 = vmatmul.msk.f32.gmra.mxu1 %vm512_vm4, %v443_v60 }
 0x2ff   :  { %3781 = vmatmul.msk.f32.gmra.mxu1 %vm512_vm4, %v446_v61 }
 0x307   :  { %3794 = vmatmul.msk.f32.vlgmr.msra.gmra.mxu1 %vm226_vm6, %v4679_v57 }
 0x30f   :  { %3795 = vmatmul.msk.f32.gmra.mxu1 %vm226_vm6, %v4690_v7 }
 0x317   :  { %3796 = vmatmul.msk.f32.gmra.mxu1 %vm226_vm6, %v4702_v15 }
 0x31f   :  { %3797 = vmatmul.msk.f32.gmra.mxu1 %vm226_vm6, %v4714_v19 }
 0x364   :  { %v554_v62 = vpop.f32.mrf.mxu1 }
 0x365   :  { %v566_v1 = vmul.f32 0.35355338, %v554_v62 }
 0x367   :  { %v570_v2 = vadd.f32 %v566_v1, %v4763_v63  ;;  %v679_v1 = vpop.f32.mrf.mxu3 }
 0x369   :  { %v574_v3 = vsel %vm226_vm6, %v570_v2, -inf }
 0x36a   :  { %575 = vmax.xlane.f32.xlu2 %v574_v3  ;;  %v351_v3 = vld [vmem:[%s4468_s29 + $0x58] sm:$0xff] }
 0x36c   :  { %v557_v4 = vpop.f32.mrf.mxu1 }
 0x36d   :  { %v567_v8 = vmul.f32 0.35355338, %v557_v4  ;;  %v350_v4 = vld [vmem:[%s4468_s29 + $0x50] sm:$0xff] }
 0x36f   :  { %v571_v9 = vadd.f32 %v567_v8, %v4768_v6  ;;  %v4138_v8 = vld [vmem:[%s4473_s3 + $0x1] ss:$0 sm:$0xff] }
 0x371   :  { %v577_v59 = vsel %vm226_vm6, %v571_v9, -inf }
 0x372   :  { %578 = vmax.xlane.f32.xlu2 %v577_v59  ;;  %v348_v59 = vld [vmem:[%s4468_s29 + $0x40] sm:$0xff] }
 0x374   :  { %v560_v10 = vpop.f32.mrf.mxu1 }
 0x375   :  { %v568_v12 = vmul.f32 0.35355338, %v560_v10  ;;  %v680_v10 = vadd.f32 %v4138_v8, %v679_v1  ;;  %v371_v1 = vld [vmem:[%s4478_s8 + $0x58] sm:$0xff] }
 0x377   :  { %v572_v13 = vadd.f32 %v568_v12, %v4773_v11  ;;  %v682_v12 = vpop.f32.mrf.mxu3 }
 0x379   :  { %v580_v14 = vsel %vm226_vm6, %v572_v13, -inf }
 0x37a   :  { %581 = vmax.xlane.f32.xlu0 %v580_v14 }
 0x37c   :  { %v563_v16 = vpop.f32.mrf.mxu1 }
 0x37d   :  { %v569_v0 = vmul.f32 0.35355338, %v563_v16 }
 0x37f   :  { %v573_v18 = vadd.f32 %v569_v0, %v4778_v17  ;;  %v685_v14 = vpop.f32.mrf.mxu3 }
 0x380   :  { %v686_v16 = vadd.f32 %v4138_v8, %v685_v14 }
 0x381   :  { %v583_v5 = vsel %vm226_vm6, %v573_v18, -inf }
 0x382   :  { %584 = vmax.xlane.f32.xlu1 %v583_v5  ;;  %v400_v5 = vld [vmem:[%s4498_s30] sm:$0xff] }
 0x383   :  { %969 = vmatpush.msrb.mxu1 %v400_v5 }
 0x384   :  { %v743_v20 = vpop.f32.mrf.mxu1 }
 0x385   :  { %v744_v28 = vadd.f32 %v4139_v23, %v743_v20 }
 0x387   :  { %v688_v0 = vpop.f32.mrf.mxu3 }
 0x38c   :  { %v746_v21 = vpop.f32.mrf.mxu1 }
 0x38d   :  { %v747_v27 = vadd.f32 %v4139_v23, %v746_v21 }
 0x394   :  { %v749_v22 = vpop.f32.mrf.mxu1 }
 0x395   :  { %v750_v26 = vadd.f32 %v4139_v23, %v749_v22 }
 0x39c   :  { %v752_v24 = vpop.f32.mrf.mxu1 }
 0x39d   :  { %v753_v25 = vadd.f32 %v4139_v23, %v752_v24 }
 0x39f   :  { %884 = vmatpush.msra.mxu3 %v753_v25 }
 0x3a1   :  { %885 = vmatpush.msra.mxu3 %v750_v26 }
 0x3a3   :  { %886 = vmatpush.msra.mxu3 %v747_v27 }
 0x3a5   :  { %887 = vmatpush.msra.mxu3 %v744_v28 }
 0x3a7   :  { %1030 = vmatpush.msrb.mxu3 %v371_v1 }
 0x3dd   :  { %v576_v29 = vpop.xlane.xlu2 %575 }
 0x3de   :  { %v586_v30 = vsub.f32 %v570_v2, %v576_v29 }
 0x3e0   :  { %v590_v31 = vmul.f32 1.442695, %v586_v30 }
 0x3e2   :  { %4185 = vpow2.f32 %v590_v31 }
 0x3e5   :  { %v579_v32 = vpop.xlane.xlu2 %578 }
 0x3e6   :  { %v587_v33 = vsub.f32 %v571_v9, %v579_v32  ;;  %v349_v9 = vld [vmem:[%s4468_s29 + $0x48] sm:$0xff] }
 0x3e8   :  { %v4186_v34 = vpop.eup %4185  ;;  %v592_v35 = vmul.f32 1.442695, %v587_v33 }
 0x3e9   :  { %v598_v36 = vsel %vm226_vm6, %v4186_v34, 0.0 }
 0x3ea   :  { %4187 = vpow2.f32 %v592_v35  ;;  %599 = vadd.xlane.f32.xlu2 %v598_v36 }
 0x3ed   :  { %v582_v37 = vpop.xlane.xlu0 %581 }
 0x3ee   :  { %v588_v38 = vsub.f32 %v572_v13, %v582_v37  ;;  %v683_v13 = vadd.f32 %v4138_v8, %v682_v12 }
 0x3f0   :  { %v4188_v39 = vpop.eup %4187  ;;  %v594_v40 = vmul.f32 1.442695, %v588_v38 }
 0x3f1   :  { %v601_v41 = vsel %vm226_vm6, %v4188_v39, 0.0 }
 0x3f2   :  { %4189 = vpow2.f32 %v594_v40  ;;  %602 = vadd.xlane.f32.xlu0 %v601_v41 }
 0x3f5   :  { %v585_v42 = vpop.xlane.xlu1 %584 }
 0x3f6   :  { %v589_v43 = vsub.f32 %v573_v18, %v585_v42  ;;  %v689_v18 = vadd.f32 %v4138_v8, %v688_v0  ;;  %v368_v8 = vld [vmem:[%s4478_s8 + $0x40] sm:$0xff] }
 0x3f8   :  { %v4190_v44 = vpop.eup %4189  ;;  %v596_v45 = vmul.f32 1.442695, %v589_v43 }
 0x3f9   :  { %v604_v46 = vsel %vm226_vm6, %v4190_v44, 0.0 }
 0x3fa   :  { %4191 = vpow2.f32 %v596_v45  ;;  %605 = vadd.xlane.f32.xlu1 %v604_v46 }
 0x400   :  { %v4192_v47 = vpop.eup %4191 }
 0x401   :  { %v607_v48 = vsel %vm226_vm6, %v4192_v47, 0.0 }
 0x402   :  { %608 = vadd.xlane.f32.xlu2 %v607_v48 }
 0x45d   :  { %v600_v49 = vpop.xlane.xlu2 %599 }
 0x45e   :  { %4193 = vrcp.f32 %v600_v49 }
 0x464   :  { %v4194_v50 = vpop.eup %4193 }
 0x465   :  { %v603_v52 = vpop.xlane.xlu0 %602  ;;  %v614_v53 = vmul.f32 %v4194_v50, %v4186_v34 }
 0x466   :  { %4195 = vrcp.f32 %v603_v52 }
 0x467   :  { %3782 = vmatmul.msk.f32.vlgmr.msrb.gmra.mxu2 %vm226_vm6, %v614_v53 }
 0x468   :  { %998 = vmatpush.msrb.mxu2 %v351_v3  ;;  %v370_v3 = vld [vmem:[%s4478_s8 + $0x50] sm:$0xff] }
 0x469   :  { %1031 = vmatpush.msrb.mxu3 %v370_v3 }
 0x46a   :  { %999 = vmatpush.msrb.mxu2 %v350_v4  ;;  %v369_v4 = vld [vmem:[%s4478_s8 + $0x48] sm:$0xff] }
 0x46b   :  { %1032 = vmatpush.msrb.mxu3 %v369_v4 }
 0x46c   :  { %v4196_v55 = vpop.eup %4195  ;;  %1000 = vmatpush.msrb.mxu2 %v349_v9 }
 0x46d   :  { %v606_v56 = vpop.xlane.xlu1 %605  ;;  %v615_v58 = vmul.f32 %v4196_v55, %v4188_v39  ;;  %1033 = vmatpush.msrb.mxu3 %v368_v8 }
 0x46e   :  { %4197 = vrcp.f32 %v606_v56  ;;  %1001 = vmatpush.msrb.mxu2 %v348_v59 }
 0x46f   :  { %3783 = vmatmul.msk.f32.gmra.mxu2 %vm226_vm6, %v615_v58 }
 0x474   :  { %v4198_v60 = vpop.eup %4197 }
 0x475   :  { %v609_v54 = vpop.xlane.xlu2 %608  ;;  %v616_v61 = vmul.f32 %v4198_v60, %v4190_v44 }
 0x476   :  { %4199 = vrcp.f32 %v609_v54 }
 0x477   :  { %3784 = vmatmul.msk.f32.gmra.mxu2 %vm226_vm6, %v616_v61 }
 0x47c   :  { %v4200_v62 = vpop.eup %4199 }
 0x47d   :  { %v617_v2 = vmul.f32 %v4200_v62, %v4192_v47 }
 0x47f   :  { %3785 = vmatmul.msk.f32.gmra.mxu2 %vm226_vm6, %v617_v2 }
 0x487   :  { %3802 = vmatmul.msk.f32.vlgmr.msra.gmra.mxu2 %vm512_vm4, %v680_v10 }
 0x48f   :  { %3803 = vmatmul.msk.f32.gmra.mxu2 %vm512_vm4, %v683_v13 }
 0x497   :  { %3804 = vmatmul.msk.f32.gmra.mxu2 %vm512_vm4, %v686_v16 }
 0x49f   :  { %3805 = vmatmul.msk.f32.gmra.mxu2 %vm512_vm4, %v689_v18 }
 0x4a7   :  { %3818 = vmatmul.msk.f32.vlgmr.msrb.gmra.mxu2 %vm226_vm6, %v4679_v57 }
 0x4af   :  { %3819 = vmatmul.msk.f32.gmra.mxu2 %vm226_vm6, %v4690_v7 }
 0x4b7   :  { %3820 = vmatmul.msk.f32.gmra.mxu2 %vm226_vm6, %v4702_v15 }
 0x4bf   :  { %3821 = vmatmul.msk.f32.gmra.mxu2 %vm226_vm6, %v4714_v19 }
 0x4ea   :  { %v647_v20 = vpop.f32.mrf.mxu2 }
 0x4eb   :  { %3814 = vmatmul.msk.f32.vlgmr.msrb.gmra.mxu1 %vm512_vm4, %v647_v20 }
 0x4f2   :  { %v650_v21 = vpop.f32.mrf.mxu2 }
 0x4f3   :  { %3815 = vmatmul.msk.f32.gmra.mxu1 %vm512_vm4, %v650_v21  ;;  %v401_v21 = vld [vmem:[%s4498_s30 + $0x8] sm:$0xff] }
 0x4f4   :  { %928 = vmatpush.msrb.mxu0 %v401_v21 }
 0x4fa   :  { %v653_v22 = vpop.f32.mrf.mxu2 }
 0x4fb   :  { %3816 = vmatmul.msk.f32.gmra.mxu1 %vm512_vm4, %v653_v22  ;;  %v391_v22 = vld [vmem:[%s4488_s19 + $0x58] sm:$0xff] }
 0x4fc   :  { %1062 = vmatpush.msra.mxu0 %v391_v22 }
 0x502   :  { %v656_v23 = vpop.f32.mrf.mxu2 }
 0x503   :  { %3817 = vmatmul.msk.f32.gmra.mxu1 %vm512_vm4, %v656_v23  ;;  %v390_v23 = vld [vmem:[%s4488_s19 + $0x50] sm:$0xff] }
 0x504   :  { %1063 = vmatpush.msra.mxu0 %v390_v23 }
 0x50a   :  { %v796_v24 = vpop.f32.mrf.mxu2 }
 0x50b   :  { %v808_v25 = vmul.f32 0.35355338, %v796_v24  ;;  %v389_v24 = vld [vmem:[%s4488_s19 + $0x48] sm:$0xff] }
 0x50c   :  { %1064 = vmatpush.msra.mxu0 %v389_v24 }
 0x50d   :  { %v812_v26 = vadd.f32 %v808_v25, %v4763_v63 }
 0x50f   :  { %v816_v27 = vsel %vm226_vm6, %v812_v26, -inf }
 0x510   :  { %817 = vmax.xlane.f32.xlu0 %v816_v27 }
 0x512   :  { %v799_v28 = vpop.f32.mrf.mxu2 }
 0x513   :  { %v809_v29 = vmul.f32 0.35355338, %v799_v28 }
 0x515   :  { %v813_v30 = vadd.f32 %v809_v29, %v4768_v6 }
 0x517   :  { %v819_v31 = vsel %vm226_vm6, %v813_v30, -inf }
 0x518   :  { %820 = vmax.xlane.f32.xlu1 %v819_v31  ;;  %v354_v31 = vld [vmem:[%s4468_s29 + $0x70] sm:$0xff] }
 0x51a   :  { %v802_v32 = vpop.f32.mrf.mxu2 }
 0x51b   :  { %v810_v33 = vmul.f32 0.35355338, %v802_v32  ;;  %v353_v32 = vld [vmem:[%s4468_s29 + $0x68] sm:$0xff] }
 0x51d   :  { %v814_v34 = vadd.f32 %v810_v33, %v4773_v11  ;;  %v352_v33 = vld [vmem:[%s4468_s29 + $0x60] sm:$0xff] }
 0x51f   :  { %v822_v35 = vsel %vm226_vm6, %v814_v34, -inf }
 0x520   :  { %823 = vmax.xlane.f32.xlu2 %v822_v35 }
 0x522   :  { %v805_v36 = vpop.f32.mrf.mxu2 }
 0x523   :  { %v811_v37 = vmul.f32 0.35355338, %v805_v36 }
 0x525   :  { %v815_v38 = vadd.f32 %v811_v37, %v4778_v17  ;;  %v4141_v37 = vld [vmem:[%s4483_s14 + $0x2] ss:$0 sm:$0xff] }
 0x527   :  { %v825_v39 = vsel %vm226_vm6, %v815_v38, -inf }
 0x528   :  { %826 = vmax.xlane.f32.xlu0 %v825_v39 }
 0x583   :  { %v818_v40 = vpop.xlane.xlu0 %817 }
 0x584   :  { %v828_v41 = vsub.f32 %v812_v26, %v818_v40  ;;  %v388_v26 = vld [vmem:[%s4488_s19 + $0x40] sm:$0xff] }
 0x585   :  { %1065 = vmatpush.msra.mxu0 %v388_v26 }
 0x586   :  { %v832_v42 = vmul.f32 1.442695, %v828_v41  ;;  %v1003_v41 = vpop.f32.mrf.mxu2 }
 0x588   :  { %4201 = vpow2.f32 %v832_v42 }
 0x58b   :  { %v821_v43 = vpop.xlane.xlu1 %820 }
 0x58c   :  { %v829_v44 = vsub.f32 %v813_v30, %v821_v43  ;;  %v355_v30 = vld [vmem:[%s4468_s29 + $0x78] sm:$0xff]  ;;  %v4140_v43 = vld [vmem:[%s4473_s3 + $0x2] ss:$0 sm:$0xff] }
 0x58e   :  { %v4202_v45 = vpop.eup %4201  ;;  %v834_v46 = vmul.f32 1.442695, %v829_v44 }
 0x58f   :  { %v840_v47 = vsel %vm226_vm6, %v4202_v45, 0.0 }
 0x590   :  { %4203 = vpow2.f32 %v834_v46  ;;  %841 = vadd.xlane.f32.xlu1 %v840_v47  ;;  %v1004_v46 = vadd.f32 %v4140_v43, %v1003_v41  ;;  %v374_v47 = vld [vmem:[%s4478_s8 + $0x70] sm:$0xff] }
 0x593   :  { %v824_v48 = vpop.xlane.xlu2 %823 }
 0x594   :  { %v830_v49 = vsub.f32 %v814_v34, %v824_v48  ;;  %v1006_v48 = vpop.f32.mrf.mxu2 }
 0x596   :  { %v4204_v50 = vpop.eup %4203  ;;  %v836_v52 = vmul.f32 1.442695, %v830_v49  ;;  %v373_v49 = vld [vmem:[%s4478_s8 + $0x68] sm:$0xff] }
 0x597   :  { %v843_v53 = vsel %vm226_vm6, %v4204_v50, 0.0 }
 0x598   :  { %4205 = vpow2.f32 %v836_v52  ;;  %844 = vadd.xlane.f32.xlu2 %v843_v53  ;;  %v1007_v52 = vadd.f32 %v4140_v43, %v1006_v48 }
 0x59b   :  { %v827_v55 = vpop.xlane.xlu0 %826 }
 0x59c   :  { %v831_v56 = vsub.f32 %v815_v38, %v827_v55  ;;  %v1009_v53 = vpop.f32.mrf.mxu2 }
 0x59d   :  { %v1010_v55 = vadd.f32 %v4140_v43, %v1009_v53 }
 0x59e   :  { %v4206_v58 = vpop.eup %4205  ;;  %v838_v60 = vmul.f32 1.442695, %v831_v56 }
 0x59f   :  { %v846_v54 = vsel %vm226_vm6, %v4206_v58, 0.0 }
 0x5a0   :  { %4207 = vpow2.f32 %v838_v60  ;;  %847 = vadd.xlane.f32.xlu0 %v846_v54 }
 0x5a4   :  { %v1012_v56 = vpop.f32.mrf.mxu2 }
 0x5a6   :  { %v4208_v61 = vpop.eup %4207 }
 0x5a7   :  { %v849_v62 = vsel %vm226_vm6, %v4208_v61, 0.0 }
 0x5a8   :  { %850 = vadd.xlane.f32.xlu1 %v849_v62 }
 0x603   :  { %v842_v2 = vpop.xlane.xlu1 %841 }
 0x604   :  { %4209 = vrcp.f32 %v842_v2  ;;  %v4900_v2 = vpop.f32.mrf.mxu1 }
 0x60a   :  { %v4210_v9 = vpop.eup %4209 }
 0x60b   :  { %v856_v59 = vmul.f32 %v4210_v9, %v4202_v45  ;;  %v845_v10 = vpop.xlane.xlu2 %844  ;;  %v375_v45 = vld [vmem:[%s4478_s8 + $0x78] sm:$0xff] }
 0x60c   :  { %4211 = vrcp.f32 %v845_v10  ;;  %v4902_v4 = vpop.f32.mrf.mxu1 }
 0x60d   :  { %3806 = vmatmul.msk.f32.vlgmr.msra.gmra.mxu3 %vm226_vm6, %v856_v59  ;;  %v4142_v59 = vld [vmem:[%s4493_s24 + $0x2] ss:$0 sm:$0xff] }
 0x612   :  { %v4212_v12 = vpop.eup %4211 }
 0x613   :  { %v848_v13 = vpop.xlane.xlu0 %847  ;;  %v857_v14 = vmul.f32 %v4212_v12, %v4204_v50  ;;  %v372_v50 = vld [vmem:[%s4478_s8 + $0x60] sm:$0xff] }
 0x614   :  { %4213 = vrcp.f32 %v848_v13  ;;  %v4904_v9 = vpop.f32.mrf.mxu1 }
 0x615   :  { %3807 = vmatmul.msk.f32.gmra.mxu3 %vm226_vm6, %v857_v14 }
 0x61a   :  { %v4214_v16 = vpop.eup %4213 }
 0x61b   :  { %v851_v0 = vpop.xlane.xlu1 %850  ;;  %v858_v18 = vmul.f32 %v4214_v16, %v4206_v58  ;;  %v1013_v58 = vadd.f32 %v4140_v43, %v1012_v56 }
 0x61c   :  { %4215 = vrcp.f32 %v851_v0  ;;  %v4907_v0 = vpop.f32.mrf.mxu1 }
 0x61d   :  { %3808 = vmatmul.msk.f32.gmra.mxu3 %vm226_vm6, %v858_v18 }
 0x622   :  { %v4216_v5 = vpop.eup %4215 }
 0x623   :  { %v859_v20 = vmul.f32 %v4216_v5, %v4208_v61 }
 0x625   :  { %3809 = vmatmul.msk.f32.gmra.mxu3 %vm226_vm6, %v859_v20 }
 0x62d   :  { %3822 = vmatmul.msk.f32.vlgmr.msrb.gmra.mxu3 %vm226_vm6, %v4679_v57 }
 0x635   :  { %3823 = vmatmul.msk.f32.gmra.mxu3 %vm226_vm6, %v4690_v7 }
 0x63d   :  { %3824 = vmatmul.msk.f32.gmra.mxu3 %vm226_vm6, %v4702_v15 }
 0x645   :  { %3825 = vmatmul.msk.f32.gmra.mxu3 %vm226_vm6, %v4714_v19 }
 0x690   :  { %v889_v25 = vpop.f32.mrf.mxu3 }
 0x691   :  { %3810 = vmatmul.msk.f32.vlgmr.msrb.gmra.mxu0 %vm512_vm4, %v889_v25 }
 0x692   :  { %1285 = vmatpush.msrb.mxu0 %v355_v30 }
 0x694   :  { %1286 = vmatpush.msrb.mxu0 %v354_v31 }
 0x696   :  { %1287 = vmatpush.msrb.mxu0 %v353_v32  ;;  %v402_v32 = vld [vmem:[%s4498_s30 + $0x10] sm:$0xff] }
 0x697   :  { %1252 = vmatpush.msra.mxu3 %v402_v32 }
 0x698   :  { %v892_v27 = vpop.f32.mrf.mxu3  ;;  %1288 = vmatpush.msrb.mxu0 %v352_v33 }
 0x699   :  { %3811 = vmatmul.msk.f32.gmra.mxu0 %vm512_vm4, %v892_v27 }
 0x6a0   :  { %v895_v28 = vpop.f32.mrf.mxu3 }
 0x6a1   :  { %3812 = vmatmul.msk.f32.gmra.mxu0 %vm512_vm4, %v895_v28 }
 0x6a8   :  { %v898_v29 = vpop.f32.mrf.mxu3 }
 0x6a9   :  { %3813 = vmatmul.msk.f32.gmra.mxu0 %vm512_vm4, %v898_v29 }
 0x6b0   :  { %v1035_v34 = vpop.f32.mrf.mxu3 }
 0x6b1   :  { %3826 = vmatmul.msk.f32.vlgmr.msra.gmra.mxu0 %vm226_vm6, %v4679_v57  ;;  %v1036_v44 = vadd.f32 %v4141_v37, %v1035_v34 }
 0x6b8   :  { %v1038_v35 = vpop.f32.mrf.mxu3 }
 0x6b9   :  { %3827 = vmatmul.msk.f32.gmra.mxu0 %vm226_vm6, %v4690_v7  ;;  %v1039_v42 = vadd.f32 %v4141_v37, %v1038_v35 }
 0x6c0   :  { %v1041_v36 = vpop.f32.mrf.mxu3 }
 0x6c1   :  { %3828 = vmatmul.msk.f32.gmra.mxu0 %vm226_vm6, %v4702_v15  ;;  %v1042_v40 = vadd.f32 %v4141_v37, %v1041_v36 }
 0x6c8   :  { %v1044_v38 = vpop.f32.mrf.mxu3 }
 0x6c9   :  { %v1045_v39 = vadd.f32 %v4141_v37, %v1044_v38  ;;  %3829 = vmatmul.msk.f32.gmra.mxu0 %vm226_vm6, %v4714_v19  ;;  %v4144_v38 = vld [vmem:[%s4483_s14 + $0x3] ss:$0 sm:$0xff] }
 0x6cb   :  { %3830 = vmatpush.xpose.msk.msra.mxu1 %vm512_vm4, %v1045_v39 }
 0x6cf   :  { %3831 = vmatpush.xpose.msk.msra.mxu1 %vm512_vm4, %v1042_v40 }
 0x6d1   :  { %3846 = vmatmul.msk.f32.vlgmr.msrb.gmra.mxu0 %vm226_vm6, %v4679_v57 }
 0x6d3   :  { %3832 = vmatpush.xpose.msk.msra.mxu1 %vm512_vm4, %v1039_v42 }
 0x6d7   :  { %3833 = vmatpush.xpose.msk.msra.mxu1 %vm512_vm4, %v1036_v44 }
 0x6d9   :  { %3847 = vmatmul.msk.f32.gmra.mxu0 %vm226_vm6, %v4690_v7 }
 0x6da   :  { %3834 = vmatmul.msk.f32.vlgmr.msra.gmra.mxu1 %vm512_vm4, %v1004_v46 }
 0x6db   :  { %1317 = vmatpush.msrb.mxu1 %v375_v45 }
 0x6dd   :  { %1318 = vmatpush.msrb.mxu1 %v374_v47 }
 0x6df   :  { %1319 = vmatpush.msrb.mxu1 %v373_v49 }
 0x6e1   :  { %1320 = vmatpush.msrb.mxu1 %v372_v50  ;;  %3848 = vmatmul.msk.f32.gmra.mxu0 %vm226_vm6, %v4702_v15 }
 0x6e2   :  { %3835 = vmatmul.msk.f32.gmra.mxu1 %vm512_vm4, %v1007_v52 }
 0x6e9   :  { %3849 = vmatmul.msk.f32.gmra.mxu0 %vm226_vm6, %v4714_v19 }
 0x6ea   :  { %3836 = vmatmul.msk.f32.gmra.mxu1 %vm512_vm4, %v1010_v55 }
 0x6f2   :  { %3837 = vmatmul.msk.f32.gmra.mxu1 %vm512_vm4, %v1013_v58 }
 0x6fa   :  { %3850 = vmatmul.msk.f32.vlgmr.msrb.gmra.mxu1 %vm226_vm6, %v4679_v57 }
 0x702   :  { %3851 = vmatmul.msk.f32.gmra.mxu1 %vm226_vm6, %v4690_v7 }
 0x70a   :  { %3852 = vmatmul.msk.f32.gmra.mxu1 %vm226_vm6, %v4702_v15 }
 0x70e   :  { %v4890_v60 = vpop.f32.mrf.mxu0 }
 0x712   :  { %3853 = vmatmul.msk.f32.gmra.mxu1 %vm226_vm6, %v4714_v19 }
 0x716   :  { %v4894_v54 = vpop.f32.mrf.mxu0 }
 0x71e   :  { %v4896_v61 = vpop.f32.mrf.mxu0 }
 0x726   :  { %v4898_v62 = vpop.f32.mrf.mxu0 }
 0x72e   :  { %v1067_v1 = vpop.f32.mrf.mxu0 }
 0x72f   :  { %v1068_v16 = vadd.f32 %v4142_v59, %v1067_v1 }
 0x736   :  { %v1070_v3 = vpop.f32.mrf.mxu0 }
 0x737   :  { %v1071_v14 = vadd.f32 %v4142_v59, %v1070_v3 }
 0x73e   :  { %v1073_v8 = vpop.f32.mrf.mxu0 }
 0x73f   :  { %v1074_v13 = vadd.f32 %v4142_v59, %v1073_v8 }
 0x746   :  { %v1076_v10 = vpop.f32.mrf.mxu0 }
 0x747   :  { %v1077_v12 = vadd.f32 %v4142_v59, %v1076_v10 }
 0x749   :  { %1208 = vmatpush.msra.mxu2 %v1077_v12 }
 0x74b   :  { %1209 = vmatpush.msra.mxu2 %v1074_v13 }
 0x74d   :  { %1210 = vmatpush.msra.mxu2 %v1071_v14 }
 0x74f   :  { %1211 = vmatpush.msra.mxu2 %v1068_v16 }
 0x757   :  { %v1120_v18 = vpop.f32.mrf.mxu1 }
 0x758   :  { %v1132_v5 = vmul.f32 0.35355338, %v1120_v18  ;;  %v395_v18 = vld [vmem:[%s4488_s19 + $0x78] sm:$0xff] }
 0x759   :  { %1349 = vmatpush.msrb.mxu2 %v395_v18 }
 0x75a   :  { %v1136_v20 = vadd.f32 %v1132_v5, %v4763_v63  ;;  %v394_v5 = vld [vmem:[%s4488_s19 + $0x70] sm:$0xff] }
 0x75b   :  { %1350 = vmatpush.msrb.mxu2 %v394_v5 }
 0x75c   :  { %v1140_v21 = vsel %vm226_vm6, %v1136_v20, -inf }
 0x75d   :  { %1141 = vmax.xlane.f32.xlu2 %v1140_v21  ;;  %v392_v21 = vld [vmem:[%s4488_s19 + $0x60] sm:$0xff] }
 0x75f   :  { %v1123_v22 = vpop.f32.mrf.mxu1 }
 0x760   :  { %v1133_v23 = vmul.f32 0.35355338, %v1123_v22 }
 0x762   :  { %v1137_v24 = vadd.f32 %v1133_v23, %v4768_v6 }
 0x764   :  { %v1143_v25 = vsel %vm226_vm6, %v1137_v24, -inf }
 0x765   :  { %1144 = vmax.xlane.f32.xlu0 %v1143_v25 }
 0x767   :  { %v1126_v26 = vpop.f32.mrf.mxu1 }
 0x768   :  { %v1134_v27 = vmul.f32 0.35355338, %v1126_v26 }
 0x76a   :  { %v1138_v28 = vadd.f32 %v1134_v27, %v4773_v11 }
 0x76c   :  { %v1146_v29 = vsel %vm226_vm6, %v1138_v28, -inf }
 0x76d   :  { %1147 = vmax.xlane.f32.xlu1 %v1146_v29 }
 0x76f   :  { %v1129_v30 = vpop.f32.mrf.mxu1 }
 0x770   :  { %v1135_v31 = vmul.f32 0.35355338, %v1129_v30 }
 0x772   :  { %v1139_v33 = vadd.f32 %v1135_v31, %v4778_v17 }
 0x774   :  { %v1149_v34 = vsel %vm226_vm6, %v1139_v33, -inf }
 0x775   :  { %1150 = vmax.xlane.f32.xlu2 %v1149_v34 }
 0x777   :  { %v1322_v35 = vpop.f32.mrf.mxu1 }
 0x778   :  { %v1323_v43 = vadd.f32 %v4144_v38, %v1322_v35 }
 0x77f   :  { %v1325_v36 = vpop.f32.mrf.mxu1 }
 0x780   :  { %v1326_v42 = vadd.f32 %v4144_v38, %v1325_v36  ;;  %v1290_v36 = vpop.f32.mrf.mxu0 }
 0x787   :  { %v1328_v37 = vpop.f32.mrf.mxu1 }
 0x788   :  { %v1329_v41 = vadd.f32 %v4144_v38, %v1328_v37 }
 0x78f   :  { %v1331_v39 = vpop.f32.mrf.mxu1 }
 0x790   :  { %v1332_v40 = vadd.f32 %v4144_v38, %v1331_v39  ;;  %v4143_v38 = vld [vmem:[%s4473_s3 + $0x3] ss:$0 sm:$0xff] }
 0x791   :  { %v1291_v39 = vadd.f32 %v4143_v38, %v1290_v36 }
 0x792   :  { %3858 = vmatpush.xpose.msk.msrb.mxu3 %vm512_vm4, %v1332_v40  ;;  %v1293_v40 = vpop.f32.mrf.mxu0 }
 0x796   :  { %3859 = vmatpush.xpose.msk.msrb.mxu3 %vm512_vm4, %v1329_v41 }
 0x79a   :  { %3860 = vmatpush.xpose.msk.msrb.mxu3 %vm512_vm4, %v1326_v42  ;;  %v1294_v42 = vadd.f32 %v4143_v38, %v1293_v40 }
 0x79e   :  { %3861 = vmatpush.xpose.msk.msrb.mxu3 %vm512_vm4, %v1323_v43 }
 0x7d0   :  { %v1142_v44 = vpop.xlane.xlu2 %1141 }
 0x7d1   :  { %v1152_v45 = vsub.f32 %v1136_v20, %v1142_v44  ;;  %v393_v20 = vld [vmem:[%s4488_s19 + $0x68] sm:$0xff]  ;;  %v1296_v44 = vpop.f32.mrf.mxu0 }
 0x7d2   :  { %1351 = vmatpush.msrb.mxu2 %v393_v20 }
 0x7d3   :  { %v1156_v46 = vmul.f32 1.442695, %v1152_v45  ;;  %v1297_v45 = vadd.f32 %v4143_v38, %v1296_v44 }
 0x7d4   :  { %1352 = vmatpush.msrb.mxu2 %v392_v21 }
 0x7d5   :  { %4217 = vpow2.f32 %v1156_v46 }
 0x7d8   :  { %v1145_v47 = vpop.xlane.xlu0 %1144 }
 0x7d9   :  { %v1153_v48 = vsub.f32 %v1137_v24, %v1145_v47  ;;  %v1299_v47 = vpop.f32.mrf.mxu0 }
 0x7db   :  { %v4218_v49 = vpop.eup %4217  ;;  %v1158_v50 = vmul.f32 1.442695, %v1153_v48  ;;  %v1300_v48 = vadd.f32 %v4143_v38, %v1299_v47 }
 0x7dc   :  { %v1164_v52 = vsel %vm226_vm6, %v4218_v49, 0.0 }
 0x7dd   :  { %4219 = vpow2.f32 %v1158_v50  ;;  %1165 = vadd.xlane.f32.xlu0 %v1164_v52 }
 0x7e0   :  { %v1148_v53 = vpop.xlane.xlu1 %1147 }
 0x7e1   :  { %v1154_v55 = vsub.f32 %v1138_v28, %v1148_v53 }
 0x7e3   :  { %v4220_v56 = vpop.eup %4219  ;;  %v1160_v58 = vmul.f32 1.442695, %v1154_v55 }
 0x7e4   :  { %v1167_v1 = vsel %vm226_vm6, %v4220_v56, 0.0 }
 0x7e5   :  { %4221 = vpow2.f32 %v1160_v58  ;;  %1168 = vadd.xlane.f32.xlu1 %v1167_v1 }
 0x7e8   :  { %v1151_v3 = vpop.xlane.xlu2 %1150 }
 0x7e9   :  { %v1155_v8 = vsub.f32 %v1139_v33, %v1151_v3 }
 0x7eb   :  { %v4222_v59 = vpop.eup %4221  ;;  %v1162_v10 = vmul.f32 1.442695, %v1155_v8 }
 0x7ec   :  { %v1170_v12 = vsel %vm226_vm6, %v4222_v59, 0.0 }
 0x7ed   :  { %4223 = vpow2.f32 %v1162_v10  ;;  %1171 = vadd.xlane.f32.xlu2 %v1170_v12 }
 0x7f3   :  { %v4224_v13 = vpop.eup %4223 }
 0x7f4   :  { %v1173_v14 = vsel %vm226_vm6, %v4224_v13, 0.0 }
 0x7f5   :  { %1174 = vadd.xlane.f32.xlu0 %v1173_v14 }
 0x850   :  { %v1166_v16 = vpop.xlane.xlu0 %1165 }
 0x851   :  { %4225 = vrcp.f32 %v1166_v16 }
 0x857   :  { %v4226_v22 = vpop.eup %4225 }
 0x858   :  { %v1180_v23 = vmul.f32 %v4226_v22, %v4218_v49  ;;  %v1169_v24 = vpop.xlane.xlu1 %1168  ;;  %v4145_v49 = vld [vmem:[%s4493_s24 + $0x3] ss:$0 sm:$0xff] }
 0x859   :  { %4227 = vrcp.f32 %v1169_v24 }
 0x85a   :  { %3838 = vmatmul.msk.f32.vlgmr.msra.gmra.mxu2 %vm226_vm6, %v1180_v23 }
 0x85f   :  { %v4228_v25 = vpop.eup %4227 }
 0x860   :  { %v1172_v26 = vpop.xlane.xlu2 %1171  ;;  %v1181_v27 = vmul.f32 %v4228_v25, %v4220_v56 }
 0x861   :  { %4229 = vrcp.f32 %v1172_v26 }
 0x862   :  { %3839 = vmatmul.msk.f32.gmra.mxu2 %vm226_vm6, %v1181_v27 }
 0x867   :  { %v4230_v28 = vpop.eup %4229 }
 0x868   :  { %v1175_v29 = vpop.xlane.xlu0 %1174  ;;  %v1182_v30 = vmul.f32 %v4230_v28, %v4222_v59 }
 0x869   :  { %4231 = vrcp.f32 %v1175_v29 }
 0x86a   :  { %3840 = vmatmul.msk.f32.gmra.mxu2 %vm226_vm6, %v1182_v30 }
 0x86f   :  { %v4232_v31 = vpop.eup %4231 }
 0x870   :  { %v1183_v32 = vmul.f32 %v4232_v31, %v4224_v13 }
 0x872   :  { %3841 = vmatmul.msk.f32.gmra.mxu2 %vm226_vm6, %v1183_v32 }
 0x87a   :  { %3854 = vmatmul.msk.f32.vlgmr.msrb.gmra.mxu2 %vm226_vm6, %v4679_v57 }
 0x882   :  { %3855 = vmatmul.msk.f32.gmra.mxu2 %vm226_vm6, %v4690_v7 }
 0x88a   :  { %3856 = vmatmul.msk.f32.gmra.mxu2 %vm226_vm6, %v4702_v15 }
 0x892   :  { %3857 = vmatmul.msk.f32.gmra.mxu2 %vm226_vm6, %v4714_v19 }
 0x8dd   :  { %v1213_v33 = vpop.f32.mrf.mxu2 }
 0x8de   :  { %3842 = vmatmul.msk.f32.vlgmr.msra.gmra.mxu3 %vm512_vm4, %v1213_v33 }
 0x8e5   :  { %v1216_v34 = vpop.f32.mrf.mxu2 }
 0x8e6   :  { %3843 = vmatmul.msk.f32.gmra.mxu3 %vm512_vm4, %v1216_v34 }
 0x8ed   :  { %v1219_v35 = vpop.f32.mrf.mxu2 }
 0x8ee   :  { %3844 = vmatmul.msk.f32.gmra.mxu3 %vm512_vm4, %v1219_v35 }
 0x8f5   :  { %v1222_v37 = vpop.f32.mrf.mxu2 }
 0x8f6   :  { %3845 = vmatmul.msk.f32.gmra.mxu3 %vm512_vm4, %v1222_v37 }
 0x8fd   :  { %v1354_v41 = vpop.f32.mrf.mxu2 }
 0x8fe   :  { %3862 = vmatmul.msk.f32.vlgmr.msrb.gmra.mxu3 %vm512_vm4, %v1291_v39  ;;  %v1355_v56 = vadd.f32 %v4145_v49, %v1354_v41 }
 0x905   :  { %v1357_v43 = vpop.f32.mrf.mxu2 }
 0x906   :  { %3863 = vmatmul.msk.f32.gmra.mxu3 %vm512_vm4, %v1294_v42  ;;  %v1358_v55 = vadd.f32 %v4145_v49, %v1357_v43 }
 0x90d   :  { %v1360_v46 = vpop.f32.mrf.mxu2 }
 0x90e   :  { %3864 = vmatmul.msk.f32.gmra.mxu3 %vm512_vm4, %v1297_v45  ;;  %v1361_v53 = vadd.f32 %v4145_v49, %v1360_v46  ;;  %v403_v45 = vld [vmem:[%s4498_s30 + $0x18] sm:$0xff] }
 0x90f   :  { %1539 = vmatpush.msra.mxu1 %v403_v45 }
 0x915   :  { %v1363_v50 = vpop.f32.mrf.mxu2 }
 0x916   :  { %v1364_v52 = vadd.f32 %v4145_v49, %v1363_v50  ;;  %3865 = vmatmul.msk.f32.gmra.mxu3 %vm512_vm4, %v1300_v48 }
 0x918   :  { %1495 = vmatpush.msra.mxu0 %v1364_v52 }
 0x91a   :  { %1496 = vmatpush.msra.mxu0 %v1361_v53 }
 0x91c   :  { %1497 = vmatpush.msra.mxu0 %v1358_v55 }
 0x91e   :  { %1498 = vmatpush.msra.mxu0 %v1355_v56 }
 0x961   :  { %v4953_v58 = vpop.f32.mrf.mxu3 }
 0x969   :  { %v4955_v1 = vpop.f32.mrf.mxu3 }
 0x971   :  { %v4957_v3 = vpop.f32.mrf.mxu3 }
 0x979   :  { %v4959_v8 = vpop.f32.mrf.mxu3 }
 0x981   :  { %v1407_v59 = vpop.f32.mrf.mxu3 }
 0x982   :  { %v1419_v10 = vmul.f32 0.35355338, %v1407_v59 }
 0x984   :  { %v1423_v12 = vadd.f32 %v1419_v10, %v4763_v63 }
 0x986   :  { %v1427_v13 = vsel %vm226_vm6, %v1423_v12, -inf }
 0x987   :  { %1428 = vmax.xlane.f32.xlu1 %v1427_v13 }
 0x989   :  { %v1410_v14 = vpop.f32.mrf.mxu3 }
 0x98a   :  { %v1420_v16 = vmul.f32 0.35355338, %v1410_v14 }
 0x98c   :  { %v1424_v18 = vadd.f32 %v1420_v16, %v4768_v6 }
 0x98e   :  { %v1430_v5 = vsel %vm226_vm6, %v1424_v18, -inf }
 0x98f   :  { %1431 = vmax.xlane.f32.xlu2 %v1430_v5 }
 0x991   :  { %v1413_v20 = vpop.f32.mrf.mxu3 }
 0x992   :  { %v1421_v21 = vmul.f32 0.35355338, %v1413_v20  ;;  %v4146_v20 = vld [vmem:[%s4503_s6] ss:$0 sm:$0xff] }
 0x994   :  { %v1425_v22 = vadd.f32 %v1421_v21, %v4773_v11 }
 0x996   :  { %v1433_v23 = vsel %vm226_vm6, %v1425_v22, -inf }
 0x997   :  { %1434 = vmax.xlane.f32.xlu0 %v1433_v23 }
 0x999   :  { %v1416_v24 = vpop.f32.mrf.mxu3 }
 0x99a   :  { %v1422_v25 = vmul.f32 0.35355338, %v1416_v24  ;;  %v975_v24 = vadd.f32 %v4902_v4, %v4894_v54 }
 0x99c   :  { %v1426_v63 = vadd.f32 %v1422_v25, %v4778_v17 }
 0x99e   :  { %v1436_v26 = vsel %vm226_vm6, %v1426_v63, -inf }
 0x99f   :  { %1437 = vmax.xlane.f32.xlu1 %v1436_v26 }
 0x9fa   :  { %v1429_v27 = vpop.xlane.xlu1 %1428 }
 0x9fb   :  { %v1439_v28 = vsub.f32 %v1423_v12, %v1429_v27 }
 0x9fd   :  { %v1443_v6 = vmul.f32 1.442695, %v1439_v28 }
 0x9ff   :  { %4233 = vpow2.f32 %v1443_v6 }
 0xa02   :  { %v1432_v29 = vpop.xlane.xlu2 %1431 }
 0xa03   :  { %v1440_v30 = vsub.f32 %v1424_v18, %v1432_v29  ;;  %v972_v18 = vadd.f32 %v4900_v2, %v4890_v60  ;;  %v978_v60 = vadd.f32 %v4904_v9, %v4896_v61 }
 0xa05   :  { %v4234_v31 = vpop.eup %4233  ;;  %v1445_v32 = vmul.f32 1.442695, %v1440_v30  ;;  %v1266_v5 = vadd.f32 %v4953_v58, %v972_v18  ;;  %v1268_v58 = vadd.f32 %v4957_v3, %v978_v60 }
 0xa06   :  { %v1451_v11 = vsel %vm226_vm6, %v4234_v31, 0.0 }
 0xa07   :  { %4235 = vpow2.f32 %v1445_v32  ;;  %1452 = vadd.xlane.f32.xlu2 %v1451_v11 }
 0xa0a   :  { %v1435_v33 = vpop.xlane.xlu0 %1434 }
 0xa0b   :  { %v1441_v34 = vsub.f32 %v1425_v22, %v1435_v33 }
 0xa0d   :  { %v4236_v35 = vpop.eup %4235  ;;  %v1447_v36 = vmul.f32 1.442695, %v1441_v34 }
 0xa0e   :  { %v1454_v17 = vsel %vm226_vm6, %v4236_v35, 0.0 }
 0xa0f   :  { %4237 = vpow2.f32 %v1447_v36  ;;  %1455 = vadd.xlane.f32.xlu0 %v1454_v17 }
 0xa12   :  { %v1438_v37 = vpop.xlane.xlu1 %1437 }
 0xa13   :  { %v1442_v38 = vsub.f32 %v1426_v63, %v1438_v37  ;;  %v1267_v63 = vadd.f32 %v4955_v1, %v975_v24  ;;  %v981_v1 = vadd.f32 %v4907_v0, %v4898_v62 }
 0xa15   :  { %v4238_v39 = vpop.eup %4237  ;;  %v1449_v40 = vmul.f32 1.442695, %v1442_v38 }
 0xa16   :  { %v1457_v41 = vsel %vm226_vm6, %v4238_v39, 0.0 }
 0xa17   :  { %4239 = vpow2.f32 %v1449_v40  ;;  %1458 = vadd.xlane.f32.xlu1 %v1457_v41 }
 0xa1d   :  { %v4240_v42 = vpop.eup %4239 }
 0xa1e   :  { %v1460_v43 = vsel %vm226_vm6, %v4240_v42, 0.0 }
 0xa1f   :  { %1461 = vadd.xlane.f32.xlu2 %v1460_v43 }
 0xa7a   :  { %v1453_v44 = vpop.xlane.xlu2 %1452 }
 0xa7b   :  { %4241 = vrcp.f32 %v1453_v44 }
 0xa81   :  { %v4242_v46 = vpop.eup %4241 }
 0xa82   :  { %v1467_v47 = vmul.f32 %v4242_v46, %v4234_v31  ;;  %v1456_v48 = vpop.xlane.xlu0 %1455  ;;  %v1269_v31 = vadd.f32 %v4959_v8, %v981_v1 }
 0xa83   :  { %4243 = vrcp.f32 %v1456_v48  ;;  %v1675_v48 = vld [vmem:[%s5603_s0 + $0x10] sm:$0xff] }
 0xa84   :  { %3866 = vmatmul.msk.f32.vlgmr.msra.gmra.mxu0 %vm226_vm6, %v1467_v47  ;;  %v1676_v47 = vld [vmem:[%s5603_s0 + $0x18] sm:$0xff] }
 0xa85   :  { %1705 = vmatpush.msra.mxu2 %v1676_v47  ;;  %v1761_v47 = vld [vmem:[%s5606_s17 + $0x18] sm:$0xff] }
 0xa87   :  { %1706 = vmatpush.msra.mxu2 %v1675_v48  ;;  %v1759_v48 = vld [vmem:[%s5606_s17 + $0x8] sm:$0xff] }
 0xa89   :  { %v4244_v49 = vpop.eup %4243 }
 0xa8a   :  { %v1459_v50 = vpop.xlane.xlu1 %1458  ;;  %v1468_v52 = vmul.f32 %v4244_v49, %v4236_v35  ;;  %v1674_v49 = vld [vmem:[%s5603_s0 + $0x8] sm:$0xff] }
 0xa8b   :  { %4245 = vrcp.f32 %v1459_v50  ;;  %1707 = vmatpush.msra.mxu2 %v1674_v49  ;;  %v1673_v50 = vld [vmem:[%s5603_s0] sm:$0xff] }
 0xa8c   :  { %3867 = vmatmul.msk.f32.gmra.mxu0 %vm226_vm6, %v1468_v52  ;;  %v1758_v49 = vld [vmem:[%s5606_s17] sm:$0xff] }
 0xa8d   :  { %1708 = vmatpush.msra.mxu2 %v1673_v50  ;;  %v4149_v50 = vld [vmem:[%s5607_s21] ss:$0 sm:$0xff] }
 0xa91   :  { %v4246_v53 = vpop.eup %4245 }
 0xa92   :  { %v1462_v55 = vpop.xlane.xlu2 %1461  ;;  %v1469_v56 = vmul.f32 %v4246_v53, %v4238_v39 }
 0xa93   :  { %4247 = vrcp.f32 %v1462_v55 }
 0xa94   :  { %3868 = vmatmul.msk.f32.gmra.mxu0 %vm226_vm6, %v1469_v56 }
 0xa99   :  { %v4248_v59 = vpop.eup %4247 }
 0xa9a   :  { %v1470_v10 = vmul.f32 %v4248_v59, %v4240_v42 }
 0xa9c   :  { %3869 = vmatmul.msk.f32.gmra.mxu0 %vm226_vm6, %v1470_v10 }
 0xb01   :  { %v1500_v12 = vpop.f32.mrf.mxu0 }
 0xb02   :  { %3870 = vmatmul.msk.f32.vlgmr.msra.gmra.mxu1 %vm512_vm4, %v1500_v12 }
 0xb09   :  { %v1503_v13 = vpop.f32.mrf.mxu0 }
 0xb0a   :  { %3871 = vmatmul.msk.f32.gmra.mxu1 %vm512_vm4, %v1503_v13 }
 0xb11   :  { %v1506_v14 = vpop.f32.mrf.mxu0 }
 0xb12   :  { %3872 = vmatmul.msk.f32.gmra.mxu1 %vm512_vm4, %v1506_v14 }
 0xb19   :  { %v1509_v16 = vpop.f32.mrf.mxu0 }
 0xb1a   :  { %3873 = vmatmul.msk.f32.gmra.mxu1 %vm512_vm4, %v1509_v16 }
 0xb7f   :  { %v1541_v21 = vpop.f32.mrf.mxu1 }
 0xb80   :  { %v1553_v22 = vadd.f32 %v1541_v21, %v1266_v5 }
 0xb82   :  { %v1561_v23 = vadd.f32 %v4146_v20, %v1553_v22 }
 0xb84   :  { %v1565_v25 = vadd.f32 %v1561_v23, %v4679_v57 }
 0xb86   :  { %v1571_v26 = vsel %vm226_vm6, %v1565_v25, 0.0 }
 0xb87   :  { %1572 = vadd.xlane.f32.xlu0 %v1571_v26  ;;  %v1544_v27 = vpop.f32.mrf.mxu1 }
 0xb88   :  { %v1554_v28 = vadd.f32 %v1544_v27, %v1267_v63  ;;  %v4148_v27 = vld [vmem:[%s5605_s13] ss:$0 sm:$0xff] }
 0xb8a   :  { %v1562_v6 = vadd.f32 %v4146_v20, %v1554_v28 }
 0xb8c   :  { %v1566_v2 = vadd.f32 %v1562_v6, %v4690_v7 }
 0xb8e   :  { %v1574_v29 = vsel %vm226_vm6, %v1566_v2, 0.0 }
 0xb8f   :  { %1575 = vadd.xlane.f32.xlu1 %v1574_v29  ;;  %v1547_v54 = vpop.f32.mrf.mxu1 }
 0xb90   :  { %v1555_v57 = vadd.f32 %v1547_v54, %v1268_v58 }
 0xb92   :  { %v1563_v4 = vadd.f32 %v4146_v20, %v1555_v57 }
 0xb94   :  { %v1567_v30 = vadd.f32 %v1563_v4, %v4702_v15 }
 0xb96   :  { %v1577_v32 = vsel %vm226_vm6, %v1567_v30, 0.0 }
 0xb97   :  { %1578 = vadd.xlane.f32.xlu2 %v1577_v32  ;;  %v1550_v61 = vpop.f32.mrf.mxu1 }
 0xb98   :  { %v1556_v7 = vadd.f32 %v1550_v61, %v1269_v31 }
 0xb9a   :  { %v1564_v9 = vadd.f32 %v4146_v20, %v1556_v7 }
 0xb9c   :  { %v1568_v3 = vadd.f32 %v1564_v9, %v4714_v19 }
 0xb9e   :  { %v1580_v11 = vsel %vm226_vm6, %v1568_v3, 0.0 }
 0xb9f   :  { %1581 = vadd.xlane.f32.xlu0 %v1580_v11 }
 0xbfa   :  { %v1573_v33 = vpop.xlane.xlu0 %1572 }
 0xbfb   :  { %v1583_v34 = vmul.f32 %v1573_v33, %v4624_v51 }
 0xbfd   :  { %v1587_v35 = vsub.f32 %v1565_v25, %v1583_v34  ;;  %v4147_v25 = vld [vmem:[%s5604_s5] ss:$0 sm:$0xff] }
 0xbff   :  { %v1591_v62 = vmul.f32 %v1587_v35, %v1587_v35 }
 0xc01   :  { %v1595_v15 = vsel %vm226_vm6, %v1591_v62, 0.0 }
 0xc02   :  { %1596 = vadd.xlane.f32.xlu1 %v1595_v15  ;;  %v1576_v0 = vpop.xlane.xlu1 %1575 }
 0xc03   :  { %v1584_v8 = vmul.f32 %v1576_v0, %v4624_v51 }
 0xc05   :  { %v5006_v36 = vsub.f32 %v1566_v2, %v1584_v8 }
 0xc07   :  { %v1592_v19 = vmul.f32 %v5006_v36, %v5006_v36 }
 0xc09   :  { %v1598_v17 = vsel %vm226_vm6, %v1592_v19, 0.0 }
 0xc0a   :  { %v1579_v37 = vpop.xlane.xlu2 %1578  ;;  %1599 = vadd.xlane.f32.xlu2 %v1598_v17 }
 0xc0b   :  { %v1585_v38 = vmul.f32 %v1579_v37, %v4624_v51 }
 0xc0d   :  { %v5012_v39 = vsub.f32 %v1567_v30, %v1585_v38 }
 0xc0f   :  { %v1593_v40 = vmul.f32 %v5012_v39, %v5012_v39 }
 0xc11   :  { %v1601_v41 = vsel %vm226_vm6, %v1593_v40, 0.0 }
 0xc12   :  { %1602 = vadd.xlane.f32.xlu0 %v1601_v41  ;;  %v1582_v42 = vpop.xlane.xlu0 %1581 }
 0xc13   :  { %v1586_v43 = vmul.f32 %v1582_v42, %v4624_v51  ;;  %v1765_v42 = vld [vmem:[%s5606_s17 + $0x38] sm:$0xff] }
 0xc14   :  { %1791 = vmatpush.msra.mxu3 %v1765_v42 }
 0xc15   :  { %v5018_v44 = vsub.f32 %v1568_v3, %v1586_v43  ;;  %v1764_v43 = vld [vmem:[%s5606_s17 + $0x30] sm:$0xff] }
 0xc16   :  { %1792 = vmatpush.msra.mxu3 %v1764_v43 }
 0xc17   :  { %v1594_v45 = vmul.f32 %v5018_v44, %v5018_v44 }
 0xc19   :  { %v1604_v46 = vsel %vm226_vm6, %v1594_v45, 0.0  ;;  %v1763_v45 = vld [vmem:[%s5606_s17 + $0x28] sm:$0xff] }
 0xc1a   :  { %1605 = vadd.xlane.f32.xlu1 %v1604_v46  ;;  %1793 = vmatpush.msra.mxu3 %v1763_v45  ;;  %v1762_v46 = vld [vmem:[%s5606_s17 + $0x20] sm:$0xff] }
 0xc1c   :  { %1794 = vmatpush.msra.mxu3 %v1762_v46 }
 0xc1e   :  { %1795 = vmatpush.msra.mxu3 %v1761_v47 }
 0xc75   :  { %v1597_v52 = vpop.xlane.xlu1 %1596 }
 0xc76   :  { %v1607_v53 = vmul.f32 %v1597_v52, %v4624_v51 }
 0xc78   :  { %v1611_v55 = vadd.f32 1e-12, %v1607_v53 }
 0xc7a   :  { %4249 = vrsqrt.f32 %v1611_v55  ;;  %vm1621_vm7 = vweird.f32 %v1611_v55 }
 0xc7d   :  { %v1600_v56 = vpop.xlane.xlu2 %1599 }
 0xc7e   :  { %v1608_v59 = vmul.f32 %v1600_v56, %v4624_v51 }
 0xc80   :  { %v4250_v10 = vpop.eup %4249  ;;  %v1612_v12 = vadd.f32 1e-12, %v1608_v59 }
 0xc81   :  { %v1616_v13 = vmul.f32 %v4250_v10, %v1611_v55  ;;  %vm1622_vm5 = vweird.f32 %v4250_v10 }
 0xc82   :  { %4251 = vrsqrt.f32 %v1612_v12  ;;  %vm1623_vm8 = vmor %vm1621_vm7, %vm1622_vm5  ;;  %vm1631_vm10 = vweird.f32 %v1612_v12 }
 0xc83   :  { %v1617_v14 = vmul.f32 %v4250_v10, %v1616_v13 }
 0xc85   :  { %v1618_v16 = vmul.f32 0.5, %v1617_v14  ;;  %v1603_v18 = vpop.xlane.xlu0 %1602 }
 0xc86   :  { %v1609_v5 = vmul.f32 %v1603_v18, %v4624_v51 }
 0xc87   :  { %v1619_v20 = vsub.f32 1.5, %v1618_v16 }
 0xc88   :  { %v4252_v21 = vpop.eup %4251  ;;  %v1613_v22 = vadd.f32 1e-12, %v1609_v5 }
 0xc89   :  { %v1620_v23 = vmul.f32 %v4250_v10, %v1619_v20  ;;  %v1626_v24 = vmul.f32 %v4252_v21, %v1612_v12  ;;  %vm1632_vm9 = vweird.f32 %v4252_v21 }
 0xc8a   :  { %4253 = vrsqrt.f32 %v1613_v22  ;;  %vm1633_vm11 = vmor %vm1631_vm10, %vm1632_vm9  ;;  %vm1641_vm13 = vweird.f32 %v1613_v22 }
 0xc8b   :  { %v1624_v63 = vsel %vm1623_vm8, %v4250_v10, %v1620_v23  ;;  %v1627_v26 = vmul.f32 %v4252_v21, %v1626_v24 }
 0xc8c   :  { %v1655_v28 = vmul.f32 %v1624_v63, %v1587_v35 }
 0xc8d   :  { %v1628_v6 = vmul.f32 0.5, %v1627_v26  ;;  %v1606_v60 = vpop.xlane.xlu1 %1605 }
 0xc8e   :  { %v1662_v2 = vmul.f32 %v4147_v25, %v1655_v28  ;;  %v1610_v58 = vmul.f32 %v1606_v60, %v4624_v51 }
 0xc8f   :  { %v1629_v29 = vsub.f32 1.5, %v1628_v6 }
 0xc90   :  { %v4254_v54 = vpop.eup %4253  ;;  %v5033_v57 = vadd.f32 %v4148_v27, %v1662_v2  ;;  %v1614_v4 = vadd.f32 1e-12, %v1610_v58 }
 0xc91   :  { %v1630_v1 = vmul.f32 %v4252_v21, %v1629_v29  ;;  %v1636_v30 = vmul.f32 %v4254_v54, %v1613_v22  ;;  %vm1642_vm12 = vweird.f32 %v4254_v54 }
 0xc92   :  { %4255 = vrsqrt.f32 %v1614_v4  ;;  %3874 = vmatmul.msk.f32.vlgmr.msra.gmra.mxu2 %vm226_vm6, %v5033_v57  ;;  %vm1643_vm14 = vmor %vm1641_vm13, %vm1642_vm12  ;;  %vm1651_vm0 = vweird.f32 %v1614_v4 }
 0xc93   :  { %v1634_v31 = vsel %vm1633_vm11, %v4252_v21, %v1630_v1  ;;  %v1637_v32 = vmul.f32 %v4254_v54, %v1636_v30 }
 0xc94   :  { %v1656_v61 = vmul.f32 %v1634_v31, %v5006_v36 }
 0xc95   :  { %v1638_v7 = vmul.f32 0.5, %v1637_v32 }
 0xc96   :  { %v1663_v9 = vmul.f32 %v4147_v25, %v1656_v61 }
 0xc97   :  { %v1639_v3 = vsub.f32 1.5, %v1638_v7 }
 0xc98   :  { %v4256_v11 = vpop.eup %4255  ;;  %v5038_v33 = vadd.f32 %v4148_v27, %v1663_v9 }
 0xc99   :  { %v1640_v34 = vmul.f32 %v4254_v54, %v1639_v3  ;;  %v1646_v35 = vmul.f32 %v4256_v11, %v1614_v4  ;;  %vm1652_vm15 = vweird.f32 %v4256_v11 }
 0xc9a   :  { %3875 = vmatmul.msk.f32.gmra.mxu2 %vm226_vm6, %v5038_v33  ;;  %vm1653_vm1 = vmor %vm1651_vm0, %vm1652_vm15 }
 0xc9b   :  { %v1644_v62 = vsel %vm1643_vm14, %v4254_v54, %v1640_v34  ;;  %v1647_v15 = vmul.f32 %v4256_v11, %v1646_v35 }
 0xc9c   :  { %v1657_v0 = vmul.f32 %v1644_v62, %v5012_v39 }
 0xc9d   :  { %v1648_v8 = vmul.f32 0.5, %v1647_v15 }
 0xc9e   :  { %v1664_v36 = vmul.f32 %v4147_v25, %v1657_v0 }
 0xc9f   :  { %v1649_v19 = vsub.f32 1.5, %v1648_v8 }
 0xca0   :  { %v5043_v17 = vadd.f32 %v4148_v27, %v1664_v36  ;;  %v4150_v36 = vld [vmem:[%s5608_s25] ss:$0 sm:$0xff] }
 0xca1   :  { %v1650_v37 = vmul.f32 %v4256_v11, %v1649_v19 }
 0xca2   :  { %3876 = vmatmul.msk.f32.gmra.mxu2 %vm226_vm6, %v5043_v17 }
 0xca3   :  { %v1654_v38 = vsel %vm1653_vm1, %v4256_v11, %v1650_v37 }
 0xca4   :  { %v1658_v39 = vmul.f32 %v1654_v38, %v5018_v44  ;;  %v1760_v44 = vld [vmem:[%s5606_s17 + $0x10] sm:$0xff] }
 0xca5   :  { %1796 = vmatpush.msra.mxu3 %v1760_v44 }
 0xca6   :  { %v1665_v40 = vmul.f32 %v4147_v25, %v1658_v39 }
 0xca7   :  { %1797 = vmatpush.msra.mxu3 %v1759_v48 }
 0xca8   :  { %v5048_v41 = vadd.f32 %v4148_v27, %v1665_v40 }
 0xca9   :  { %1798 = vmatpush.msra.mxu3 %v1758_v49 }
 0xcaa   :  { %3877 = vmatmul.msk.f32.gmra.mxu2 %vm226_vm6, %v5048_v41 }
 0xd15   :  { %v1710_v52 = vpop.f32.mrf.mxu2 }
 0xd16   :  { %v1711_v53 = vadd.f32 %v4149_v50, %v1710_v52 }
 0xd18   :  { %v1722_v55 = vmul.f32 %v1711_v53, %v1711_v53 }
 0xd1a   :  { %v1726_v56 = vmul.f32 %v1722_v55, %v1711_v53 }
 0xd1c   :  { %v1730_v59 = vmul.f32 0.044715, %v1726_v56 }
 0xd1d   :  { %v1713_v10 = vpop.f32.mrf.mxu2 }
 0xd1e   :  { %v1734_v12 = vadd.f32 %v1730_v59, %v1711_v53  ;;  %v1714_v13 = vadd.f32 %v4149_v50, %v1713_v10 }
 0xd20   :  { %v1738_v14 = vmul.f32 0.7978846, %v1734_v12  ;;  %v1723_v16 = vmul.f32 %v1714_v13, %v1714_v13 }
 0xd22   :  { %4257 = vtanh.f32 %v1738_v14  ;;  %v1727_v18 = vmul.f32 %v1723_v16, %v1714_v13 }
 0xd24   :  { %v1731_v5 = vmul.f32 0.044715, %v1727_v18 }
 0xd25   :  { %v1716_v20 = vpop.f32.mrf.mxu2 }
 0xd26   :  { %v1735_v21 = vadd.f32 %v1731_v5, %v1714_v13  ;;  %v1717_v22 = vadd.f32 %v4149_v50, %v1716_v20 }
 0xd28   :  { %v4258_v23 = vpop.eup %4257  ;;  %v1739_v24 = vmul.f32 0.7978846, %v1735_v21  ;;  %v1724_v25 = vmul.f32 %v1717_v22, %v1717_v22 }
 0xd29   :  { %v1746_v63 = vadd.f32 1.0, %v4258_v23 }
 0xd2a   :  { %4259 = vtanh.f32 %v1739_v24  ;;  %v1728_v26 = vmul.f32 %v1724_v25, %v1717_v22 }
 0xd2b   :  { %v1750_v27 = vmul.f32 0.5, %v1746_v63  ;;  %v3905_v63 = vld [vmem:[%s4478_s8 + $0x98] sm:$0xff] }
 0xd2c   :  { %v1732_v28 = vmul.f32 0.044715, %v1728_v26  ;;  %v3885_v26 = vld [vmem:[%s4468_s29 + $0x98] sm:$0xff]  ;;  %2050 = vmatpush.msrb.mxu1 %v3905_v63 }
 0xd2d   :  { %v1754_v6 = vmul.f32 %v1750_v27, %v1711_v53  ;;  %v1719_v60 = vpop.f32.mrf.mxu2  ;;  %v3925_v27 = vld [vmem:[%s4488_s19 + $0x98] sm:$0xff]  ;;  %2018 = vmatpush.msrb.mxu0 %v3885_v26 }
 0xd2e   :  { %v1736_v2 = vadd.f32 %v1732_v28, %v1717_v22  ;;  %v1720_v58 = vadd.f32 %v4149_v50, %v1719_v60  ;;  %2082 = vmatpush.msrb.mxu2 %v3925_v27  ;;  %v3884_v28 = vld [vmem:[%s4468_s29 + $0x90] sm:$0xff] }
 0xd2f   :  { %3878 = vmatmul.msk.f32.vlgmr.msra.gmra.mxu3 %vm1770_vm2, %v1754_v6  ;;  %v3904_v6 = vld [vmem:[%s4478_s8 + $0x90] sm:$0xff]  ;;  %2019 = vmatpush.msrb.mxu0 %v3884_v28 }
 0xd30   :  { %v4260_v29 = vpop.eup %4259  ;;  %v1740_v54 = vmul.f32 0.7978846, %v1736_v2  ;;  %v1725_v4 = vmul.f32 %v1720_v58, %v1720_v58  ;;  %v3924_v60 = vld [vmem:[%s4488_s19 + $0x90] sm:$0xff]  ;;  %2051 = vmatpush.msrb.mxu1 %v3904_v6  ;;  %v3883_v2 = vld [vmem:[%s4468_s29 + $0x88] sm:$0xff] }
 0xd31   :  { %v1747_v1 = vadd.f32 1.0, %v4260_v29  ;;  %2083 = vmatpush.msrb.mxu2 %v3924_v60  ;;  %v3923_v29 = vld [vmem:[%s4488_s19 + $0x88] sm:$0xff]  ;;  %2020 = vmatpush.msrb.mxu0 %v3883_v2 }
 0xd32   :  { %4261 = vtanh.f32 %v1740_v54  ;;  %v1729_v30 = vmul.f32 %v1725_v4, %v1720_v58  ;;  %v3882_v54 = vld [vmem:[%s4468_s29 + $0x80] sm:$0xff] }
 0xd33   :  { %v1751_v31 = vmul.f32 0.5, %v1747_v1  ;;  %2084 = vmatpush.msrb.mxu2 %v3923_v29  ;;  %v3902_v4 = vld [vmem:[%s4478_s8 + $0x80] sm:$0xff]  ;;  %2021 = vmatpush.msrb.mxu0 %v3882_v54 }
 0xd34   :  { %v1733_v32 = vmul.f32 0.044715, %v1729_v30  ;;  %v3922_v1 = vld [vmem:[%s4488_s19 + $0x80] sm:$0xff] }
 0xd35   :  { %v1755_v61 = vmul.f32 %v1751_v31, %v1714_v13  ;;  %2085 = vmatpush.msrb.mxu2 %v3922_v1 }
 0xd36   :  { %v1737_v7 = vadd.f32 %v1733_v32, %v1720_v58 }
 0xd37   :  { %3879 = vmatmul.msk.f32.gmra.mxu3 %vm1770_vm2, %v1755_v61 }
 0xd38   :  { %v4262_v9 = vpop.eup %4261  ;;  %v1741_v3 = vmul.f32 0.7978846, %v1737_v7 }
 0xd39   :  { %v1748_v11 = vadd.f32 1.0, %v4262_v9 }
 0xd3a   :  { %4263 = vtanh.f32 %v1741_v3 }
 0xd3b   :  { %v1752_v34 = vmul.f32 0.5, %v1748_v11 }
 0xd3d   :  { %v1756_v35 = vmul.f32 %v1752_v34, %v1717_v22 }
 0xd3f   :  { %3880 = vmatmul.msk.f32.gmra.mxu3 %vm1770_vm2, %v1756_v35 }
 0xd40   :  { %v4264_v62 = vpop.eup %4263 }
 0xd41   :  { %v1749_v15 = vadd.f32 1.0, %v4264_v62 }
 0xd43   :  { %v1753_v0 = vmul.f32 0.5, %v1749_v15 }
 0xd45   :  { %v1757_v8 = vmul.f32 %v1753_v0, %v1720_v58  ;;  %v3903_v58 = vld [vmem:[%s4478_s8 + $0x88] sm:$0xff] }
 0xd46   :  { %2052 = vmatpush.msrb.mxu1 %v3903_v58 }
 0xd47   :  { %3881 = vmatmul.msk.f32.gmra.mxu3 %vm1770_vm2, %v1757_v8 }
 0xd48   :  { %2053 = vmatpush.msrb.mxu1 %v3902_v4 }
 0xdb2   :  { %v1800_v19 = vpop.f32.mrf.mxu3 }
 0xdb3   :  { %v1801_v37 = vadd.f32 %v4150_v36, %v1800_v19 }
 0xdb5   :  { %v1812_v38 = vadd.f32 %v1801_v37, %v5033_v57 }
 0xdb7   :  { %v1818_v39 = vsel %vm226_vm6, %v1812_v38, 0.0 }
 0xdb8   :  { %1819 = vadd.xlane.f32.xlu2 %v1818_v39 }
 0xdba   :  { %v1803_v40 = vpop.f32.mrf.mxu3 }
 0xdbb   :  { %v1804_v42 = vadd.f32 %v4150_v36, %v1803_v40 }
 0xdbd   :  { %v1813_v43 = vadd.f32 %v1804_v42, %v5038_v33  ;;  %v3889_v42 = vld [vmem:[%s4468_s29 + $0xb8] sm:$0xff] }
 0xdbe   :  { %2260 = vmatpush.msra.mxu1 %v3889_v42 }
 0xdbf   :  { %v1821_v45 = vsel %vm226_vm6, %v1813_v43, 0.0 }
 0xdc0   :  { %1822 = vadd.xlane.f32.xlu0 %v1821_v45  ;;  %v3888_v45 = vld [vmem:[%s4468_s29 + $0xb0] sm:$0xff] }
 0xdc1   :  { %2261 = vmatpush.msra.mxu1 %v3888_v45  ;;  %v3928_v45 = vld [vmem:[%s4488_s19 + $0xb0] sm:$0xff] }
 0xdc2   :  { %v1806_v46 = vpop.f32.mrf.mxu3 }
 0xdc3   :  { %v1807_v47 = vadd.f32 %v4150_v36, %v1806_v46  ;;  %v5120_v46 = vld [vmem:[%s5610_s23] ss:$0 sm:$0xff] }
 0xdc5   :  { %v1814_v44 = vadd.f32 %v1807_v47, %v5043_v17 }
 0xdc7   :  { %v1824_v48 = vsel %vm226_vm6, %v1814_v44, 0.0 }
 0xdc8   :  { %1825 = vadd.xlane.f32.xlu1 %v1824_v48 }
 0xdca   :  { %v1809_v49 = vpop.f32.mrf.mxu3 }
 0xdcb   :  { %v1810_v50 = vadd.f32 %v4150_v36, %v1809_v49 }
 0xdcd   :  { %v1815_v57 = vadd.f32 %v1810_v50, %v5048_v41  ;;  %v3887_v50 = vld [vmem:[%s4468_s29 + $0xa8] sm:$0xff] }
 0xdce   :  { %2262 = vmatpush.msra.mxu1 %v3887_v50 }
 0xdcf   :  { %v1827_v52 = vsel %vm226_vm6, %v1815_v57, 0.0 }
 0xdd0   :  { %1828 = vadd.xlane.f32.xlu2 %v1827_v52 }
 0xe2b   :  { %v1820_v53 = vpop.xlane.xlu2 %1819 }
 0xe2c   :  { %v1830_v33 = vmul.f32 %v1820_v53, %v4624_v51 }
 0xe2e   :  { %v5075_v55 = vsub.f32 %v1812_v38, %v1830_v33  ;;  %v5114_v38 = vld [vmem:[%s5609_s22] ss:$0 sm:$0xff] }
 0xe30   :  { %v1838_v56 = vmul.f32 %v5075_v55, %v5075_v55 }
 0xe32   :  { %v1842_v17 = vsel %vm226_vm6, %v1838_v56, 0.0 }
 0xe33   :  { %1843 = vadd.xlane.f32.xlu0 %v1842_v17  ;;  %v1823_v59 = vpop.xlane.xlu0 %1822 }
 0xe34   :  { %v1831_v10 = vmul.f32 %v1823_v59, %v4624_v51  ;;  %v3886_v59 = vld [vmem:[%s4468_s29 + $0xa0] sm:$0xff] }
 0xe35   :  { %2263 = vmatpush.msra.mxu1 %v3886_v59 }
 0xe36   :  { %v5081_v12 = vsub.f32 %v1813_v43, %v1831_v10  ;;  %v3909_v43 = vld [vmem:[%s4478_s8 + $0xb8] sm:$0xff] }
 0xe37   :  { %2292 = vmatpush.msra.mxu2 %v3909_v43 }
 0xe38   :  { %v1839_v41 = vmul.f32 %v5081_v12, %v5081_v12 }
 0xe3a   :  { %v1845_v13 = vsel %vm226_vm6, %v1839_v41, 0.0 }
 0xe3b   :  { %v1826_v14 = vpop.xlane.xlu1 %1825  ;;  %1846 = vadd.xlane.f32.xlu1 %v1845_v13  ;;  %v3906_v13 = vld [vmem:[%s4478_s8 + $0xa0] sm:$0xff] }
 0xe3c   :  { %v1832_v16 = vmul.f32 %v1826_v14, %v4624_v51 }
 0xe3e   :  { %v5087_v18 = vsub.f32 %v1814_v44, %v1832_v16  ;;  %v3908_v44 = vld [vmem:[%s4478_s8 + $0xb0] sm:$0xff] }
 0xe3f   :  { %2293 = vmatpush.msra.mxu2 %v3908_v44  ;;  %v3926_v44 = vld [vmem:[%s4488_s19 + $0xa0] sm:$0xff] }
 0xe40   :  { %v1840_v5 = vmul.f32 %v5087_v18, %v5087_v18 }
 0xe42   :  { %v1848_v20 = vsel %vm226_vm6, %v1840_v5, 0.0 }
 0xe43   :  { %v1829_v21 = vpop.xlane.xlu2 %1828  ;;  %1849 = vadd.xlane.f32.xlu2 %v1848_v20 }
 0xe44   :  { %v1833_v22 = vmul.f32 %v1829_v21, %v4624_v51 }
 0xe46   :  { %v5093_v23 = vsub.f32 %v1815_v57, %v1833_v22  ;;  %v3907_v57 = vld [vmem:[%s4478_s8 + $0xa8] sm:$0xff] }
 0xe47   :  { %2294 = vmatpush.msra.mxu2 %v3907_v57 }
 0xe48   :  { %v1841_v24 = vmul.f32 %v5093_v23, %v5093_v23 }
 0xe49   :  { %2295 = vmatpush.msra.mxu2 %v3906_v13 }
 0xe4a   :  { %v1851_v25 = vsel %vm226_vm6, %v1841_v24, 0.0 }
 0xe4b   :  { %1852 = vadd.xlane.f32.xlu0 %v1851_v25 }
 0xea6   :  { %v1844_v30 = vpop.xlane.xlu0 %1843 }
 0xea7   :  { %v1854_v31 = vmul.f32 %v1844_v30, %v4624_v51 }
 0xea9   :  { %v1858_v32 = vadd.f32 1e-12, %v1854_v31 }
 0xeab   :  { %4265 = vrsqrt.f32 %v1858_v32  ;;  %vm1868_vm5 = vweird.f32 %v1858_v32 }
 0xeae   :  { %v1847_v61 = vpop.xlane.xlu1 %1846 }
 0xeaf   :  { %v1855_v7 = vmul.f32 %v1847_v61, %v4624_v51 }
 0xeb1   :  { %v4266_v9 = vpop.eup %4265  ;;  %v1859_v3 = vadd.f32 1e-12, %v1855_v7  ;;  %v4154_v7 = vld [vmem:[%s4483_s14 + $0x4] ss:$0 sm:$0xff] }
 0xeb2   :  { %v1863_v11 = vmul.f32 %v4266_v9, %v1858_v32  ;;  %vm1869_vm3 = vweird.f32 %v4266_v9 }
 0xeb3   :  { %4267 = vrsqrt.f32 %v1859_v3  ;;  %vm1870_vm7 = vmor %vm1868_vm5, %vm1869_vm3  ;;  %vm1878_vm9 = vweird.f32 %v1859_v3 }
 0xeb4   :  { %v1864_v34 = vmul.f32 %v4266_v9, %v1863_v11 }
 0xeb6   :  { %v1865_v35 = vmul.f32 0.5, %v1864_v34  ;;  %v1850_v62 = vpop.xlane.xlu2 %1849 }
 0xeb7   :  { %v1856_v15 = vmul.f32 %v1850_v62, %v4624_v51 }
 0xeb8   :  { %v1866_v0 = vsub.f32 1.5, %v1865_v35  ;;  %v4155_v35 = vld [vmem:[%s4493_s24 + $0x4] ss:$0 sm:$0xff] }
 0xeb9   :  { %v4268_v8 = vpop.eup %4267  ;;  %v1860_v36 = vadd.f32 1e-12, %v1856_v15 }
 0xeba   :  { %v1867_v19 = vmul.f32 %v4266_v9, %v1866_v0  ;;  %v1873_v37 = vmul.f32 %v4268_v8, %v1859_v3  ;;  %vm1879_vm8 = vweird.f32 %v4268_v8 }
 0xebb   :  { %4269 = vrsqrt.f32 %v1860_v36  ;;  %vm1880_vm10 = vmor %vm1878_vm9, %vm1879_vm8  ;;  %vm1888_vm12 = vweird.f32 %v1860_v36 }
 0xebc   :  { %v1871_v39 = vsel %vm1870_vm7, %v4266_v9, %v1867_v19  ;;  %v1874_v40 = vmul.f32 %v4268_v8, %v1873_v37  ;;  %v4153_v19 = vld [vmem:[%s4473_s3 + $0x4] ss:$0 sm:$0xff] }
 0xebd   :  { %v1902_v47 = vmul.f32 %v1871_v39, %v5075_v55  ;;  %v3929_v39 = vld [vmem:[%s4488_s19 + $0xb8] sm:$0xff] }
 0xebe   :  { %v1875_v48 = vmul.f32 0.5, %v1874_v40  ;;  %v1853_v49 = vpop.xlane.xlu0 %1852 }
 0xebf   :  { %v1909_v52 = vmul.f32 %v5114_v38, %v1902_v47  ;;  %v1857_v53 = vmul.f32 %v1853_v49, %v4624_v51  ;;  %v3927_v47 = vld [vmem:[%s4488_s19 + $0xa8] sm:$0xff] }
 0xec0   :  { %v1876_v33 = vsub.f32 1.5, %v1875_v48 }
 0xec1   :  { %v4270_v56 = vpop.eup %4269  ;;  %v5129_v55 = vadd.f32 %v5120_v46, %v1909_v52  ;;  %v1861_v17 = vadd.f32 1e-12, %v1857_v53 }
 0xec2   :  { %v1877_v10 = vmul.f32 %v4268_v8, %v1876_v33  ;;  %v1883_v41 = vmul.f32 %v4270_v56, %v1860_v36  ;;  %vm1889_vm11 = vweird.f32 %v4270_v56  ;;  %v4157_v33 = vld [vmem:[%s4483_s14 + $0x5] ss:$0 sm:$0xff] }
 0xec3   :  { %4271 = vrsqrt.f32 %v1861_v17  ;;  %3946 = vmatmul.msk.f32.vlgmr.msrb.gmra.mxu0 %vm226_vm6, %v5129_v55  ;;  %3950 = vmatmul.msk.f32.vlgmr.msrb.gmra.mxu1 %vm226_vm6, %v5129_v55  ;;  %vm1890_vm13 = vmor %vm1888_vm12, %vm1889_vm11  ;;  %vm1898_vm15 = vweird.f32 %v1861_v17 }
 0xec4   :  { %v1881_v14 = vsel %vm1880_vm10, %v4268_v8, %v1877_v10  ;;  %v1884_v16 = vmul.f32 %v4270_v56, %v1883_v41  ;;  %3954 = vmatmul.msk.f32.vlgmr.msrb.gmra.mxu2 %vm226_vm6, %v5129_v55 }
 0xec5   :  { %v1903_v5 = vmul.f32 %v1881_v14, %v5081_v12 }
 0xec6   :  { %v1885_v20 = vmul.f32 0.5, %v1884_v16 }
 0xec7   :  { %v1910_v21 = vmul.f32 %v5114_v38, %v1903_v5  ;;  %v5217_v5 = vld [vmem:[%s4443_s9] sm:$0xff] }
 0xec8   :  { %v1886_v22 = vsub.f32 1.5, %v1885_v20 }
 0xec9   :  { %v4272_v24 = vpop.eup %4271  ;;  %v5142_v25 = vadd.f32 %v5120_v46, %v1910_v21 }
 0xeca   :  { %v1887_v63 = vmul.f32 %v4270_v56, %v1886_v22  ;;  %v1893_v26 = vmul.f32 %v4272_v24, %v1861_v17  ;;  %vm1899_vm14 = vweird.f32 %v4272_v24 }
 0xecb   :  { %3947 = vmatmul.msk.f32.gmra.mxu0 %vm226_vm6, %v5142_v25  ;;  %3951 = vmatmul.msk.f32.gmra.mxu1 %vm226_vm6, %v5142_v25  ;;  %vm1900_vm0 = vmor %vm1898_vm15, %vm1899_vm14 }
 0xecc   :  { %v1891_v12 = vsel %vm1890_vm13, %v4270_v56, %v1887_v63  ;;  %v1894_v27 = vmul.f32 %v4272_v24, %v1893_v26  ;;  %3955 = vmatmul.msk.f32.gmra.mxu2 %vm226_vm6, %v5142_v25  ;;  %v5222_v63 = vld [vmem:[%s4443_s9 + $0x8] sm:$0xff] }
 0xecd   :  { %v1904_v28 = vmul.f32 %v1891_v12, %v5087_v18 }
 0xece   :  { %v1895_v6 = vmul.f32 0.5, %v1894_v27 }
 0xecf   :  { %v1911_v60 = vmul.f32 %v5114_v38, %v1904_v28 }
 0xed0   :  { %v1896_v2 = vsub.f32 1.5, %v1895_v6  ;;  %v5227_v6 = vld [vmem:[%s4443_s9 + $0x10] sm:$0xff] }
 0xed1   :  { %v5153_v58 = vadd.f32 %v5120_v46, %v1911_v60 }
 0xed2   :  { %v1897_v29 = vmul.f32 %v4272_v24, %v1896_v2 }
 0xed3   :  { %3948 = vmatmul.msk.f32.gmra.mxu0 %vm226_vm6, %v5153_v58  ;;  %3952 = vmatmul.msk.f32.gmra.mxu1 %vm226_vm6, %v5153_v58 }
 0xed4   :  { %v1901_v54 = vsel %vm1900_vm0, %v4272_v24, %v1897_v29  ;;  %3956 = vmatmul.msk.f32.gmra.mxu2 %vm226_vm6, %v5153_v58 }
 0xed5   :  { %v1905_v18 = vmul.f32 %v1901_v54, %v5093_v23 }
 0xed7   :  { %v1912_v4 = vmul.f32 %v5114_v38, %v1905_v18  ;;  %v5232_v18 = vld [vmem:[%s4443_s9 + $0x18] sm:$0xff]  ;;  %s5611_s9 = sld [smem:[#allocation13_spill]] }
 0xed9   :  { %v5164_v1 = vadd.f32 %v5120_v46, %v1912_v4 }
 0xedb   :  { %3949 = vmatmul.msk.f32.gmra.mxu0 %vm226_vm6, %v5164_v1  ;;  %3953 = vmatmul.msk.f32.gmra.mxu1 %vm226_vm6, %v5164_v1 }
 0xedc   :  { %3957 = vmatmul.msk.f32.gmra.mxu2 %vm226_vm6, %v5164_v1 }
 0xee3   :  { %3970 = vmatmul.msk.f32.vlgmr.msra.gmra.mxu1 %vm226_vm6, %v5129_v55 }
 0xee4   :  { %3974 = vmatmul.msk.f32.vlgmr.msra.gmra.mxu2 %vm226_vm6, %v5129_v55 }
 0xeeb   :  { %3971 = vmatmul.msk.f32.gmra.mxu1 %vm226_vm6, %v5142_v25 }
 0xeec   :  { %3975 = vmatmul.msk.f32.gmra.mxu2 %vm226_vm6, %v5142_v25 }
 0xef3   :  { %3972 = vmatmul.msk.f32.gmra.mxu1 %vm226_vm6, %v5153_v58 }
 0xef4   :  { %3976 = vmatmul.msk.f32.gmra.mxu2 %vm226_vm6, %v5153_v58 }
 0xefb   :  { %3973 = vmatmul.msk.f32.gmra.mxu1 %vm226_vm6, %v5164_v1 }
 0xefc   :  { %3977 = vmatmul.msk.f32.gmra.mxu2 %vm226_vm6, %v5164_v1 }
 0xf40   :  { %v2055_v23 = vpop.f32.mrf.mxu1  ;;  %v2023_v62 = vpop.f32.mrf.mxu0 }
 0xf41   :  { %v2056_v38 = vadd.f32 %v4154_v7, %v2055_v23  ;;  %v2024_v43 = vadd.f32 %v4153_v19, %v2023_v62 }
 0xf47   :  { %v2087_v30 = vpop.f32.mrf.mxu2 }
 0xf48   :  { %v2058_v31 = vpop.f32.mrf.mxu1  ;;  %v2088_v40 = vadd.f32 %v4155_v35, %v2087_v30  ;;  %v2026_v46 = vpop.f32.mrf.mxu0 }
 0xf49   :  { %v2059_v8 = vadd.f32 %v4154_v7, %v2058_v31  ;;  %v2027_v49 = vadd.f32 %v4153_v19, %v2026_v46 }
 0xf4f   :  { %v2090_v32 = vpop.f32.mrf.mxu2 }
 0xf50   :  { %v2061_v61 = vpop.f32.mrf.mxu1  ;;  %v2091_v37 = vadd.f32 %v4155_v35, %v2090_v32  ;;  %v2029_v50 = vpop.f32.mrf.mxu0 }
 0xf51   :  { %v2062_v34 = vadd.f32 %v4154_v7, %v2061_v61  ;;  %v2030_v52 = vadd.f32 %v4153_v19, %v2029_v50  ;;  %v4158_v61 = vld [vmem:[%s4493_s24 + $0x5] ss:$0 sm:$0xff] }
 0xf57   :  { %v2093_v9 = vpop.f32.mrf.mxu2 }
 0xf58   :  { %v2064_v3 = vpop.f32.mrf.mxu1  ;;  %v2094_v36 = vadd.f32 %v4155_v35, %v2093_v9  ;;  %v2032_v53 = vpop.f32.mrf.mxu0 }
 0xf59   :  { %v2065_v11 = vadd.f32 %v4154_v7, %v2064_v3  ;;  %v2033_v17 = vadd.f32 %v4153_v19, %v2032_v53 }
 0xf5b   :  { %3958 = vmatpush.xpose.msk.msrb.mxu3 %vm512_vm4, %v2065_v11 }
 0xf5f   :  { %v2096_v15 = vpop.f32.mrf.mxu2  ;;  %3959 = vmatpush.xpose.msk.msrb.mxu3 %vm512_vm4, %v2062_v34 }
 0xf60   :  { %v2097_v0 = vadd.f32 %v4155_v35, %v2096_v15 }
 0xf62   :  { %2228 = vmatpush.msra.mxu0 %v2097_v0 }
 0xf63   :  { %3960 = vmatpush.xpose.msk.msrb.mxu3 %vm512_vm4, %v2059_v8 }
 0xf64   :  { %2229 = vmatpush.msra.mxu0 %v2094_v36 }
 0xf66   :  { %2230 = vmatpush.msra.mxu0 %v2091_v37 }
 0xf67   :  { %v2297_v42 = vpop.f32.mrf.mxu2  ;;  %3961 = vmatpush.xpose.msk.msrb.mxu3 %vm512_vm4, %v2056_v38 }
 0xf68   :  { %2231 = vmatpush.msra.mxu0 %v2088_v40  ;;  %v2298_v13 = vadd.f32 %v4157_v33, %v2297_v42 }
 0xf6a   :  { %3962 = vmatmul.msk.f32.vlgmr.msrb.gmra.mxu3 %vm512_vm4, %v2024_v43 }
 0xf6b   :  { %2324 = vmatpush.msra.mxu3 %v3929_v39 }
 0xf6d   :  { %2325 = vmatpush.msra.mxu3 %v3928_v45 }
 0xf6f   :  { %2326 = vmatpush.msra.mxu3 %v3927_v47  ;;  %v2300_v48 = vpop.f32.mrf.mxu2 }
 0xf70   :  { %v2301_v41 = vadd.f32 %v4157_v33, %v2300_v48 }
 0xf71   :  { %2327 = vmatpush.msra.mxu3 %v3926_v44 }
 0xf72   :  { %3963 = vmatmul.msk.f32.gmra.mxu3 %vm512_vm4, %v2027_v49 }
 0xf77   :  { %v2303_v57 = vpop.f32.mrf.mxu2 }
 0xf78   :  { %v2304_v10 = vadd.f32 %v4157_v33, %v2303_v57 }
 0xf7a   :  { %3964 = vmatmul.msk.f32.gmra.mxu3 %vm512_vm4, %v2030_v52 }
 0xf7f   :  { %v2306_v56 = vpop.f32.mrf.mxu2 }
 0xf80   :  { %v2307_v59 = vadd.f32 %v4157_v33, %v2306_v56 }
 0xf82   :  { %3982 = vmatpush.xpose.msk.msrb.mxu0 %vm512_vm4, %v2307_v59  ;;  %3965 = vmatmul.msk.f32.gmra.mxu3 %vm512_vm4, %v2033_v17 }
 0xf86   :  { %3983 = vmatpush.xpose.msk.msrb.mxu0 %vm512_vm4, %v2304_v10 }
 0xf8a   :  { %3984 = vmatpush.xpose.msk.msrb.mxu0 %vm512_vm4, %v2301_v41  ;;  %3978 = vmatmul.msk.f32.vlgmr.msra.gmra.mxu3 %vm226_vm6, %v5129_v55 }
 0xf8e   :  { %3985 = vmatpush.xpose.msk.msrb.mxu0 %vm512_vm4, %v2298_v13 }
 0xf92   :  { %3979 = vmatmul.msk.f32.gmra.mxu3 %vm226_vm6, %v5142_v25 }
 0xf9a   :  { %3980 = vmatmul.msk.f32.gmra.mxu3 %vm226_vm6, %v5153_v58 }
 0xfa2   :  { %3981 = vmatmul.msk.f32.gmra.mxu3 %vm226_vm6, %v5164_v1 }
 0xfed   :  { %v2140_v14 = vpop.f32.mrf.mxu3 }
 0xfee   :  { %v2152_v16 = vmul.f32 0.35355338, %v2140_v14 }
 0xff0   :  { %v2156_v20 = vadd.f32 %v5217_v5, %v2152_v16  ;;  %v2265_v16 = vpop.f32.mrf.mxu1 }
 0xff2   :  { %v2160_v21 = vsel %vm226_vm6, %v2156_v20, -inf }
 0xff3   :  { %2161 = vmax.xlane.f32.xlu1 %v2160_v21  ;;  %v3893_v21 = vld [vmem:[%s4468_s29 + $0xd8] sm:$0xff] }
 0xff5   :  { %v2143_v22 = vpop.f32.mrf.mxu3 }
 0xff6   :  { %v2153_v24 = vmul.f32 0.35355338, %v2143_v22  ;;  %v3892_v22 = vld [vmem:[%s4468_s29 + $0xd0] sm:$0xff] }
 0xff8   :  { %v2157_v26 = vadd.f32 %v5222_v63, %v2153_v24  ;;  %v4156_v24 = vld [vmem:[%s4473_s3 + $0x5] ss:$0 sm:$0xff] }
 0xffa   :  { %v2163_v12 = vsel %vm226_vm6, %v2157_v26, -inf }
 0xffb   :  { %2164 = vmax.xlane.f32.xlu2 %v2163_v12  ;;  %v3890_v12 = vld [vmem:[%s4468_s29 + $0xc0] sm:$0xff] }
 0xffd   :  { %v2146_v27 = vpop.f32.mrf.mxu3 }
 0xffe   :  { %v2154_v28 = vmul.f32 0.35355338, %v2146_v27  ;;  %v2266_v27 = vadd.f32 %v4156_v24, %v2265_v16  ;;  %v3913_v16 = vld [vmem:[%s4478_s8 + $0xd8] sm:$0xff] }
0x1000   :  { %v2158_v60 = vadd.f32 %v5227_v6, %v2154_v28  ;;  %v2268_v28 = vpop.f32.mrf.mxu1 }
0x1002   :  { %v2166_v2 = vsel %vm226_vm6, %v2158_v60, -inf }
0x1003   :  { %2167 = vmax.xlane.f32.xlu0 %v2166_v2 }
0x1005   :  { %v2149_v29 = vpop.f32.mrf.mxu3 }
0x1006   :  { %v2155_v54 = vmul.f32 0.35355338, %v2149_v29 }
0x1008   :  { %v2159_v4 = vadd.f32 %v5232_v18, %v2155_v54  ;;  %v2271_v2 = vpop.f32.mrf.mxu1 }
0x1009   :  { %v2272_v29 = vadd.f32 %v4156_v24, %v2271_v2 }
0x100a   :  { %v2169_v23 = vsel %vm226_vm6, %v2159_v4, -inf }
0x100b   :  { %2170 = vmax.xlane.f32.xlu1 %v2169_v23  ;;  %v3942_v23 = vld [vmem:[%s4498_s30 + $0x20] sm:$0xff] }
0x100c   :  { %2555 = vmatpush.msrb.mxu3 %v3942_v23 }
0x100d   :  { %v2329_v30 = vpop.f32.mrf.mxu3 }
0x100e   :  { %v2330_v34 = vadd.f32 %v4158_v61, %v2329_v30 }
0x1010   :  { %v2274_v54 = vpop.f32.mrf.mxu1 }
0x1015   :  { %v2332_v31 = vpop.f32.mrf.mxu3 }
0x1016   :  { %v2333_v11 = vadd.f32 %v4158_v61, %v2332_v31 }
0x101d   :  { %v2335_v32 = vpop.f32.mrf.mxu3 }
0x101e   :  { %v2336_v3 = vadd.f32 %v4158_v61, %v2335_v32 }
0x1025   :  { %v2338_v7 = vpop.f32.mrf.mxu3 }
0x1026   :  { %v2339_v9 = vadd.f32 %v4158_v61, %v2338_v7 }
0x1028   :  { %2470 = vmatpush.msrb.mxu1 %v2339_v9 }
0x102a   :  { %2471 = vmatpush.msrb.mxu1 %v2336_v3 }
0x102c   :  { %2472 = vmatpush.msrb.mxu1 %v2333_v11 }
0x102e   :  { %2473 = vmatpush.msrb.mxu1 %v2330_v34 }
0x1030   :  { %2616 = vmatpush.msra.mxu1 %v3913_v16 }
0x1066   :  { %v2162_v35 = vpop.xlane.xlu1 %2161 }
0x1067   :  { %v2172_v62 = vsub.f32 %v2156_v20, %v2162_v35 }
0x1069   :  { %v2176_v15 = vmul.f32 1.442695, %v2172_v62 }
0x106b   :  { %4273 = vpow2.f32 %v2176_v15 }
0x106e   :  { %v2165_v0 = vpop.xlane.xlu2 %2164 }
0x106f   :  { %v2173_v8 = vsub.f32 %v2157_v26, %v2165_v0  ;;  %v3891_v26 = vld [vmem:[%s4468_s29 + $0xc8] sm:$0xff] }
0x1071   :  { %v4274_v36 = vpop.eup %4273  ;;  %v2178_v19 = vmul.f32 1.442695, %v2173_v8 }
0x1072   :  { %v2184_v37 = vsel %vm226_vm6, %v4274_v36, 0.0 }
0x1073   :  { %4275 = vpow2.f32 %v2178_v19  ;;  %2185 = vadd.xlane.f32.xlu2 %v2184_v37 }
0x1076   :  { %v2168_v38 = vpop.xlane.xlu0 %2167 }
0x1077   :  { %v2174_v39 = vsub.f32 %v2158_v60, %v2168_v38  ;;  %v2269_v60 = vadd.f32 %v4156_v24, %v2268_v28 }
0x1079   :  { %v4276_v40 = vpop.eup %4275  ;;  %v2180_v42 = vmul.f32 1.442695, %v2174_v39 }
0x107a   :  { %v2187_v43 = vsel %vm226_vm6, %v4276_v40, 0.0 }
0x107b   :  { %4277 = vpow2.f32 %v2180_v42  ;;  %2188 = vadd.xlane.f32.xlu0 %v2187_v43 }
0x107e   :  { %v2171_v45 = vpop.xlane.xlu1 %2170 }
0x107f   :  { %v2175_v46 = vsub.f32 %v2159_v4, %v2171_v45  ;;  %v2275_v4 = vadd.f32 %v4156_v24, %v2274_v54  ;;  %v3910_v24 = vld [vmem:[%s4478_s8 + $0xc0] sm:$0xff] }
0x1081   :  { %v4278_v47 = vpop.eup %4277  ;;  %v2182_v44 = vmul.f32 1.442695, %v2175_v46 }
0x1082   :  { %v2190_v48 = vsel %vm226_vm6, %v4278_v47, 0.0 }
0x1083   :  { %4279 = vpow2.f32 %v2182_v44  ;;  %2191 = vadd.xlane.f32.xlu1 %v2190_v48 }
0x1089   :  { %v4280_v49 = vpop.eup %4279 }
0x108a   :  { %v2193_v50 = vsel %vm226_vm6, %v4280_v49, 0.0 }
0x108b   :  { %2194 = vadd.xlane.f32.xlu2 %v2193_v50 }
0x10e6   :  { %v2186_v57 = vpop.xlane.xlu2 %2185 }
0x10e7   :  { %4281 = vrcp.f32 %v2186_v57 }
0x10ed   :  { %v4282_v52 = vpop.eup %4281 }
0x10ee   :  { %v2200_v53 = vmul.f32 %v4282_v52, %v4274_v36  ;;  %v2189_v33 = vpop.xlane.xlu0 %2188 }
0x10ef   :  { %4283 = vrcp.f32 %v2189_v33 }
0x10f0   :  { %3966 = vmatmul.msk.f32.vlgmr.msra.gmra.mxu0 %vm226_vm6, %v2200_v53 }
0x10f1   :  { %2584 = vmatpush.msra.mxu0 %v3893_v21  ;;  %v3912_v21 = vld [vmem:[%s4478_s8 + $0xd0] sm:$0xff] }
0x10f2   :  { %2617 = vmatpush.msra.mxu1 %v3912_v21 }
0x10f3   :  { %2585 = vmatpush.msra.mxu0 %v3892_v22  ;;  %v3911_v22 = vld [vmem:[%s4478_s8 + $0xc8] sm:$0xff] }
0x10f4   :  { %2618 = vmatpush.msra.mxu1 %v3911_v22 }
0x10f5   :  { %v4284_v56 = vpop.eup %4283  ;;  %2586 = vmatpush.msra.mxu0 %v3891_v26 }
0x10f6   :  { %v2192_v17 = vpop.xlane.xlu1 %2191  ;;  %v2201_v59 = vmul.f32 %v4284_v56, %v4276_v40  ;;  %2619 = vmatpush.msra.mxu1 %v3910_v24 }
0x10f7   :  { %4285 = vrcp.f32 %v2192_v17  ;;  %2587 = vmatpush.msra.mxu0 %v3890_v12 }
0x10f8   :  { %3967 = vmatmul.msk.f32.gmra.mxu0 %vm226_vm6, %v2201_v59 }
0x10fd   :  { %v4286_v10 = vpop.eup %4285 }
0x10fe   :  { %v2195_v41 = vpop.xlane.xlu2 %2194  ;;  %v2202_v13 = vmul.f32 %v4286_v10, %v4278_v47 }
0x10ff   :  { %4287 = vrcp.f32 %v2195_v41 }
0x1100   :  { %3968 = vmatmul.msk.f32.gmra.mxu0 %vm226_vm6, %v2202_v13 }
0x1105   :  { %v4288_v14 = vpop.eup %4287 }
0x1106   :  { %v2203_v20 = vmul.f32 %v4288_v14, %v4280_v49 }
0x1108   :  { %3969 = vmatmul.msk.f32.gmra.mxu0 %vm226_vm6, %v2203_v20 }
0x1110   :  { %3986 = vmatmul.msk.f32.vlgmr.msrb.gmra.mxu0 %vm512_vm4, %v2266_v27 }
0x1118   :  { %3987 = vmatmul.msk.f32.gmra.mxu0 %vm512_vm4, %v2269_v60 }
0x1120   :  { %3988 = vmatmul.msk.f32.gmra.mxu0 %vm512_vm4, %v2272_v29 }
0x1128   :  { %3989 = vmatmul.msk.f32.gmra.mxu0 %vm512_vm4, %v2275_v4 }
0x1130   :  { %4002 = vmatmul.msk.f32.vlgmr.msra.gmra.mxu0 %vm226_vm6, %v5129_v55 }
0x1138   :  { %4003 = vmatmul.msk.f32.gmra.mxu0 %vm226_vm6, %v5142_v25 }
0x1140   :  { %4004 = vmatmul.msk.f32.gmra.mxu0 %vm226_vm6, %v5153_v58 }
0x1148   :  { %4005 = vmatmul.msk.f32.gmra.mxu0 %vm226_vm6, %v5164_v1 }
0x116d   :  { %v2233_v30 = vpop.f32.mrf.mxu0 }
0x116e   :  { %3998 = vmatmul.msk.f32.vlgmr.msrb.gmra.mxu3 %vm512_vm4, %v2233_v30 }
0x1175   :  { %v2236_v31 = vpop.f32.mrf.mxu0 }
0x1176   :  { %3999 = vmatmul.msk.f32.gmra.mxu3 %vm512_vm4, %v2236_v31  ;;  %v3943_v31 = vld [vmem:[%s4498_s30 + $0x28] sm:$0xff] }
0x1177   :  { %2514 = vmatpush.msrb.mxu2 %v3943_v31 }
0x117d   :  { %v2239_v32 = vpop.f32.mrf.mxu0 }
0x117e   :  { %4000 = vmatmul.msk.f32.gmra.mxu3 %vm512_vm4, %v2239_v32  ;;  %v3933_v32 = vld [vmem:[%s4488_s19 + $0xd8] sm:$0xff] }
0x117f   :  { %2648 = vmatpush.msra.mxu2 %v3933_v32 }
0x1185   :  { %v2242_v61 = vpop.f32.mrf.mxu0 }
0x1186   :  { %4001 = vmatmul.msk.f32.gmra.mxu3 %vm512_vm4, %v2242_v61  ;;  %v3932_v61 = vld [vmem:[%s4488_s19 + $0xd0] sm:$0xff] }
0x1187   :  { %2649 = vmatpush.msra.mxu2 %v3932_v61 }
0x118d   :  { %v2382_v7 = vpop.f32.mrf.mxu0 }
0x118e   :  { %v2394_v9 = vmul.f32 0.35355338, %v2382_v7  ;;  %v3931_v7 = vld [vmem:[%s4488_s19 + $0xc8] sm:$0xff] }
0x118f   :  { %2650 = vmatpush.msra.mxu2 %v3931_v7 }
0x1190   :  { %v2398_v3 = vadd.f32 %v5217_v5, %v2394_v9 }
0x1192   :  { %v2402_v11 = vsel %vm226_vm6, %v2398_v3, -inf }
0x1193   :  { %2403 = vmax.xlane.f32.xlu0 %v2402_v11 }
0x1195   :  { %v2385_v34 = vpop.f32.mrf.mxu0 }
0x1196   :  { %v2395_v35 = vmul.f32 0.35355338, %v2385_v34 }
0x1198   :  { %v2399_v62 = vadd.f32 %v5222_v63, %v2395_v35 }
0x119a   :  { %v2405_v15 = vsel %vm226_vm6, %v2399_v62, -inf }
0x119b   :  { %2406 = vmax.xlane.f32.xlu1 %v2405_v15  ;;  %v3896_v15 = vld [vmem:[%s4468_s29 + $0xf0] sm:$0xff] }
0x119d   :  { %v2388_v0 = vpop.f32.mrf.mxu0 }
0x119e   :  { %v2396_v8 = vmul.f32 0.35355338, %v2388_v0  ;;  %v3895_v0 = vld [vmem:[%s4468_s29 + $0xe8] sm:$0xff] }
0x11a0   :  { %v2400_v36 = vadd.f32 %v5227_v6, %v2396_v8  ;;  %v3894_v8 = vld [vmem:[%s4468_s29 + $0xe0] sm:$0xff] }
0x11a2   :  { %v2408_v19 = vsel %vm226_vm6, %v2400_v36, -inf }
0x11a3   :  { %2409 = vmax.xlane.f32.xlu2 %v2408_v19 }
0x11a5   :  { %v2391_v37 = vpop.f32.mrf.mxu0 }
0x11a6   :  { %v2397_v38 = vmul.f32 0.35355338, %v2391_v37 }
0x11a8   :  { %v2401_v39 = vadd.f32 %v5232_v18, %v2397_v38  ;;  %v4160_v38 = vld [vmem:[%s4483_s14 + $0x6] ss:$0 sm:$0xff] }
0x11aa   :  { %v2411_v40 = vsel %vm226_vm6, %v2401_v39, -inf }
0x11ab   :  { %2412 = vmax.xlane.f32.xlu0 %v2411_v40 }
0x1206   :  { %v2404_v42 = vpop.xlane.xlu0 %2403 }
0x1207   :  { %v2414_v43 = vsub.f32 %v2398_v3, %v2404_v42  ;;  %v3930_v3 = vld [vmem:[%s4488_s19 + $0xc0] sm:$0xff] }
0x1208   :  { %2651 = vmatpush.msra.mxu2 %v3930_v3 }
0x1209   :  { %v2418_v45 = vmul.f32 1.442695, %v2414_v43  ;;  %v2589_v43 = vpop.f32.mrf.mxu0 }
0x120b   :  { %4289 = vpow2.f32 %v2418_v45 }
0x120e   :  { %v2407_v46 = vpop.xlane.xlu1 %2406 }
0x120f   :  { %v2415_v47 = vsub.f32 %v2399_v62, %v2407_v46  ;;  %v3897_v62 = vld [vmem:[%s4468_s29 + $0xf8] sm:$0xff]  ;;  %v4159_v46 = vld [vmem:[%s4473_s3 + $0x6] ss:$0 sm:$0xff]  ;;  %s5612_s29 = sld [smem:[#allocation14_spill]] }
0x1211   :  { %v4290_v44 = vpop.eup %4289  ;;  %v2420_v48 = vmul.f32 1.442695, %v2415_v47 }
0x1212   :  { %v2426_v49 = vsel %vm226_vm6, %v4290_v44, 0.0 }
0x1213   :  { %4291 = vpow2.f32 %v2420_v48  ;;  %2427 = vadd.xlane.f32.xlu1 %v2426_v49  ;;  %v2590_v48 = vadd.f32 %v4159_v46, %v2589_v43  ;;  %v3916_v49 = vld [vmem:[%s4478_s8 + $0xf0] sm:$0xff] }
0x1216   :  { %v2410_v50 = vpop.xlane.xlu2 %2409 }
0x1217   :  { %v2416_v57 = vsub.f32 %v2400_v36, %v2410_v50  ;;  %v2592_v50 = vpop.f32.mrf.mxu0 }
0x1219   :  { %v4292_v52 = vpop.eup %4291  ;;  %v2422_v53 = vmul.f32 1.442695, %v2416_v57  ;;  %v3915_v57 = vld [vmem:[%s4478_s8 + $0xe8] sm:$0xff] }
0x121a   :  { %v2429_v33 = vsel %vm226_vm6, %v4292_v52, 0.0 }
0x121b   :  { %4293 = vpow2.f32 %v2422_v53  ;;  %2430 = vadd.xlane.f32.xlu2 %v2429_v33  ;;  %v2593_v53 = vadd.f32 %v4159_v46, %v2592_v50 }
0x121e   :  { %v2413_v56 = vpop.xlane.xlu0 %2412 }
0x121f   :  { %v2417_v17 = vsub.f32 %v2401_v39, %v2413_v56  ;;  %v2595_v33 = vpop.f32.mrf.mxu0 }
0x1220   :  { %v2596_v56 = vadd.f32 %v4159_v46, %v2595_v33 }
0x1221   :  { %v4294_v59 = vpop.eup %4293  ;;  %v2424_v10 = vmul.f32 1.442695, %v2417_v17 }
0x1222   :  { %v2432_v41 = vsel %vm226_vm6, %v4294_v59, 0.0 }
0x1223   :  { %4295 = vpow2.f32 %v2424_v10  ;;  %2433 = vadd.xlane.f32.xlu0 %v2432_v41  ;;  %v5344_v10 = vpop.f32.mrf.mxu3 }
0x1227   :  { %v2598_v17 = vpop.f32.mrf.mxu0 }
0x1229   :  { %v4296_v13 = vpop.eup %4295 }
0x122a   :  { %v2435_v14 = vsel %vm226_vm6, %v4296_v13, 0.0 }
0x122b   :  { %2436 = vadd.xlane.f32.xlu1 %v2435_v14 }
0x1286   :  { %v2428_v20 = vpop.xlane.xlu1 %2427 }
0x1287   :  { %4297 = vrcp.f32 %v2428_v20 }
0x128d   :  { %v4298_v26 = vpop.eup %4297 }
0x128e   :  { %v2442_v12 = vmul.f32 %v4298_v26, %v4290_v44  ;;  %v2431_v27 = vpop.xlane.xlu2 %2430  ;;  %v3917_v44 = vld [vmem:[%s4478_s8 + $0xf8] sm:$0xff] }
0x128f   :  { %4299 = vrcp.f32 %v2431_v27 }
0x1290   :  { %3990 = vmatmul.msk.f32.vlgmr.msrb.gmra.mxu1 %vm226_vm6, %v2442_v12 }
0x1295   :  { %v4300_v28 = vpop.eup %4299 }
0x1296   :  { %v2434_v60 = vpop.xlane.xlu0 %2433  ;;  %v2443_v2 = vmul.f32 %v4300_v28, %v4292_v52  ;;  %v3914_v52 = vld [vmem:[%s4478_s8 + $0xe0] sm:$0xff]  ;;  %s5614_s8 = sld [smem:[#allocation17_spill]] }
0x1297   :  { %4301 = vrcp.f32 %v2434_v60  ;;  %v4161_v28 = vld [vmem:[%s4493_s24 + $0x6] ss:$0 sm:$0xff] }
0x1298   :  { %3991 = vmatmul.msk.f32.gmra.mxu1 %vm226_vm6, %v2443_v2 }
0x129d   :  { %v4302_v29 = vpop.eup %4301 }
0x129e   :  { %v2437_v54 = vpop.xlane.xlu1 %2436  ;;  %v2444_v4 = vmul.f32 %v4302_v29, %v4294_v59  ;;  %v2599_v59 = vadd.f32 %v4159_v46, %v2598_v17 }
0x129f   :  { %4303 = vrcp.f32 %v2437_v54 }
0x12a0   :  { %3992 = vmatmul.msk.f32.gmra.mxu1 %vm226_vm6, %v2444_v4 }
0x12a5   :  { %v4304_v23 = vpop.eup %4303 }
0x12a6   :  { %v2445_v30 = vmul.f32 %v4304_v23, %v4296_v13  ;;  %v5350_v13 = vpop.f32.mrf.mxu3 }
0x12a8   :  { %3993 = vmatmul.msk.f32.gmra.mxu1 %vm226_vm6, %v2445_v30 }
0x12ae   :  { %v5354_v16 = vpop.f32.mrf.mxu3 }
0x12b0   :  { %4006 = vmatmul.msk.f32.vlgmr.msra.gmra.mxu1 %vm226_vm6, %v5129_v55 }
0x12b6   :  { %v2566_v21 = vpop.f32.mrf.mxu3 }
0x12b8   :  { %4007 = vmatmul.msk.f32.gmra.mxu1 %vm226_vm6, %v5142_v25 }
0x12c0   :  { %4008 = vmatmul.msk.f32.gmra.mxu1 %vm226_vm6, %v5153_v58 }
0x12c8   :  { %4009 = vmatmul.msk.f32.gmra.mxu1 %vm226_vm6, %v5164_v1 }
0x130d   :  { %v2475_v9 = vpop.f32.mrf.mxu1 }
0x130e   :  { %3994 = vmatmul.msk.f32.vlgmr.msrb.gmra.mxu2 %vm512_vm4, %v2475_v9 }
0x130f   :  { %2871 = vmatpush.msrb.mxu2 %v3897_v62 }
0x1311   :  { %2872 = vmatpush.msrb.mxu2 %v3896_v15 }
0x1313   :  { %2873 = vmatpush.msrb.mxu2 %v3895_v0 }
0x1315   :  { %v2478_v11 = vpop.f32.mrf.mxu1  ;;  %2874 = vmatpush.msrb.mxu2 %v3894_v8  ;;  %v3944_v8 = vld [vmem:[%s4498_s30 + $0x30] sm:$0xff] }
0x1316   :  { %3995 = vmatmul.msk.f32.gmra.mxu2 %vm512_vm4, %v2478_v11  ;;  %2838 = vmatpush.msrb.mxu1 %v3944_v8 }
0x131d   :  { %v2481_v34 = vpop.f32.mrf.mxu1 }
0x131e   :  { %3996 = vmatmul.msk.f32.gmra.mxu2 %vm512_vm4, %v2481_v34 }
0x1325   :  { %v2484_v35 = vpop.f32.mrf.mxu1 }
0x1326   :  { %3997 = vmatmul.msk.f32.gmra.mxu2 %vm512_vm4, %v2484_v35 }
0x132d   :  { %v2621_v36 = vpop.f32.mrf.mxu1 }
0x132e   :  { %4010 = vmatmul.msk.f32.vlgmr.msra.gmra.mxu2 %vm226_vm6, %v5129_v55  ;;  %v2622_v47 = vadd.f32 %v4160_v38, %v2621_v36 }
0x1335   :  { %v2624_v19 = vpop.f32.mrf.mxu1 }
0x1336   :  { %4011 = vmatmul.msk.f32.gmra.mxu2 %vm226_vm6, %v5142_v25  ;;  %v2625_v45 = vadd.f32 %v4160_v38, %v2624_v19 }
0x133d   :  { %v2627_v37 = vpop.f32.mrf.mxu1 }
0x133e   :  { %4012 = vmatmul.msk.f32.gmra.mxu2 %vm226_vm6, %v5153_v58  ;;  %v2628_v42 = vadd.f32 %v4160_v38, %v2627_v37 }
0x1345   :  { %v2630_v39 = vpop.f32.mrf.mxu1 }
0x1346   :  { %v2631_v40 = vadd.f32 %v4160_v38, %v2630_v39  ;;  %4013 = vmatmul.msk.f32.gmra.mxu2 %vm226_vm6, %v5164_v1 }
0x1348   :  { %4014 = vmatpush.xpose.msk.msra.mxu3 %vm512_vm4, %v2631_v40  ;;  %v4163_v40 = vld [vmem:[%s4483_s14 + $0x7] ss:$0 sm:$0xff]  ;;  %s5615_s14 = sld [smem:[#allocation16_spill]] }
0x134c   :  { %4015 = vmatpush.xpose.msk.msra.mxu3 %vm512_vm4, %v2628_v42 }
0x134e   :  { %4030 = vmatmul.msk.f32.vlgmr.msrb.gmra.mxu2 %vm226_vm6, %v5129_v55 }
0x1350   :  { %4016 = vmatpush.xpose.msk.msra.mxu3 %vm512_vm4, %v2625_v45 }
0x1354   :  { %4017 = vmatpush.xpose.msk.msra.mxu3 %vm512_vm4, %v2622_v47 }
0x1356   :  { %4031 = vmatmul.msk.f32.gmra.mxu2 %vm226_vm6, %v5142_v25 }
0x1357   :  { %4018 = vmatmul.msk.f32.vlgmr.msra.gmra.mxu3 %vm512_vm4, %v2590_v48 }
0x1358   :  { %2903 = vmatpush.msrb.mxu3 %v3917_v44 }
0x135a   :  { %2904 = vmatpush.msrb.mxu3 %v3916_v49 }
0x135c   :  { %2905 = vmatpush.msrb.mxu3 %v3915_v57 }
0x135e   :  { %2906 = vmatpush.msrb.mxu3 %v3914_v52  ;;  %4032 = vmatmul.msk.f32.gmra.mxu2 %vm226_vm6, %v5153_v58 }
0x135f   :  { %4019 = vmatmul.msk.f32.gmra.mxu3 %vm512_vm4, %v2593_v53 }
0x1366   :  { %4033 = vmatmul.msk.f32.gmra.mxu2 %vm226_vm6, %v5164_v1 }
0x1367   :  { %4020 = vmatmul.msk.f32.gmra.mxu3 %vm512_vm4, %v2596_v56 }
0x136f   :  { %4021 = vmatmul.msk.f32.gmra.mxu3 %vm512_vm4, %v2599_v59 }
0x1377   :  { %4034 = vmatmul.msk.f32.vlgmr.msrb.gmra.mxu3 %vm226_vm6, %v5129_v55 }
0x137f   :  { %4035 = vmatmul.msk.f32.gmra.mxu3 %vm226_vm6, %v5142_v25 }
0x1387   :  { %4036 = vmatmul.msk.f32.gmra.mxu3 %vm226_vm6, %v5153_v58 }
0x138f   :  { %4037 = vmatmul.msk.f32.gmra.mxu3 %vm226_vm6, %v5164_v1 }
0x1391   :  { %v5348_v41 = vpop.f32.mrf.mxu2 }
0x1399   :  { %v5352_v14 = vpop.f32.mrf.mxu2 }
0x13a1   :  { %v5356_v20 = vpop.f32.mrf.mxu2 }
0x13a9   :  { %v2525_v22 = vpop.f32.mrf.mxu2 }
0x13aa   :  { %v5358_v24 = vadd.f32 %v2566_v21, %v2525_v22 }
0x13b1   :  { %v2653_v26 = vpop.f32.mrf.mxu2 }
0x13b2   :  { %v2654_v4 = vadd.f32 %v4161_v28, %v2653_v26 }
0x13b9   :  { %v2656_v12 = vpop.f32.mrf.mxu2 }
0x13ba   :  { %v2657_v54 = vadd.f32 %v4161_v28, %v2656_v12 }
0x13c1   :  { %v2659_v27 = vpop.f32.mrf.mxu2 }
0x13c2   :  { %v2660_v29 = vadd.f32 %v4161_v28, %v2659_v27 }
0x13c9   :  { %v2662_v60 = vpop.f32.mrf.mxu2 }
0x13ca   :  { %v2663_v2 = vadd.f32 %v4161_v28, %v2662_v60 }
0x13cc   :  { %2794 = vmatpush.msrb.mxu0 %v2663_v2 }
0x13ce   :  { %2795 = vmatpush.msrb.mxu0 %v2660_v29 }
0x13d0   :  { %2796 = vmatpush.msrb.mxu0 %v2657_v54 }
0x13d2   :  { %2797 = vmatpush.msrb.mxu0 %v2654_v4  ;;  %v3937_v4 = vld [vmem:[%s4488_s19 + $0xf8] sm:$0xff] }
0x13d4   :  { %2935 = vmatpush.msra.mxu0 %v3937_v4 }
0x13da   :  { %v2706_v23 = vpop.f32.mrf.mxu3 }
0x13db   :  { %v2718_v30 = vmul.f32 0.35355338, %v2706_v23  ;;  %v3936_v23 = vld [vmem:[%s4488_s19 + $0xf0] sm:$0xff] }
0x13dc   :  { %2936 = vmatpush.msra.mxu0 %v3936_v23 }
0x13dd   :  { %v2722_v31 = vadd.f32 %v5217_v5, %v2718_v30  ;;  %v3935_v30 = vld [vmem:[%s4488_s19 + $0xe8] sm:$0xff] }
0x13de   :  { %2937 = vmatpush.msra.mxu0 %v3935_v30 }
0x13df   :  { %v2726_v32 = vsel %vm226_vm6, %v2722_v31, -inf }
0x13e0   :  { %2727 = vmax.xlane.f32.xlu2 %v2726_v32 }
0x13e2   :  { %v2709_v61 = vpop.f32.mrf.mxu3 }
0x13e3   :  { %v2719_v7 = vmul.f32 0.35355338, %v2709_v61 }
0x13e5   :  { %v2723_v9 = vadd.f32 %v5222_v63, %v2719_v7 }
0x13e7   :  { %v2729_v3 = vsel %vm226_vm6, %v2723_v9, -inf }
0x13e8   :  { %2730 = vmax.xlane.f32.xlu0 %v2729_v3 }
0x13ea   :  { %v2712_v11 = vpop.f32.mrf.mxu3 }
0x13eb   :  { %v2720_v34 = vmul.f32 0.35355338, %v2712_v11 }
0x13ed   :  { %v2724_v35 = vadd.f32 %v5227_v6, %v2720_v34 }
0x13ef   :  { %v2732_v62 = vsel %vm226_vm6, %v2724_v35, -inf }
0x13f0   :  { %2733 = vmax.xlane.f32.xlu1 %v2732_v62 }
0x13f2   :  { %v2715_v15 = vpop.f32.mrf.mxu3 }
0x13f3   :  { %v2721_v0 = vmul.f32 0.35355338, %v2715_v15 }
0x13f5   :  { %v2725_v36 = vadd.f32 %v5232_v18, %v2721_v0 }
0x13f7   :  { %v2735_v19 = vsel %vm226_vm6, %v2725_v36, -inf }
0x13f8   :  { %2736 = vmax.xlane.f32.xlu2 %v2735_v19 }
0x13fa   :  { %v2908_v37 = vpop.f32.mrf.mxu3 }
0x13fb   :  { %v2909_v47 = vadd.f32 %v4163_v40, %v2908_v37  ;;  %v2876_v37 = vpop.f32.mrf.mxu2 }
0x1402   :  { %v2911_v38 = vpop.f32.mrf.mxu3 }
0x1403   :  { %v2912_v46 = vadd.f32 %v4163_v40, %v2911_v38 }
0x140a   :  { %v2914_v39 = vpop.f32.mrf.mxu3 }
0x140b   :  { %v2915_v45 = vadd.f32 %v4163_v40, %v2914_v39  ;;  %v4162_v39 = vld [vmem:[%s4473_s3 + $0x7] ss:$0 sm:$0xff]  ;;  %s5613_s3 = sld [smem:[#allocation15_spill]] }
0x1412   :  { %v2917_v42 = vpop.f32.mrf.mxu3 }
0x1413   :  { %v2918_v43 = vadd.f32 %v4163_v40, %v2917_v42  ;;  %v2877_v40 = vadd.f32 %v4162_v39, %v2876_v37  ;;  %v2879_v42 = vpop.f32.mrf.mxu2 }
0x1415   :  { %4042 = vmatpush.xpose.msk.msra.mxu1 %vm512_vm4, %v2918_v43 }
0x1419   :  { %4043 = vmatpush.xpose.msk.msra.mxu1 %vm512_vm4, %v2915_v45  ;;  %v2880_v45 = vadd.f32 %v4162_v39, %v2879_v42 }
0x141d   :  { %4044 = vmatpush.xpose.msk.msra.mxu1 %vm512_vm4, %v2912_v46 }
0x1421   :  { %4045 = vmatpush.xpose.msk.msra.mxu1 %vm512_vm4, %v2909_v47  ;;  %v2882_v47 = vpop.f32.mrf.mxu2 }
0x1453   :  { %v2728_v44 = vpop.xlane.xlu2 %2727 }
0x1454   :  { %v2738_v48 = vsub.f32 %v2722_v31, %v2728_v44  ;;  %v3934_v31 = vld [vmem:[%s4488_s19 + $0xe0] sm:$0xff]  ;;  %v2883_v44 = vadd.f32 %v4162_v39, %v2882_v47  ;;  %v3945_v47 = vld [vmem:[%s4498_s30 + $0x38] sm:$0xff]  ;;  %s5616_s19 = sld [smem:[#allocation18_spill]] }
0x1455   :  { %2938 = vmatpush.msra.mxu0 %v3934_v31  ;;  %3125 = vmatpush.msra.mxu3 %v3945_v47 }
0x1456   :  { %v2742_v49 = vmul.f32 1.442695, %v2738_v48 }
0x1458   :  { %4305 = vpow2.f32 %v2742_v49  ;;  %v2885_v49 = vpop.f32.mrf.mxu2 }
0x145b   :  { %v2731_v50 = vpop.xlane.xlu0 %2730 }
0x145c   :  { %v2739_v57 = vsub.f32 %v2723_v9, %v2731_v50  ;;  %v2886_v50 = vadd.f32 %v4162_v39, %v2885_v49 }
0x145e   :  { %v4306_v52 = vpop.eup %4305  ;;  %v2744_v53 = vmul.f32 1.442695, %v2739_v57  ;;  %v4164_v57 = vld [vmem:[%s4493_s24 + $0x7] ss:$0 sm:$0xff]  ;;  %s4429_s24 = smov [#allocation2]  }
0x145f   :  { %v2750_v33 = vsel %vm226_vm6, %v4306_v52, 0.0  ;;  %s3711_s30 = sshll.u32 %s4429_s24, 4  ;;  %s3712_s30 = int_to_ptr.vmem [resolvable:$true] %s3711_s30 }
0x1460   :  { %4307 = vpow2.f32 %v2744_v53  ;;  %2751 = vadd.xlane.f32.xlu0 %v2750_v33 }
0x1463   :  { %v2734_v56 = vpop.xlane.xlu1 %2733 }
0x1464   :  { %v2740_v17 = vsub.f32 %v2724_v35, %v2734_v56 }
0x1466   :  { %v4308_v59 = vpop.eup %4307  ;;  %v2746_v21 = vmul.f32 1.442695, %v2740_v17 }
0x1467   :  { %v2753_v22 = vsel %vm226_vm6, %v4308_v59, 0.0 }
0x1468   :  { %4309 = vpow2.f32 %v2746_v21  ;;  %2754 = vadd.xlane.f32.xlu1 %v2753_v22 }
0x146b   :  { %v2737_v26 = vpop.xlane.xlu2 %2736 }
0x146c   :  { %v2741_v12 = vsub.f32 %v2725_v36, %v2737_v26  ;;  %v2561_v26 = vadd.f32 %v5350_v13, %v5352_v14 }
0x146e   :  { %v4310_v27 = vpop.eup %4309  ;;  %v2748_v28 = vmul.f32 1.442695, %v2741_v12 }
0x146f   :  { %v2756_v60 = vsel %vm226_vm6, %v4310_v27, 0.0 }
0x1470   :  { %4311 = vpow2.f32 %v2748_v28  ;;  %2757 = vadd.xlane.f32.xlu2 %v2756_v60  ;;  %v2564_v28 = vadd.f32 %v5354_v16, %v5356_v20 }
0x1476   :  { %v4312_v2 = vpop.eup %4311 }
0x1477   :  { %v2759_v29 = vsel %vm226_vm6, %v4312_v2, 0.0 }
0x1478   :  { %2760 = vadd.xlane.f32.xlu0 %v2759_v29 }
0x14d3   :  { %v2752_v54 = vpop.xlane.xlu0 %2751 }
0x14d4   :  { %4313 = vrcp.f32 %v2752_v54 }
0x14da   :  { %v4314_v32 = vpop.eup %4313 }
0x14db   :  { %v2766_v61 = vmul.f32 %v4314_v32, %v4306_v52  ;;  %v2755_v7 = vpop.xlane.xlu1 %2754 }
0x14dc   :  { %4315 = vrcp.f32 %v2755_v7 }
0x14dd   :  { %4022 = vmatmul.msk.f32.vlgmr.msrb.gmra.mxu0 %vm226_vm6, %v2766_v61 }
0x14e2   :  { %v4316_v9 = vpop.eup %4315 }
0x14e3   :  { %v2758_v3 = vpop.xlane.xlu2 %2757  ;;  %v2767_v11 = vmul.f32 %v4316_v9, %v4308_v59  ;;  %v2558_v59 = vadd.f32 %v5344_v10, %v5348_v41 }
0x14e4   :  { %4317 = vrcp.f32 %v2758_v3 }
0x14e5   :  { %4023 = vmatmul.msk.f32.gmra.mxu0 %vm226_vm6, %v2767_v11 }
0x14ea   :  { %v4318_v34 = vpop.eup %4317 }
0x14eb   :  { %v2761_v35 = vpop.xlane.xlu0 %2760  ;;  %v2768_v62 = vmul.f32 %v4318_v34, %v4310_v27 }
0x14ec   :  { %4319 = vrcp.f32 %v2761_v35 }
0x14ed   :  { %4024 = vmatmul.msk.f32.gmra.mxu0 %vm226_vm6, %v2768_v62 }
0x14f2   :  { %v4320_v15 = vpop.eup %4319 }
0x14f3   :  { %v2769_v0 = vmul.f32 %v4320_v15, %v4312_v2 }
0x14f5   :  { %4025 = vmatmul.msk.f32.gmra.mxu0 %vm226_vm6, %v2769_v0 }
0x14fd   :  { %4038 = vmatmul.msk.f32.vlgmr.msra.gmra.mxu0 %vm226_vm6, %v5129_v55 }
0x1505   :  { %4039 = vmatmul.msk.f32.gmra.mxu0 %vm226_vm6, %v5142_v25 }
0x150d   :  { %4040 = vmatmul.msk.f32.gmra.mxu0 %vm226_vm6, %v5153_v58 }
0x1515   :  { %4041 = vmatmul.msk.f32.gmra.mxu0 %vm226_vm6, %v5164_v1 }
0x155a   :  { %v2799_v8 = vpop.f32.mrf.mxu0 }
0x155b   :  { %4026 = vmatmul.msk.f32.vlgmr.msrb.gmra.mxu1 %vm512_vm4, %v2799_v8 }
0x1562   :  { %v2802_v36 = vpop.f32.mrf.mxu0 }
0x1563   :  { %4027 = vmatmul.msk.f32.gmra.mxu1 %vm512_vm4, %v2802_v36 }
0x156a   :  { %v2805_v19 = vpop.f32.mrf.mxu0 }
0x156b   :  { %4028 = vmatmul.msk.f32.gmra.mxu1 %vm512_vm4, %v2805_v19 }
0x1572   :  { %v2808_v38 = vpop.f32.mrf.mxu0 }
0x1573   :  { %4029 = vmatmul.msk.f32.gmra.mxu1 %vm512_vm4, %v2808_v38 }
0x157a   :  { %v2940_v43 = vpop.f32.mrf.mxu0 }
0x157b   :  { %4046 = vmatmul.msk.f32.vlgmr.msra.gmra.mxu1 %vm512_vm4, %v2877_v40  ;;  %v2941_v17 = vadd.f32 %v4164_v57, %v2940_v43 }
0x1582   :  { %v2943_v46 = vpop.f32.mrf.mxu0 }
0x1583   :  { %4047 = vmatmul.msk.f32.gmra.mxu1 %vm512_vm4, %v2880_v45  ;;  %v2944_v56 = vadd.f32 %v4164_v57, %v2943_v46 }
0x158a   :  { %v2946_v48 = vpop.f32.mrf.mxu0 }
0x158b   :  { %4048 = vmatmul.msk.f32.gmra.mxu1 %vm512_vm4, %v2883_v44  ;;  %v2947_v33 = vadd.f32 %v4164_v57, %v2946_v48 }
0x1592   :  { %v2949_v52 = vpop.f32.mrf.mxu0 }
0x1593   :  { %v2950_v53 = vadd.f32 %v4164_v57, %v2949_v52  ;;  %4049 = vmatmul.msk.f32.gmra.mxu1 %vm512_vm4, %v2886_v50 }
0x1595   :  { %3081 = vmatpush.msra.mxu2 %v2950_v53 }
0x1597   :  { %3082 = vmatpush.msra.mxu2 %v2947_v33 }
0x1599   :  { %3083 = vmatpush.msra.mxu2 %v2944_v56 }
0x159b   :  { %3084 = vmatpush.msra.mxu2 %v2941_v17 }
0x15d8   :  { %v2840_v21 = vpop.f32.mrf.mxu1 }
0x15d9   :  { %v5407_v22 = vadd.f32 %v2840_v21, %v2558_v59 }
0x15e0   :  { %v2843_v12 = vpop.f32.mrf.mxu1 }
0x15e1   :  { %v5411_v27 = vadd.f32 %v2843_v12, %v2561_v26 }
0x15e8   :  { %v2846_v60 = vpop.f32.mrf.mxu1 }
0x15e9   :  { %v5415_v2 = vadd.f32 %v2846_v60, %v2564_v28  ;;  %v4165_v60 = vld [vmem:[%s4503_s6 + $0x1] ss:$0 sm:$0xff]  ;;  %s3713_s6 = sshll.u32 %s4593_s20, 4  ;;  %s3714_s6 = int_to_ptr.hbm [resolvable:$true] %s3713_s6 }
0x15f0   :  { %v2849_v29 = vpop.f32.mrf.mxu1 }
0x15f1   :  { %v5418_v54 = vadd.f32 %v2849_v29, %v5358_v24 }
0x15f8   :  { %v2993_v10 = vpop.f32.mrf.mxu1 }
0x15f9   :  { %v3005_v41 = vmul.f32 0.35355338, %v2993_v10 }
0x15fb   :  { %v3009_v4 = vadd.f32 %v5217_v5, %v3005_v41 }
0x15fd   :  { %v3013_v23 = vsel %vm226_vm6, %v3009_v4, -inf }
0x15fe   :  { %3014 = vmax.xlane.f32.xlu1 %v3013_v23 }
0x1600   :  { %v2996_v13 = vpop.f32.mrf.mxu1 }
0x1601   :  { %v3006_v14 = vmul.f32 0.35355338, %v2996_v13 }
0x1603   :  { %v3010_v30 = vadd.f32 %v5222_v63, %v3006_v14 }
0x1605   :  { %v3016_v16 = vsel %vm226_vm6, %v3010_v30, -inf }
0x1606   :  { %3017 = vmax.xlane.f32.xlu2 %v3016_v16 }
0x1608   :  { %v2999_v20 = vpop.f32.mrf.mxu1 }
0x1609   :  { %v3007_v31 = vmul.f32 0.35355338, %v2999_v20 }
0x160b   :  { %v3011_v32 = vadd.f32 %v5227_v6, %v3007_v31 }
0x160d   :  { %v3019_v24 = vsel %vm226_vm6, %v3011_v32, -inf }
0x160e   :  { %3020 = vmax.xlane.f32.xlu0 %v3019_v24 }
0x1610   :  { %v3002_v61 = vpop.f32.mrf.mxu1 }
0x1611   :  { %v3008_v7 = vmul.f32 0.35355338, %v3002_v61 }
0x1613   :  { %v3012_v5 = vadd.f32 %v5232_v18, %v3008_v7 }
0x1615   :  { %v3022_v9 = vsel %vm226_vm6, %v3012_v5, -inf }
0x1616   :  { %3023 = vmax.xlane.f32.xlu1 %v3022_v9 }
0x1671   :  { %v3015_v3 = vpop.xlane.xlu1 %3014 }
0x1672   :  { %v3025_v11 = vsub.f32 %v3009_v4, %v3015_v3 }
0x1674   :  { %v3029_v63 = vmul.f32 1.442695, %v3025_v11 }
0x1676   :  { %4321 = vpow2.f32 %v3029_v63 }
0x1679   :  { %v3018_v34 = vpop.xlane.xlu2 %3017 }
0x167a   :  { %v3026_v35 = vsub.f32 %v3010_v30, %v3018_v34 }
0x167c   :  { %v4322_v62 = vpop.eup %4321  ;;  %v3031_v15 = vmul.f32 1.442695, %v3026_v35 }
0x167d   :  { %v3037_v6 = vsel %vm226_vm6, %v4322_v62, 0.0 }
0x167e   :  { %4323 = vpow2.f32 %v3031_v15  ;;  %3038 = vadd.xlane.f32.xlu2 %v3037_v6 }
0x1681   :  { %v3021_v0 = vpop.xlane.xlu0 %3020 }
0x1682   :  { %v3027_v8 = vsub.f32 %v3011_v32, %v3021_v0 }
0x1684   :  { %v4324_v36 = vpop.eup %4323  ;;  %v3033_v19 = vmul.f32 1.442695, %v3027_v8 }
0x1685   :  { %v3040_v18 = vsel %vm226_vm6, %v4324_v36, 0.0 }
0x1686   :  { %4325 = vpow2.f32 %v3033_v19  ;;  %3041 = vadd.xlane.f32.xlu0 %v3040_v18 }
0x1689   :  { %v3024_v37 = vpop.xlane.xlu1 %3023 }
0x168a   :  { %v3028_v38 = vsub.f32 %v3012_v5, %v3024_v37 }
0x168c   :  { %v4326_v39 = vpop.eup %4325  ;;  %v3035_v40 = vmul.f32 1.442695, %v3028_v38 }
0x168d   :  { %v3043_v42 = vsel %vm226_vm6, %v4326_v39, 0.0 }
0x168e   :  { %4327 = vpow2.f32 %v3035_v40  ;;  %3044 = vadd.xlane.f32.xlu1 %v3043_v42  ;;  %v4063_v40 = vld [vmem:[%s5603_s0 + $0x30] sm:$0xff]  ;;  %v4062_v42 = vld [vmem:[%s5603_s0 + $0x28] sm:$0xff] }
0x1694   :  { %v4328_v43 = vpop.eup %4327 }
0x1695   :  { %v3046_v45 = vsel %vm226_vm6, %v4328_v43, 0.0 }
0x1696   :  { %3047 = vadd.xlane.f32.xlu2 %v3046_v45 }
0x16f1   :  { %v3039_v46 = vpop.xlane.xlu2 %3038 }
0x16f2   :  { %4329 = vrcp.f32 %v3039_v46 }
0x16f8   :  { %v4330_v44 = vpop.eup %4329 }
0x16f9   :  { %v3053_v48 = vmul.f32 %v4330_v44, %v4322_v62  ;;  %v3042_v49 = vpop.xlane.xlu0 %3041 }
0x16fa   :  { %4331 = vrcp.f32 %v3042_v49 }
0x16fb   :  { %4050 = vmatmul.msk.f32.vlgmr.msra.gmra.mxu2 %vm226_vm6, %v3053_v48 }
0x1700   :  { %v4332_v50 = vpop.eup %4331 }
0x1701   :  { %v3045_v57 = vpop.xlane.xlu1 %3044  ;;  %v3054_v52 = vmul.f32 %v4332_v50, %v4324_v36 }
0x1702   :  { %4333 = vrcp.f32 %v3045_v57 }
0x1703   :  { %4051 = vmatmul.msk.f32.gmra.mxu2 %vm226_vm6, %v3054_v52 }
0x1708   :  { %v4334_v53 = vpop.eup %4333 }
0x1709   :  { %v3048_v33 = vpop.xlane.xlu2 %3047  ;;  %v3055_v56 = vmul.f32 %v4334_v53, %v4326_v39  ;;  %v4064_v39 = vld [vmem:[%s5603_s0 + $0x38] sm:$0xff] }
0x170a   :  { %4335 = vrcp.f32 %v3048_v33  ;;  %3296 = vmatpush.msrb.mxu0 %v4064_v39  ;;  %v4073_v39 = vld [vmem:[%s5606_s17 + $0x58] sm:$0xff] }
0x170b   :  { %4052 = vmatmul.msk.f32.gmra.mxu2 %vm226_vm6, %v3055_v56 }
0x170c   :  { %3297 = vmatpush.msrb.mxu0 %v4063_v40  ;;  %v4071_v40 = vld [vmem:[%s5606_s17 + $0x48] sm:$0xff] }
0x170e   :  { %3298 = vmatpush.msrb.mxu0 %v4062_v42  ;;  %v4070_v42 = vld [vmem:[%s5606_s17 + $0x40] sm:$0xff] }
0x1710   :  { %v4336_v17 = vpop.eup %4335 }
0x1711   :  { %v3056_v59 = vmul.f32 %v4336_v17, %v4328_v43  ;;  %v4061_v43 = vld [vmem:[%s5603_s0 + $0x20] sm:$0xff] }
0x1712   :  { %3299 = vmatpush.msrb.mxu0 %v4061_v43  ;;  %v4168_v43 = vld [vmem:[%s5607_s21 + $0x1] ss:$0 sm:$0xff] }
0x1713   :  { %4053 = vmatmul.msk.f32.gmra.mxu2 %vm226_vm6, %v3056_v59 }
0x177e   :  { %v3086_v21 = vpop.f32.mrf.mxu2 }
0x177f   :  { %4054 = vmatmul.msk.f32.vlgmr.msra.gmra.mxu3 %vm512_vm4, %v3086_v21 }
0x1786   :  { %v3089_v26 = vpop.f32.mrf.mxu2 }
0x1787   :  { %4055 = vmatmul.msk.f32.gmra.mxu3 %vm512_vm4, %v3089_v26 }
0x178e   :  { %v3092_v12 = vpop.f32.mrf.mxu2 }
0x178f   :  { %4056 = vmatmul.msk.f32.gmra.mxu3 %vm512_vm4, %v3092_v12 }
0x1796   :  { %v3095_v28 = vpop.f32.mrf.mxu2 }
0x1797   :  { %4057 = vmatmul.msk.f32.gmra.mxu3 %vm512_vm4, %v3095_v28  ;;  %v4166_v28 = vld [vmem:[%s5604_s5 + $0x1] ss:$0 sm:$0xff] }
0x1802   :  { %v3127_v29 = vpop.f32.mrf.mxu3 }
0x1803   :  { %v3139_v10 = vadd.f32 %v3127_v29, %v5407_v22 }
0x1805   :  { %v3148_v41 = vadd.f32 %v4165_v60, %v3139_v10  ;;  %v4167_v10 = vld [vmem:[%s5605_s13 + $0x1] ss:$0 sm:$0xff] }
0x1807   :  { %v3152_v4 = vadd.f32 %v3148_v41, %v5129_v55 }
0x1809   :  { %v3160_v23 = vsel %vm226_vm6, %v3152_v4, 0.0 }
0x180a   :  { %3161 = vadd.xlane.f32.xlu0 %v3160_v23  ;;  %v3130_v13 = vpop.f32.mrf.mxu3 }
0x180b   :  { %v3140_v14 = vadd.f32 %v3130_v13, %v5411_v27 }
0x180d   :  { %v3149_v30 = vadd.f32 %v4165_v60, %v3140_v14 }
0x180f   :  { %v3153_v16 = vadd.f32 %v3149_v30, %v5142_v25 }
0x1811   :  { %v3163_v20 = vsel %vm226_vm6, %v3153_v16, 0.0 }
0x1812   :  { %3164 = vadd.xlane.f32.xlu1 %v3163_v20  ;;  %v3133_v31 = vpop.f32.mrf.mxu3 }
0x1813   :  { %v3141_v32 = vadd.f32 %v3133_v31, %v5415_v2 }
0x1815   :  { %v3150_v24 = vadd.f32 %v4165_v60, %v3141_v32 }
0x1817   :  { %v3154_v22 = vadd.f32 %v3150_v24, %v5153_v58 }
0x1819   :  { %v3166_v55 = vsel %vm226_vm6, %v3154_v22, 0.0 }
0x181a   :  { %3167 = vadd.xlane.f32.xlu2 %v3166_v55  ;;  %v3136_v61 = vpop.f32.mrf.mxu3 }
0x181b   :  { %v3142_v7 = vadd.f32 %v3136_v61, %v5418_v54 }
0x181d   :  { %v3151_v5 = vadd.f32 %v4165_v60, %v3142_v7 }
0x181f   :  { %v3155_v27 = vadd.f32 %v3151_v5, %v5164_v1 }
0x1821   :  { %v3169_v25 = vsel %vm226_vm6, %v3155_v27, 0.0 }
0x1822   :  { %3170 = vadd.xlane.f32.xlu0 %v3169_v25 }
0x187d   :  { %v3162_v9 = vpop.xlane.xlu0 %3161 }
0x187e   :  { %v3172_v3 = vmul.f32 %v3162_v9, %v4624_v51 }
0x1880   :  { %v3176_v11 = vsub.f32 %v3152_v4, %v3172_v3 }
0x1882   :  { %v3180_v2 = vmul.f32 %v3176_v11, %v3176_v11 }
0x1884   :  { %v3184_v63 = vsel %vm226_vm6, %v3180_v2, 0.0 }
0x1885   :  { %3185 = vadd.xlane.f32.xlu1 %v3184_v63  ;;  %v3165_v58 = vpop.xlane.xlu1 %3164 }
0x1886   :  { %v3173_v34 = vmul.f32 %v3165_v58, %v4624_v51 }
0x1888   :  { %v5457_v35 = vsub.f32 %v3153_v16, %v3173_v34 }
0x188a   :  { %v3181_v1 = vmul.f32 %v5457_v35, %v5457_v35 }
0x188c   :  { %v3187_v54 = vsel %vm226_vm6, %v3181_v1, 0.0 }
0x188d   :  { %v3168_v62 = vpop.xlane.xlu2 %3167  ;;  %3188 = vadd.xlane.f32.xlu2 %v3187_v54 }
0x188e   :  { %v3174_v15 = vmul.f32 %v3168_v62, %v4624_v51 }
0x1890   :  { %v5463_v6 = vsub.f32 %v3154_v22, %v3174_v15 }
0x1892   :  { %v3182_v0 = vmul.f32 %v5463_v6, %v5463_v6 }
0x1894   :  { %v3190_v8 = vsel %vm226_vm6, %v3182_v0, 0.0 }
0x1895   :  { %3191 = vadd.xlane.f32.xlu0 %v3190_v8  ;;  %v3171_v36 = vpop.xlane.xlu0 %3170 }
0x1896   :  { %v3175_v19 = vmul.f32 %v3171_v36, %v4624_v51  ;;  %v4077_v36 = vld [vmem:[%s5606_s17 + $0x78] sm:$0xff] }
0x1897   :  { %3383 = vmatpush.msrb.mxu1 %v4077_v36 }
0x1898   :  { %v5469_v18 = vsub.f32 %v3155_v27, %v3175_v19  ;;  %v4076_v19 = vld [vmem:[%s5606_s17 + $0x70] sm:$0xff] }
0x1899   :  { %3384 = vmatpush.msrb.mxu1 %v4076_v19 }
0x189a   :  { %v3183_v37 = vmul.f32 %v5469_v18, %v5469_v18 }
0x189c   :  { %v3193_v38 = vsel %vm226_vm6, %v3183_v37, 0.0  ;;  %v4075_v37 = vld [vmem:[%s5606_s17 + $0x68] sm:$0xff] }
0x189d   :  { %3194 = vadd.xlane.f32.xlu1 %v3193_v38  ;;  %3385 = vmatpush.msrb.mxu1 %v4075_v37  ;;  %v4074_v38 = vld [vmem:[%s5606_s17 + $0x60] sm:$0xff] }
0x189f   :  { %3386 = vmatpush.msrb.mxu1 %v4074_v38 }
0x18a1   :  { %3387 = vmatpush.msrb.mxu1 %v4073_v39 }
0x18f8   :  { %v3186_v45 = vpop.xlane.xlu1 %3185 }
0x18f9   :  { %v3196_v46 = vmul.f32 %v3186_v45, %v4624_v51 }
0x18fb   :  { %v3200_v47 = vadd.f32 1e-12, %v3196_v46 }
0x18fd   :  { %4337 = vrsqrt.f32 %v3200_v47  ;;  %vm3210_vm1 = vweird.f32 %v3200_v47 }
0x1900   :  { %v3189_v44 = vpop.xlane.xlu2 %3188 }
0x1901   :  { %v3197_v48 = vmul.f32 %v3189_v44, %v4624_v51 }
0x1903   :  { %v4338_v49 = vpop.eup %4337  ;;  %v3201_v50 = vadd.f32 1e-12, %v3197_v48 }
0x1904   :  { %v3205_v57 = vmul.f32 %v4338_v49, %v3200_v47  ;;  %vm3211_vm4 = vweird.f32 %v4338_v49 }
0x1905   :  { %4339 = vrsqrt.f32 %v3201_v50  ;;  %vm3212_vm3 = vmor %vm3210_vm1, %vm3211_vm4  ;;  %vm3220_vm7 = vweird.f32 %v3201_v50 }
0x1906   :  { %v3206_v52 = vmul.f32 %v4338_v49, %v3205_v57 }
0x1908   :  { %v3207_v53 = vmul.f32 0.5, %v3206_v52  ;;  %v3192_v33 = vpop.xlane.xlu0 %3191 }
0x1909   :  { %v3198_v56 = vmul.f32 %v3192_v33, %v4624_v51 }
0x190a   :  { %v3208_v17 = vsub.f32 1.5, %v3207_v53 }
0x190b   :  { %v4340_v59 = vpop.eup %4339  ;;  %v3202_v21 = vadd.f32 1e-12, %v3198_v56 }
0x190c   :  { %v3209_v26 = vmul.f32 %v4338_v49, %v3208_v17  ;;  %v3215_v12 = vmul.f32 %v4340_v59, %v3201_v50  ;;  %vm3221_vm5 = vweird.f32 %v4340_v59 }
0x190d   :  { %4341 = vrsqrt.f32 %v3202_v21  ;;  %vm3222_vm8 = vmor %vm3220_vm7, %vm3221_vm5  ;;  %vm3230_vm10 = vweird.f32 %v3202_v21 }
0x190e   :  { %v3213_v60 = vsel %vm3212_vm3, %v4338_v49, %v3209_v26  ;;  %v3216_v29 = vmul.f32 %v4340_v59, %v3215_v12 }
0x190f   :  { %v3244_v41 = vmul.f32 %v3213_v60, %v3176_v11 }
0x1910   :  { %v3217_v4 = vmul.f32 0.5, %v3216_v29  ;;  %v3195_v23 = vpop.xlane.xlu1 %3194 }
0x1911   :  { %v3251_v13 = vmul.f32 %v4166_v28, %v3244_v41  ;;  %v3199_v14 = vmul.f32 %v3195_v23, %v4624_v51 }
0x1912   :  { %v3218_v30 = vsub.f32 1.5, %v3217_v4 }
0x1913   :  { %v4342_v16 = vpop.eup %4341  ;;  %v5484_v20 = vadd.f32 %v4167_v10, %v3251_v13  ;;  %v3203_v31 = vadd.f32 1e-12, %v3199_v14 }
0x1914   :  { %v3219_v32 = vmul.f32 %v4340_v59, %v3218_v30  ;;  %v3225_v24 = vmul.f32 %v4342_v16, %v3202_v21  ;;  %vm3231_vm9 = vweird.f32 %v4342_v16 }
0x1915   :  { %4343 = vrsqrt.f32 %v3203_v31  ;;  %4066 = vmatmul.msk.f32.vlgmr.msrb.gmra.mxu0 %vm226_vm6, %v5484_v20  ;;  %vm3232_vm11 = vmor %vm3230_vm10, %vm3231_vm9  ;;  %vm3240_vm13 = vweird.f32 %v3203_v31 }
0x1916   :  { %v3223_v22 = vsel %vm3222_vm8, %v4340_v59, %v3219_v32  ;;  %v3226_v55 = vmul.f32 %v4342_v16, %v3225_v24 }
0x1917   :  { %v3245_v61 = vmul.f32 %v3223_v22, %v5457_v35 }
0x1918   :  { %v3227_v7 = vmul.f32 0.5, %v3226_v55 }
0x1919   :  { %v3252_v5 = vmul.f32 %v4166_v28, %v3245_v61 }
0x191a   :  { %v3228_v27 = vsub.f32 1.5, %v3227_v7 }
0x191b   :  { %v4344_v25 = vpop.eup %4343  ;;  %v5489_v9 = vadd.f32 %v4167_v10, %v3252_v5 }
0x191c   :  { %v3229_v3 = vmul.f32 %v4342_v16, %v3228_v27  ;;  %v3235_v11 = vmul.f32 %v4344_v25, %v3203_v31  ;;  %vm3241_vm12 = vweird.f32 %v4344_v25 }
0x191d   :  { %4067 = vmatmul.msk.f32.gmra.mxu0 %vm226_vm6, %v5489_v9  ;;  %vm3242_vm14 = vmor %vm3240_vm13, %vm3241_vm12  ;;  %vm3628_vm12 = vcmask 130048  }
0x191e   :  { %v3233_v2 = vsel %vm3232_vm11, %v4342_v16, %v3229_v3  ;;  %v3236_v63 = vmul.f32 %v4344_v25, %v3235_v11 }
0x191f   :  { %v3246_v58 = vmul.f32 %v3233_v2, %v5463_v6 }
0x1920   :  { %v3237_v34 = vmul.f32 0.5, %v3236_v63 }
0x1921   :  { %v3253_v35 = vmul.f32 %v4166_v28, %v3246_v58 }
0x1922   :  { %v3238_v1 = vsub.f32 1.5, %v3237_v34 }
0x1923   :  { %v5494_v54 = vadd.f32 %v4167_v10, %v3253_v35 }
0x1924   :  { %v3239_v62 = vmul.f32 %v4344_v25, %v3238_v1  ;;  %v4169_v1 = vld [vmem:[%s5608_s25 + $0x1] ss:$0 sm:$0xff] }
0x1925   :  { %4068 = vmatmul.msk.f32.gmra.mxu0 %vm226_vm6, %v5494_v54 }
0x1926   :  { %v3243_v15 = vsel %vm3242_vm14, %v4344_v25, %v3239_v62 }
0x1927   :  { %v3247_v6 = vmul.f32 %v3243_v15, %v5469_v18  ;;  %v4072_v18 = vld [vmem:[%s5606_s17 + $0x50] sm:$0xff] }
0x1928   :  { %3388 = vmatpush.msrb.mxu1 %v4072_v18 }
0x1929   :  { %v3254_v0 = vmul.f32 %v4166_v28, %v3247_v6 }
0x192a   :  { %3389 = vmatpush.msrb.mxu1 %v4071_v40 }
0x192b   :  { %v5499_v8 = vadd.f32 %v4167_v10, %v3254_v0 }
0x192c   :  { %3390 = vmatpush.msrb.mxu1 %v4070_v42 }
0x192d   :  { %4069 = vmatmul.msk.f32.gmra.mxu0 %vm226_vm6, %v5499_v8 }
0x1992   :  { %v3301_v45 = vpop.f32.mrf.mxu0 }
0x1993   :  { %v3302_v46 = vadd.f32 %v4168_v43, %v3301_v45 }
0x1995   :  { %v3313_v47 = vmul.f32 %v3302_v46, %v3302_v46 }
0x1997   :  { %v3317_v44 = vmul.f32 %v3313_v47, %v3302_v46 }
0x1999   :  { %v3321_v48 = vmul.f32 0.044715, %v3317_v44 }
0x199a   :  { %v3304_v49 = vpop.f32.mrf.mxu0 }
0x199b   :  { %v3325_v50 = vadd.f32 %v3321_v48, %v3302_v46  ;;  %v3305_v57 = vadd.f32 %v4168_v43, %v3304_v49 }
0x199d   :  { %v3329_v52 = vmul.f32 0.7978846, %v3325_v50  ;;  %v3314_v53 = vmul.f32 %v3305_v57, %v3305_v57 }
0x199f   :  { %4345 = vtanh.f32 %v3329_v52  ;;  %v3318_v33 = vmul.f32 %v3314_v53, %v3305_v57 }
0x19a1   :  { %v3322_v56 = vmul.f32 0.044715, %v3318_v33 }
0x19a2   :  { %v3307_v17 = vpop.f32.mrf.mxu0 }
0x19a3   :  { %v3326_v59 = vadd.f32 %v3322_v56, %v3305_v57  ;;  %v3308_v21 = vadd.f32 %v4168_v43, %v3307_v17 }
0x19a5   :  { %v4346_v26 = vpop.eup %4345  ;;  %v3330_v12 = vmul.f32 0.7978846, %v3326_v59  ;;  %v3315_v28 = vmul.f32 %v3308_v21, %v3308_v21 }
0x19a6   :  { %v3337_v60 = vadd.f32 1.0, %v4346_v26 }
0x19a7   :  { %4347 = vtanh.f32 %v3330_v12  ;;  %v3319_v29 = vmul.f32 %v3315_v28, %v3308_v21 }
0x19a8   :  { %v3341_v10 = vmul.f32 0.5, %v3337_v60 }
0x19a9   :  { %v3323_v41 = vmul.f32 0.044715, %v3319_v29 }
0x19aa   :  { %v3345_v4 = vmul.f32 %v3341_v10, %v3302_v46  ;;  %v3310_v23 = vpop.f32.mrf.mxu0 }
0x19ab   :  { %v3327_v13 = vadd.f32 %v3323_v41, %v3308_v21  ;;  %v3311_v14 = vadd.f32 %v4168_v43, %v3310_v23 }
0x19ac   :  { %4079 = vmatmul.msk.f32.vlgmr.msrb.gmra.mxu1 %vm1770_vm2, %v3345_v4 }
0x19ad   :  { %v4348_v30 = vpop.eup %4347  ;;  %v3331_v16 = vmul.f32 0.7978846, %v3327_v13  ;;  %v3316_v31 = vmul.f32 %v3311_v14, %v3311_v14 }
0x19ae   :  { %v3338_v32 = vadd.f32 1.0, %v4348_v30 }
0x19af   :  { %4349 = vtanh.f32 %v3331_v16  ;;  %v3320_v24 = vmul.f32 %v3316_v31, %v3311_v14 }
0x19b0   :  { %v3342_v22 = vmul.f32 0.5, %v3338_v32 }
0x19b1   :  { %v3324_v55 = vmul.f32 0.044715, %v3320_v24 }
0x19b2   :  { %v3346_v61 = vmul.f32 %v3342_v22, %v3305_v57 }
0x19b3   :  { %v3328_v7 = vadd.f32 %v3324_v55, %v3311_v14 }
0x19b4   :  { %4080 = vmatmul.msk.f32.gmra.mxu1 %vm1770_vm2, %v3346_v61 }
0x19b5   :  { %v4350_v5 = vpop.eup %4349  ;;  %v3332_v27 = vmul.f32 0.7978846, %v3328_v7 }
0x19b6   :  { %v3339_v25 = vadd.f32 1.0, %v4350_v5 }
0x19b7   :  { %4351 = vtanh.f32 %v3332_v27 }
0x19b8   :  { %v3343_v3 = vmul.f32 0.5, %v3339_v25 }
0x19ba   :  { %v3347_v11 = vmul.f32 %v3343_v3, %v3308_v21 }
0x19bc   :  { %4081 = vmatmul.msk.f32.gmra.mxu1 %vm1770_vm2, %v3347_v11 }
0x19bd   :  { %v4352_v2 = vpop.eup %4351 }
0x19be   :  { %v3340_v63 = vadd.f32 1.0, %v4352_v2 }
0x19c0   :  { %v3344_v58 = vmul.f32 0.5, %v3340_v63 }
0x19c2   :  { %v3348_v34 = vmul.f32 %v3344_v58, %v3311_v14 }
0x19c4   :  { %4082 = vmatmul.msk.f32.gmra.mxu1 %vm1770_vm2, %v3348_v34 }
0x1a29   :  { %v3392_v35 = vpop.f32.mrf.mxu1 }
0x1a2a   :  { %v3393_v42 = vadd.f32 %v4169_v1, %v3392_v35 }
0x1a31   :  { %v3395_v62 = vpop.f32.mrf.mxu1 }
0x1a32   :  { %v3396_v15 = vadd.f32 %v4169_v1, %v3395_v62 }
0x1a34   :  { %v3405_v6 = vadd.f32 %v3396_v15, %v5489_v9  ;;  %v3404_v9 = vadd.f32 %v3393_v42, %v5484_v20 }
0x1a36   :  { %v3415_v0 = vsel %vm226_vm6, %v3405_v6, 0.0  ;;  %v3412_v45 = vsel %vm226_vm6, %v3404_v9, 0.0 }
0x1a37   :  { %3416 = vadd.xlane.f32.xlu1 %v3415_v0 }
0x1a39   :  { %v3398_v36 = vpop.f32.mrf.mxu1 }
0x1a3a   :  { %v3399_v19 = vadd.f32 %v4169_v1, %v3398_v36 }
0x1a3c   :  { %v3406_v37 = vadd.f32 %v3399_v19, %v5494_v54 }
0x1a3e   :  { %v3418_v38 = vsel %vm226_vm6, %v3406_v37, 0.0 }
0x1a3f   :  { %3419 = vadd.xlane.f32.xlu0 %v3418_v38 }
0x1a41   :  { %v3401_v39 = vpop.f32.mrf.mxu1 }
0x1a42   :  { %v3402_v18 = vadd.f32 %v4169_v1, %v3401_v39 }
0x1a44   :  { %v3407_v40 = vadd.f32 %v3402_v18, %v5499_v8  ;;  %v4170_v18 = vld [vmem:[%s5609_s22 + $0x1] ss:$0 sm:$0xff] }
0x1a46   :  { %v3421_v43 = vsel %vm226_vm6, %v3407_v40, 0.0 }
0x1a47   :  { %3422 = vadd.xlane.f32.xlu2 %v3421_v43 }
0x1a4f   :  { %3413 = vadd.xlane.f32.xlu2 %v3412_v45 }
0x1aaa   :  { %v3417_v46 = vpop.xlane.xlu1 %3416 }
0x1aab   :  { %v3425_v47 = vmul.f32 %v3417_v46, %v4624_v51 }
0x1aad   :  { %v5526_v54 = vsub.f32 %v3405_v6, %v3425_v47 }
0x1aaf   :  { %v3433_v44 = vmul.f32 %v5526_v54, %v5526_v54 }
0x1ab1   :  { %v3439_v48 = vsel %vm226_vm6, %v3433_v44, 0.0 }
0x1ab2   :  { %3440 = vadd.xlane.f32.xlu2 %v3439_v48  ;;  %v3420_v8 = vpop.xlane.xlu0 %3419 }
0x1ab3   :  { %v3426_v49 = vmul.f32 %v3420_v8, %v4624_v51 }
0x1ab5   :  { %v5532_v50 = vsub.f32 %v3406_v37, %v3426_v49 }
0x1ab7   :  { %v3434_v20 = vmul.f32 %v5532_v50, %v5532_v50 }
0x1ab9   :  { %v3442_v57 = vsel %vm226_vm6, %v3434_v20, 0.0 }
0x1aba   :  { %v3423_v52 = vpop.xlane.xlu2 %3422  ;;  %3443 = vadd.xlane.f32.xlu1 %v3442_v57 }
0x1abb   :  { %v3427_v53 = vmul.f32 %v3423_v52, %v4624_v51  ;;  %v3514_v52 = vld [vmem:[%s5611_s9] sm:$0x3] }
0x1abd   :  { %v3431_v33 = vsub.f32 %v3407_v40, %v3427_v53  ;;  %v3538_v53 = vld [vmem:[%s5612_s29] sm:$0x3] }
0x1abf   :  { %v3435_v56 = vmul.f32 %v3431_v33, %v3431_v33 }
0x1ac1   :  { %v3445_v17 = vsel %vm226_vm6, %v3435_v56, 0.0  ;;  %v3596_v56 = vld [vmem:[%s5614_s8 + $0x18] sm:$0xff] }
0x1ac2   :  { %v3414_v59 = vpop.xlane.xlu2 %3413  ;;  %3446 = vadd.xlane.f32.xlu0 %v3445_v17  ;;  %v3564_v17 = vld [vmem:[%s5613_s3 + $0x10] sm:$0xff] }
0x1ac3   :  { %v3424_v21 = vmul.f32 %v3414_v59, %v4624_v51  ;;  %v3595_v59 = vld [vmem:[%s5614_s8 + $0x10] sm:$0xff] }
0x1ac5   :  { %v5540_v26 = vsub.f32 %v3404_v9, %v3424_v21  ;;  %v4171_v9 = vld [vmem:[%s5610_s23 + $0x1] ss:$0 sm:$0xff]  ;;  %v3563_v21 = vld [vmem:[%s5613_s3 + $0x8] sm:$0xff] }
0x1ac7   :  { %v3432_v12 = vmul.f32 %v5540_v26, %v5540_v26 }
0x1ac9   :  { %v3436_v28 = vsel %vm226_vm6, %v3432_v12, 0.0  ;;  %v3562_v12 = vld [vmem:[%s5613_s3] sm:$0xff] }
0x1aca   :  { %3437 = vadd.xlane.f32.xlu0 %v3436_v28  ;;  %v3593_v28 = vld [vmem:[%s5614_s8] sm:$0xff] }
0x1b25   :  { %v3441_v60 = vpop.xlane.xlu2 %3440 }
0x1b26   :  { %v3449_v29 = vmul.f32 %v3441_v60, %v4624_v51 }
0x1b28   :  { %v3453_v10 = vadd.f32 1e-12, %v3449_v29 }
0x1b2a   :  { %4353 = vrsqrt.f32 %v3453_v10  ;;  %vm3472_vm1 = vweird.f32 %v3453_v10 }
0x1b2d   :  { %v3444_v41 = vpop.xlane.xlu1 %3443 }
0x1b2e   :  { %v3450_v4 = vmul.f32 %v3444_v41, %v4624_v51  ;;  %v3625_v41 = vld [vmem:[%s4578_s27 + $0x8] sm:$0xff] }
0x1b30   :  { %v3454_v23 = vadd.f32 1e-12, %v3450_v4  ;;  %v4354_v13 = vpop.eup %4353  ;;  %v3626_v4 = vld [vmem:[%s4583_s4] sm:$0xff] }
0x1b31   :  { %v3467_v14 = vmul.f32 %v4354_v13, %v3453_v10  ;;  %vm3473_vm15 = vweird.f32 %v4354_v13  ;;  %v3627_v10 = vld [vmem:[%s4583_s4 + $0x8] sm:$0xff]  ;;  %s4385_s4 = scalar_lea.hbm %s4593_s20, 2 }
0x1b32   :  { %4355 = vrsqrt.f32 %v3454_v23  ;;  %vm3482_vm0 = vweird.f32 %v3454_v23  ;;  %vm3474_vm5 = vmor %vm3472_vm1, %vm3473_vm15 }
0x1b33   :  { %v3468_v24 = vmul.f32 %v4354_v13, %v3467_v14  ;;  %v4173_v14 = vld [vmem:[%s5616_s19] ss:$0 sm:$0xff] }
0x1b35   :  { %v3447_v30 = vpop.xlane.xlu0 %3446  ;;  %v3469_v61 = vmul.f32 0.5, %v3468_v24  ;;  %v4174_v24 = vld [vmem:[%s4588_s12] ss:$0 sm:$0xff]  ;;  %s4381_s12 = sshra.s32 %s3714_s6, 4  ;;  %s4382_s12 = int_to_ptr.hbm [resolvable:$true] %s4381_s12 }
0x1b36   :  { %v3451_v16 = vmul.f32 %v3447_v30, %v4624_v51  ;;  %p4386_p1 = scmp.lt.s32.totalorder %s4382_s12, %s4593_s20 }
0x1b37   :  { %v3470_v2 = vsub.f32 1.5, %v3469_v61 }
0x1b38   :  { %v4356_v31 = vpop.eup %4355  ;;  %v3455_v32 = vadd.f32 1e-12, %v3451_v16 }
0x1b39   :  { %v3477_v22 = vmul.f32 %v4356_v31, %v3454_v23  ;;  %vm3483_vm2 = vweird.f32 %v4356_v31  ;;  %v3471_v35 = vmul.f32 %v4354_v13, %v3470_v2  ;;  %v3624_v23 = vld [vmem:[%s4578_s27] sm:$0xff]  ;;  %s4383_s27 = scalar_lea.hbm %s4382_s12, 2 }
0x1b3a   :  { %4357 = vrsqrt.f32 %v3455_v32  ;;  %vm3484_vm4 = vmor %vm3482_vm0, %vm3483_vm2  ;;  %vm3492_vm7 = vweird.f32 %v3455_v32  ;;  %p4384_p0 = scmp.ne.s32.totalorder %s4382_s12, %s4383_s27  ;;  %p4387_p2 = scmp.lt.s32.totalorder %s4385_s4, %s4383_s27 }
0x1b3b   :  { %v3478_v55 = vmul.f32 %v4356_v31, %v3477_v22  ;;  %v3475_v6 = vsel %vm3474_vm5, %v4354_v13, %v3471_v35  ;;  %v4172_v13 = vld [vmem:[%s5615_s14] ss:$0 sm:$0xff] }
0x1b3c   :  { %v3497_v40 = vmul.f32 %v3475_v6, %v5526_v54  ;;  %p4388_p3 = por %p4387_p2, %p4386_p1 }
0x1b3d   :  { %v3479_v7 = vmul.f32 0.5, %v3478_v55  ;;  %v3438_v5 = vpop.xlane.xlu0 %3437 }
0x1b3e   :  { %v3448_v27 = vmul.f32 %v3438_v5, %v4624_v51  ;;  %v3504_v44 = vmul.f32 %v4170_v18, %v3497_v40  ;;  %p4389_p4 = pnand %p4388_p3, %p4384_p0 }
0x1b3f   :  { %v3480_v25 = vsub.f32 1.5, %v3479_v7 }
0x1b40   :  { %v4358_v3 = vpop.eup %4357  ;;  %v3452_v11 = vadd.f32 1e-12, %v3448_v27  ;;  %v3511_v54 = vadd.f32 %v4171_v9, %v3504_v44 }
0x1b41   :  { %v3487_v63 = vmul.f32 %v4358_v3, %v3455_v32  ;;  %v3481_v58 = vmul.f32 %v4356_v31, %v3480_v25  ;;  %vm3493_vm3 = vweird.f32 %v4358_v3 }
0x1b42   :  { %4359 = vrsqrt.f32 %v3452_v11  ;;  %vm3494_vm8 = vmor %vm3492_vm7, %vm3493_vm3  ;;  %vm3462_vm10 = vweird.f32 %v3452_v11 }
0x1b43   :  { %v3488_v34 = vmul.f32 %v4358_v3, %v3487_v63  ;;  %v3485_v62 = vsel %vm3484_vm4, %v4356_v31, %v3481_v58 }
0x1b44   :  { %v3498_v19 = vmul.f32 %v3485_v62, %v5532_v50 }
0x1b45   :  { %v3489_v1 = vmul.f32 0.5, %v3488_v34 }
0x1b46   :  { %v3505_v45 = vmul.f32 %v4170_v18, %v3498_v19 }
0x1b47   :  { %v3490_v15 = vsub.f32 1.5, %v3489_v1 }
0x1b48   :  { %v4360_v51 = vpop.eup %4359  ;;  %v3512_v8 = vadd.f32 %v4171_v9, %v3505_v45 }
0x1b49   :  { %v3491_v0 = vmul.f32 %v4358_v3, %v3490_v15  ;;  %v3457_v36 = vmul.f32 %v4360_v51, %v3452_v11  ;;  %vm3463_vm9 = vweird.f32 %v4360_v51 }
0x1b4a   :  { %vm3464_vm11 = vmor %vm3462_vm10, %vm3463_vm9 }
0x1b4b   :  { %v3495_v37 = vsel %vm3494_vm8, %v4358_v3, %v3491_v0  ;;  %v3458_v38 = vmul.f32 %v4360_v51, %v3457_v36 }
0x1b4c   :  { %v3499_v39 = vmul.f32 %v3495_v37, %v3431_v33  ;;  %v3565_v33 = vld [vmem:[%s5613_s3 + $0x18] sm:$0xff] }
0x1b4d   :  { %v3459_v42 = vmul.f32 0.5, %v3458_v38 }
0x1b4e   :  { %v3506_v43 = vmul.f32 %v4170_v18, %v3499_v39 }
0x1b4f   :  { %v3460_v46 = vsub.f32 1.5, %v3459_v42 }
0x1b50   :  { %v3513_v47 = vadd.f32 %v4171_v9, %v3506_v43 }
0x1b51   :  { %v3461_v48 = vmul.f32 %v4360_v51, %v3460_v46 }
0x1b52   :  { %3530 = vmatpush.msrb.mxu2 %v3513_v47  ;;  %3554 = vmatpush.msrb.mxu3 %v3513_v47 }
0x1b53   :  { %v3465_v49 = vsel %vm3464_vm11, %v4360_v51, %v3461_v48 }
0x1b54   :  { %3531 = vmatpush.msrb.mxu2 %v3512_v8  ;;  %3555 = vmatpush.msrb.mxu3 %v3512_v8  ;;  %v3496_v50 = vmul.f32 %v3465_v49, %v5540_v26  ;;  %v3594_v26 = vld [vmem:[%s5614_s8 + $0x8] sm:$0xff] }
0x1b56   :  { %3532 = vmatpush.msrb.mxu2 %v3511_v54  ;;  %3556 = vmatpush.msrb.mxu3 %v3511_v54  ;;  %v3503_v20 = vmul.f32 %v4170_v18, %v3496_v50 }
0x1b58   :  { %v3510_v57 = vadd.f32 %v4171_v9, %v3503_v20 }
0x1b5a   :  { %3533 = vmatpush.msrb.mxu2 %v3510_v57  ;;  %3557 = vmatpush.msrb.mxu3 %v3510_v57 }
0x1b5b   :  { %4085 = vmatmul.msk.f32.vlgmr.msrb.gmra.mxu2 %vm226_vm6, %v3514_v52  ;;  %4086 = vmatmul.msk.f32.vlgmr.msrb.gmra.mxu3 %vm226_vm6, %v3538_v53 }
0x1b5c   :  { %3585 = vmatpush.msra.mxu2 %v3565_v33  ;;  %3616 = vmatpush.msra.mxu3 %v3596_v56 }
0x1b5e   :  { %3586 = vmatpush.msra.mxu2 %v3564_v17  ;;  %3617 = vmatpush.msra.mxu3 %v3595_v59 }
0x1b60   :  { %3587 = vmatpush.msra.mxu2 %v3563_v21  ;;  %3618 = vmatpush.msra.mxu3 %v3594_v26 }
0x1b62   :  { %3588 = vmatpush.msra.mxu2 %v3562_v12  ;;  %3619 = vmatpush.msra.mxu3 %v3593_v28 }
0x1b64   :  { %3646 = vmatpush.msrb.mxu2 %v3627_v10  ;;  %3669 = vmatpush.msrb.mxu3 %v3625_v41 }
0x1b66   :  { %3647 = vmatpush.msrb.mxu2 %v3626_v4  ;;  %3670 = vmatpush.msrb.mxu3 %v3624_v23 }
0x1bde   :  { %v3535_v60 = vpop.f32.mrf.mxu2  ;;  %v3559_v29 = vpop.f32.mrf.mxu3 }
0x1bdf   :  { %4087 = vmatmul.msk.f32.vlgmr.msra.gmra.mxu2 %vm226_vm6, %v3535_v60  ;;  %4088 = vmatmul.msk.f32.vlgmr.msra.gmra.mxu3 %vm226_vm6, %v3559_v29  ;;  %vm3680_vm6 = vcmask 1041408  }
0x1c62   :  { %v3590_v30 = vpop.f32.mrf.mxu2  ;;  %v3621_v16 = vpop.f32.mrf.mxu3 }
0x1c63   :  { %v3591_v31 = vadd.f32 %v4172_v13, %v3590_v30  ;;  %v3622_v32 = vadd.f32 %v4173_v14, %v3621_v16 }
0x1c65   :  { %4089 = vmatmul.msk.f32.vlgmr.msrb.gmra.mxu2 %vm3628_vm12, %v3622_v32  ;;  %4090 = vmatmul.msk.f32.vlgmr.msrb.gmra.mxu3 %vm3628_vm12, %v3591_v31 }
0x1ce8   :  { %v3649_v22 = vpop.f32.mrf.mxu2  ;;  %v3672_v55 = vpop.f32.mrf.mxu3 }
0x1ce9   :  { %v3673_v61 = vadd.f32 %v3672_v55, %v3649_v22 }
0x1ceb   :  { %v3679_v7 = vadd.f32 %v4174_v24, %v3673_v61 }
0x1ced   :  { %v3681_v5 = vsel %vm3680_vm6, %v3679_v7, -inf }
0x1cee   :  { %3682 = vmax.xlane.f32.xlu1 %v3681_v5 }
0x1d61   :  { %v3683_v27 = vpop.xlane.xlu1 %3682 }
0x1d62   :  { %v3684_v25 = vsub.f32 %v3679_v7, %v3683_v27 }
0x1d64   :  { %v3685_v3 = vmul.f32 1.442695, %v3684_v25 }
0x1d66   :  { %4361 = vpow2.f32 %v3685_v3 }
0x1d6c   :  { %v4362_v11 = vpop.eup %4361 }
0x1d6d   :  { %v3687_v2 = vsel %vm3680_vm6, %v4362_v11, 0.0 }
0x1d6e   :  { %3688 = vadd.xlane.f32.xlu2 %v3687_v2 }
0x1de1   :  { %v3689_v63 = vpop.xlane.xlu2 %3688 }
0x1de2   :  { %4363 = vrcp.f32 %v3689_v63  ;;  %v3701_v1 = vand.u32 2147483648, %v3689_v63  ;;  %v3699_v15 = vand.u32 2147483647, %v3689_v63  ;;  %vm3695_vm14 = vweird.f32 %v3689_v63 }
0x1de4   :  { %v3702_v6 = vor.u32 1.1754944e-38, %v3701_v1  ;;  %vm3700_vm15 = vcmp.eq.f32.partialorder %v3699_v15, 8.507059e+37 }
0x1de8   :  { %v4364_v58 = vpop.eup %4363 }
0x1de9   :  { %v3691_v34 = vmul.f32 %v4364_v58, %v3689_v63  ;;  %vm3696_vm13 = vweird.f32 %v4364_v58 }
0x1dea   :  { %vm3697_vm2 = vmor %vm3695_vm14, %vm3696_vm13 }
0x1deb   :  { %v3692_v35 = vsub.f32 1.0, %v3691_v34 }
0x1ded   :  { %v3693_v62 = vmul.f32 %v4364_v58, %v3692_v35 }
0x1def   :  { %v3694_v51 = vadd.f32 %v4364_v58, %v3693_v62 }
0x1df1   :  { %v3698_v0 = vsel %vm3697_vm2, %v4364_v58, %v3694_v51 }
0x1df2   :  { %v3703_v36 = vsel %vm3700_vm15, %v3702_v6, %v3698_v0 }
0x1df3   :  { %v3704_v19 = vmul.f32 %v4362_v11, %v3703_v36 }
0x1df5   :  { %3705 = vst [vmem:[#allocation2] sm:$0x3] %v3704_v19 }
0x1df6   :  { %4392 = shalt.err (!%p4389_p4)
}
0x1df7   :  { %3716 = dma.vmem_to_hbm [thread:$0]  %s3712_s30, 32, %s3714_s6, [#allocation3]  }
0x1df8   :  { %4393 = dma.done.wait [#allocation3], 32  }
0x1df9   :  { %4394 = vsyncadd [#allocation3], 4294967264 }
0x1dfa   :  { %3721 = vsyncpa [#allocation3], 1 }

</bundles_post_ra>
